<compile_context>
chip_gen: v5e
topology: v5e:2x2
jax: 0.10.0
libtpu: 0.0.40
codegen_flags: <defaults>
</compile_context>

<pallas_src>
import numpy as np
import jax
import jax.numpy as jnp
from jax.experimental import pallas as pl
from jax.experimental.pallas import tpu as pltpu


# ----------------------------------------------------------------------------
# tiling helpers
# ----------------------------------------------------------------------------
def _pick_row_tile(n, pref=512):
    """Largest row tile <= pref that divides n (or n itself if n <= pref)."""
    if n <= pref:
        return n
    for t in (pref, 256, 128, 64, 32, 16, 8):
        if n % t == 0:
            return t
    return n  # fallback: single full-extent block (only for non-8-divisible n)


# ----------------------------------------------------------------------------
# Pallas kernel 1: backbone + cnn_attn + cnn_attn_channal, fully fused
# ----------------------------------------------------------------------------
def _backbone_fused_kernel(p_ref, wb_ref, bb_ref, wa_ref, ba_ref, wc_ref, bc_ref,
                           bf_ref, res_ref):
    # feat = patches @ W_backbone + b  (bf16 in, f32 accumulate) -- stays in VMEM.
    feat = jnp.dot(p_ref[...], wb_ref[...],
                   preferred_element_type=jnp.float32) + bb_ref[...]
    # cnn_attn: 1024 -> 3, consuming feat while resident (no HBM round trip).
    box_feat = jnp.dot(feat, wa_ref[...],
                       preferred_element_type=jnp.float32) + ba_ref[...]
    bf_ref[...] = box_feat.astype(bf_ref.dtype)
    # cnn_attn_channal: 3 -> 256 as three VPU broadcast-FMAs (K=3 off the MXU).
    res = bc_ref[...] + box_feat[:, 0:1] * wc_ref[0:1, :]
    res = res + box_feat[:, 1:2] * wc_ref[1:2, :]
    res = res + box_feat[:, 2:3] * wc_ref[2:3, :]
    res_ref[...] = res.astype(res_ref.dtype)


def backbone_fused(patches, wb, bb, wa, ba, wc, bc):
    """Returns (box_feat (M,3), res_image (M,256)); feat never leaves VMEM."""
    M, Kp = patches.shape
    Kf = wb.shape[1]          # 1024
    N3 = wa.shape[1]          # 3
    Nr = wc.shape[1]          # 256
    tm = _pick_row_tile(M, 512)
    return pl.pallas_call(
        _backbone_fused_kernel,
        out_shape=(jax.ShapeDtypeStruct((M, N3), jnp.float32),
                   jax.ShapeDtypeStruct((M, Nr), jnp.float32)),
        grid_spec=pltpu.PrefetchScalarGridSpec(
            num_scalar_prefetch=0,
            grid=(M // tm,),
            in_specs=[
                pl.BlockSpec((tm, Kp), lambda i: (i, 0)),
                pl.BlockSpec((Kp, Kf), lambda i: (0, 0)),   # resident weight
                pl.BlockSpec((1, Kf), lambda i: (0, 0)),
                pl.BlockSpec((Kf, N3), lambda i: (0, 0)),
                pl.BlockSpec((1, N3), lambda i: (0, 0)),
                pl.BlockSpec((N3, Nr), lambda i: (0, 0)),
                pl.BlockSpec((1, Nr), lambda i: (0, 0)),
            ],
            out_specs=(pl.BlockSpec((tm, N3), lambda i: (i, 0)),
                       pl.BlockSpec((tm, Nr), lambda i: (i, 0))),
        ),
        compiler_params=pltpu.CompilerParams(dimension_semantics=("parallel",)),
    )(patches, wb, bb.reshape(1, Kf), wa, ba.reshape(1, N3), wc, bc.reshape(1, Nr))


# ----------------------------------------------------------------------------
# Pallas kernel 2: image_encoder(3->256) + res add + pe add + decoder matvec
# ----------------------------------------------------------------------------
def _encode_mask_kernel(e_ref, r_ref, pe_ref, we_ref, v_ref, o_ref):
    # src = image_embedding + pe = (enc_in @ W_enc) + res_image + pe  (VPU FMAs),
    # then the (linear) decoder head reduces to a per-row dot with v_b.
    e = e_ref[...]                                   # (tm, 3)
    src = r_ref[...] + pe_ref[...]
    src = src + e[:, 0:1] * we_ref[0:1, :]
    src = src + e[:, 1:2] * we_ref[1:2, :]
    src = src + e[:, 2:3] * we_ref[2:3, :]
    o_ref[...] = jnp.sum(src * v_ref[...], axis=1, keepdims=True).astype(o_ref.dtype)


def encode_and_mask(enc_in, res, pe, enc_w, v):
    """enc_in (B,L,3), res (B,L,256), pe (L,256), v (B,256) -> masks_low (B,L,1)."""
    B, L, _ = enc_in.shape
    C = res.shape[-1]
    tm = _pick_row_tile(L, 512)
    v3 = v.reshape(B, 1, C)
    return pl.pallas_call(
        _encode_mask_kernel,
        out_shape=jax.ShapeDtypeStruct((B, L, 1), jnp.float32),
        grid_spec=pltpu.PrefetchScalarGridSpec(
            num_scalar_prefetch=0,
            grid=(L // tm, B),      # batch innermost: pe tile (index only on i) revisited
            in_specs=[
                pl.BlockSpec((None, tm, 3), lambda i, b: (b, i, 0)),
                pl.BlockSpec((None, tm, C), lambda i, b: (b, i, 0)),
                pl.BlockSpec((tm, C), lambda i, b: (i, 0)),
                pl.BlockSpec((3, C), lambda i, b: (0, 0)),
                pl.BlockSpec((None, 1, C), lambda i, b: (b, 0, 0)),
            ],
            out_specs=pl.BlockSpec((None, tm, 1), lambda i, b: (b, i, 0)),
        ),
        compiler_params=pltpu.CompilerParams(
            dimension_semantics=("parallel", "parallel")),
    )(enc_in, res, pe, enc_w, v3)


# ----------------------------------------------------------------------------
# Pallas kernel 3: separable linear resize (used once, for the final H x W map)
# ----------------------------------------------------------------------------
def _resize_kernel(ah_ref, x_ref, awt_ref, o_ref):
    tmp = jnp.dot(ah_ref[...], x_ref[...], preferred_element_type=jnp.float32)
    o_ref[...] = jnp.dot(tmp, awt_ref[...],
                         preferred_element_type=jnp.float32).astype(o_ref.dtype)


def resize2d(x, a_h, a_w):
    """out[b] = a_h @ x[b] @ a_w.T  per batch map (all f32, exact composition)."""
    BC, in_h, in_w = x.shape
    a_h = jnp.asarray(a_h, dtype=jnp.float32)
    awt = jnp.asarray(a_w, dtype=jnp.float32).T           # (in_w, out_w)
    out_h = a_h.shape[0]
    out_w = awt.shape[1]
    tm = _pick_row_tile(out_h, 256)   # bound live (tm,in_w) intermediate (v5e store slot)
    return pl.pallas_call(
        _resize_kernel,
        out_shape=jax.ShapeDtypeStruct((BC, out_h, out_w), x.dtype),
        grid_spec=pltpu.PrefetchScalarGridSpec(
            num_scalar_prefetch=0,
            grid=(BC, out_h // tm),   # x (index only on b) revisited across inner i
            in_specs=[
                pl.BlockSpec((tm, in_h), lambda b, i: (i, 0)),
                pl.BlockSpec((None, in_h, in_w), lambda b, i: (b, 0, 0)),
                pl.BlockSpec((in_w, out_w), lambda b, i: (0, 0)),
            ],
            out_specs=pl.BlockSpec((None, tm, out_w), lambda b, i: (b, i, 0)),
        ),
        compiler_params=pltpu.CompilerParams(
            dimension_semantics=("parallel", "parallel")),
    )(a_h, x, awt)


# ----------------------------------------------------------------------------
# Glue: interpolation / pooling matrices, prompt encoder, parameters
# ----------------------------------------------------------------------------
def bilinear_matrix(out_size, in_size, align_corners):
    """Row-interpolation matrix matching F.interpolate(mode='bilinear')."""
    i = np.arange(out_size, dtype=np.float64)
    if align_corners:
        src = i * (in_size - 1) / (out_size - 1) if out_size > 1 else np.zeros_like(i)
    else:
        src = (i + 0.5) * in_size / out_size - 0.5
        src = np.clip(src, 0.0, None)
    x0 = np.clip(np.floor(src).astype(np.int64), 0, in_size - 1)
    x1 = np.minimum(x0 + 1, in_size - 1)
    frac = src - x0
    A = np.zeros((out_size, in_size), dtype=np.float32)
    A[np.arange(out_size), x0] += (1.0 - frac)
    A[np.arange(out_size), x1] += frac
    return A


def avgpool_matrix(out_size, in_size):
    p = in_size // out_size
    A = np.zeros((out_size, in_size), dtype=np.float32)
    for i in range(out_size):
        A[i, i * p:(i + 1) * p] = 1.0 / p
    return A


def prompt_encode(box, params, hf, wf, input_size=1024.0):
    """Stand-in for SAM prompt_encoder (frozen): random-Fourier box PE.
    Returns sparse (B,2,256) and flattened dense_pe (hf*wf,256)."""
    B = box.shape[0]
    G = params["pe_gauss"]  # (2,128)

    def pe(coords):  # coords in [0,1], (...,2)
        c = 2.0 * coords - 1.0
        proj = 2.0 * jnp.pi * (c @ G)
        return jnp.concatenate([jnp.sin(proj), jnp.cos(proj)], axis=-1)

    if box.ndim == 2:           # mirrors `box_torch[:, None, :]`
        box = box[:, None, :]
    corners = (box.reshape(B, 2, 2) + 0.5) / input_size
    sparse = pe(corners) + params["corner_embed"]              # (B,2,256)
    ys = (jnp.arange(hf, dtype=jnp.float32) + 0.5) / hf
    xs = (jnp.arange(wf, dtype=jnp.float32) + 0.5) / wf
    gy, gx = jnp.meshgrid(ys, xs, indexing="ij")
    dense_pe = pe(jnp.stack([gx, gy], axis=-1))                # (hf,wf,256)
    return sparse, dense_pe.reshape(hf * wf, 256)


def init_params(key):
    ks = jax.random.split(key, 10)

    def nrm(k, shape, scale=0.02):
        return scale * jax.random.normal(k, shape, dtype=jnp.float32)

    return dict(
        # TODO(synk): resnet50[:-3] backbone replaced by one 16x16/stride-16 patchify conv 3->1024.
        backbone_w=nrm(ks[0], (3 * 16 * 16, 1024)),
        backbone_b=jnp.zeros((1024,), jnp.float32),
        cnn_attn_w=nrm(ks[1], (1024, 3)),        # nn.Conv2d(1024, 3, 1)
        cnn_attn_b=jnp.zeros((3,), jnp.float32),
        attn_ch_w=nrm(ks[2], (3, 256)),          # nn.Conv2d(3, 256, 1)
        attn_ch_b=jnp.zeros((256,), jnp.float32),
        enc_w=nrm(ks[3], (3, 256)),              # image_encoder stand-in 1x1 conv
        enc_b=jnp.zeros((256,), jnp.float32),
        pe_gauss=jax.random.normal(ks[4], (2, 128), dtype=jnp.float32),
        corner_embed=nrm(ks[5], (2, 256)),
        no_mask_embed=nrm(ks[6], (256,)),
        dec_up_w=nrm(ks[7], (256, 32)),          # mask_decoder stand-in upscale proj
        dec_up_b=jnp.zeros((32,), jnp.float32),
        dec_hyper_w=nrm(ks[8], (256, 32)),       # mask_decoder stand-in hypernet
        dec_hyper_b=jnp.zeros((32,), jnp.float32),
        cnn_pos=nrm(ks[9], (1, 64)),             # nn.Embedding(1, 64) — unused in forward
    )


# ----------------------------------------------------------------------------
# Forward pass
# ----------------------------------------------------------------------------
def conv_sam_forward(params, image, box):
    B, C, H, W = image.shape
    P = 16
    h, w = H // P, W // P            # backbone stride-16 feature size

    # ---- trace-time linear-operator compositions (tiny, exact, f32) ----
    # adaptive-avg-pool(1024->h/w) ∘ bilinear-upsample(h/w->1024)
    m_h = avgpool_matrix(h, 1024) @ bilinear_matrix(1024, h, True)              # (h,h)
    m_w = avgpool_matrix(w, 1024) @ bilinear_matrix(1024, w, True)              # (w,w)
    # bilinear(H,4h,ac=False) ∘ bilinear(4h,h,ac=False)  (decoder 4x up + final resize)
    r_h = bilinear_matrix(H, 4 * h, False) @ bilinear_matrix(4 * h, h, False)   # (H,h)
    r_w = bilinear_matrix(W, 4 * w, False) @ bilinear_matrix(4 * w, w, False)   # (W,w)

    # ---- cnnback_bone + cnn_attn + cnn_attn_channal: ONE fused Pallas kernel ----
    # TODO(synk): host-side patchify transpose stays outside Pallas (XLA fuses the bf16 cast).
    patches = image.reshape(B, C, h, P, w, P).transpose(0, 2, 4, 1, 3, 5)
    patches = patches.reshape(B * h * w, C * P * P).astype(jnp.bfloat16)
    box_feat, res_image = backbone_fused(
        patches,
        params["backbone_w"].astype(jnp.bfloat16), params["backbone_b"],
        params["cnn_attn_w"], params["cnn_attn_b"],
        params["attn_ch_w"], params["attn_ch_b"])            # (B*h*w,3), (B*h*w,256)

    # ---- upsample(1024,bilinear,ac=True) ∘ image_encoder pooling: composed matrices ----
    # B*3 tiny (h,w)->(h,w) maps: plain XLA (a Pallas launch here is pure overhead).
    box_hw = box_feat.reshape(B, h, w, 3)
    enc_sp = jnp.einsum("hp,bpqc,wq->bhwc", jnp.asarray(m_h), box_hw, jnp.asarray(m_w))
    enc_in = enc_sp.reshape(B, h * w, 3)

    # ---- prompt_encoder (frozen, tiny): plain-JAX glue ----
    sparse, dense_pe = prompt_encode(box, params, h, w)

    # ---- mask_decoder (stand-in, linear) collapsed by linearity ----
    # TODO(synk): SAM two-way transformer mask_decoder not replicated (stand-in is linear,
    # so hypernet weighting is pushed through the 256->32 projection exactly).
    hyper_in = jnp.mean(sparse, axis=1)                                          # (B,256)
    hyper = hyper_in @ params["dec_hyper_w"] + params["dec_hyper_b"]             # (B,32)
    v = hyper @ params["dec_up_w"].T                                             # (B,256)
    c = v @ (params["enc_b"] + params["no_mask_embed"]) + hyper @ params["dec_up_b"]  # (B,)

    # src = image_embedding(+res) + dense(no_mask) + pe, dotted with v_b — fused kernel.
    masks_low = encode_and_mask(enc_in, res_image.reshape(B, h * w, 256),
                                dense_pe, params["enc_w"], v)                    # (B,hw,1)
    masks_low = masks_low.reshape(B, h, w) + c[:, None, None]

    # ---- decoder 4x upsample ∘ final F.interpolate(H,W): one composed resize ----
    ori = resize2d(masks_low, r_h, r_w)                                          # (B,H,W)
    return ori.reshape(B, 1, H, W)


if __name__ == "__main__":
    key = jax.random.PRNGKey(0)
    kp, ki = jax.random.split(key)
    params = init_params(kp)

    image = jax.random.normal(ki, (2, 3, 64, 64), dtype=jnp.float32)   # NCHW
    box = jnp.array([[8.0, 16.0, 400.0, 512.0],
                     [32.0, 48.0, 640.0, 768.0]], dtype=jnp.float32)   # (B,4) xyxy

    out = conv_sam_forward(params, image, box)
    out = jax.block_until_ready(out)
    assert out.shape == (2, 1, 64, 64) and out.dtype == jnp.float32
    assert bool(jnp.all(jnp.isfinite(out)))
    print("KERNEL_OK")
</pallas_src>

<mosaic_0001>
module attributes {stable_mosaic.version = 11 : i64} {
  func.func @_backbone_fused_kernel(%arg0: i32, %arg1: memref<32x768xbf16, #tpu.memory_space<vmem>>, %arg2: memref<768x1024xbf16, #tpu.memory_space<vmem>>, %arg3: memref<1x1024xf32, #tpu.memory_space<vmem>>, %arg4: memref<1024x3xf32, #tpu.memory_space<vmem>>, %arg5: memref<1x3xf32, #tpu.memory_space<vmem>>, %arg6: memref<3x256xf32, #tpu.memory_space<vmem>>, %arg7: memref<1x256xf32, #tpu.memory_space<vmem>>, %arg8: memref<32x3xf32, #tpu.memory_space<vmem>>, %arg9: memref<32x256xf32, #tpu.memory_space<vmem>>) attributes {dimension_semantics = [#tpu.dimension_semantics<parallel>], iteration_bounds = array<i64: 1>, scalar_prefetch = 0 : i64, scratch_operands = 0 : i64, tpu.core_type = #tpu.core_type<tc>, window_params = [{transform_indices = @transform_0, window_bounds = array<i64: 32, 768>}, {pipeline_mode = #tpu.pipeline_mode<synchronous>, transform_indices = @transform_1, window_bounds = array<i64: 768, 1024>}, {pipeline_mode = #tpu.pipeline_mode<synchronous>, transform_indices = @transform_2, window_bounds = array<i64: 1, 1024>}, {pipeline_mode = #tpu.pipeline_mode<synchronous>, transform_indices = @transform_3, window_bounds = array<i64: 1024, 3>}, {pipeline_mode = #tpu.pipeline_mode<synchronous>, transform_indices = @transform_4, window_bounds = array<i64: 1, 3>}, {pipeline_mode = #tpu.pipeline_mode<synchronous>, transform_indices = @transform_5, window_bounds = array<i64: 3, 256>}, {pipeline_mode = #tpu.pipeline_mode<synchronous>, transform_indices = @transform_6, window_bounds = array<i64: 1, 256>}, {transform_indices = @transform_7, window_bounds = array<i64: 32, 3>}, {transform_indices = @transform_8, window_bounds = array<i64: 32, 256>}]} {
    %c0 = arith.constant 0 : index
    %c0_0 = arith.constant 0 : index
    %0 = vector.load %arg1[%c0, %c0_0] : memref<32x768xbf16, #tpu.memory_space<vmem>>, vector<32x768xbf16>
    %c0_1 = arith.constant 0 : index
    %c0_2 = arith.constant 0 : index
    %1 = vector.load %arg2[%c0_1, %c0_2] : memref<768x1024xbf16, #tpu.memory_space<vmem>>, vector<768x1024xbf16>
    %cst = arith.constant dense<0.000000e+00> : vector<32x1024xf32>
    %2 = tpu.matmul %0, %1, %cst {dimension_numbers = #tpu.dot_dimension_numbers<[1], [0], [0], [1], [0, 0, 1, 1], [], []>} : vector<32x768xbf16>, vector<768x1024xbf16>, vector<32x1024xf32> -> vector<32x1024xf32>
    %c0_3 = arith.constant 0 : index
    %c0_4 = arith.constant 0 : index
    %3 = vector.load %arg3[%c0_3, %c0_4] : memref<1x1024xf32, #tpu.memory_space<vmem>>, vector<1x1024xf32>
    %4 = vector.broadcast %3 : vector<1x1024xf32> to vector<32x1024xf32>
    %5 = arith.addf %2, %4 : vector<32x1024xf32>
    %c0_5 = arith.constant 0 : index
    %c0_6 = arith.constant 0 : index
    %6 = vector.load %arg4[%c0_5, %c0_6] : memref<1024x3xf32, #tpu.memory_space<vmem>>, vector<1024x3xf32>
    %cst_7 = arith.constant dense<0.000000e+00> : vector<32x3xf32>
    %7 = tpu.matmul %5, %6, %cst_7 {dimension_numbers = #tpu.dot_dimension_numbers<[1], [0], [0], [1], [0, 0, 1, 1], [], []>} : vector<32x1024xf32>, vector<1024x3xf32>, vector<32x3xf32> -> vector<32x3xf32>
    %c0_8 = arith.constant 0 : index
    %c0_9 = arith.constant 0 : index
    %8 = vector.load %arg5[%c0_8, %c0_9] : memref<1x3xf32, #tpu.memory_space<vmem>>, vector<1x3xf32>
    %9 = vector.broadcast %8 : vector<1x3xf32> to vector<32x3xf32>
    %10 = arith.addf %7, %9 : vector<32x3xf32>
    %c0_10 = arith.constant 0 : index
    %c0_11 = arith.constant 0 : index
    %11 = vector.load %arg8[%c0_10, %c0_11] : memref<32x3xf32, #tpu.memory_space<vmem>>, vector<32x3xf32>
    tpu.vector_store %arg8[%c0_10, %c0_11], %10 {strides = array<i32>} : memref<32x3xf32, #tpu.memory_space<vmem>>, vector<32x3xf32>,
    %c0_12 = arith.constant 0 : index
    %c0_13 = arith.constant 0 : index
    %12 = vector.load %arg7[%c0_12, %c0_13] : memref<1x256xf32, #tpu.memory_space<vmem>>, vector<1x256xf32>
    %13 = vector.extract_strided_slice %10 {offsets = [0, 0], sizes = [32, 1], strides = [1, 1]} : vector<32x3xf32> to vector<32x1xf32>
    %c0_14 = arith.constant 0 : index
    %c0_15 = arith.constant 0 : index
    %14 = vector.load %arg6[%c0_14, %c0_15] : memref<3x256xf32, #tpu.memory_space<vmem>>, vector<1x256xf32>
    %15 = vector.broadcast %13 : vector<32x1xf32> to vector<32x256xf32>
    %16 = vector.broadcast %14 : vector<1x256xf32> to vector<32x256xf32>
    %17 = arith.mulf %15, %16 : vector<32x256xf32>
    %18 = vector.broadcast %12 : vector<1x256xf32> to vector<32x256xf32>
    %19 = arith.addf %18, %17 : vector<32x256xf32>
    %20 = vector.extract_strided_slice %10 {offsets = [0, 1], sizes = [32, 1], strides = [1, 1]} : vector<32x3xf32> to vector<32x1xf32>
    %c1 = arith.constant 1 : index
    %c0_16 = arith.constant 0 : index
    %21 = vector.load %arg6[%c1, %c0_16] : memref<3x256xf32, #tpu.memory_space<vmem>>, vector<1x256xf32>
    %22 = vector.broadcast %20 : vector<32x1xf32> to vector<32x256xf32>
    %23 = vector.broadcast %21 : vector<1x256xf32> to vector<32x256xf32>
    %24 = arith.mulf %22, %23 : vector<32x256xf32>
    %25 = arith.addf %19, %24 : vector<32x256xf32>
    %26 = vector.extract_strided_slice %10 {offsets = [0, 2], sizes = [32, 1], strides = [1, 1]} : vector<32x3xf32> to vector<32x1xf32>
    %c2 = arith.constant 2 : index
    %c0_17 = arith.constant 0 : index
    %27 = vector.load %arg6[%c2, %c0_17] : memref<3x256xf32, #tpu.memory_space<vmem>>, vector<1x256xf32>
    %28 = vector.broadcast %26 : vector<32x1xf32> to vector<32x256xf32>
    %29 = vector.broadcast %27 : vector<1x256xf32> to vector<32x256xf32>
    %30 = arith.mulf %28, %29 : vector<32x256xf32>
    %31 = arith.addf %25, %30 : vector<32x256xf32>
    %c0_18 = arith.constant 0 : index
    %c0_19 = arith.constant 0 : index
    %32 = vector.load %arg9[%c0_18, %c0_19] : memref<32x256xf32, #tpu.memory_space<vmem>>, vector<32x256xf32>
    tpu.vector_store %arg9[%c0_18, %c0_19], %31 {strides = array<i32>} : memref<32x256xf32, #tpu.memory_space<vmem>>, vector<32x256xf32>,
    return
  }
  func.func @transform_0(%arg0: i32) -> (i32, i32) {
    %c0_i32 = arith.constant 0 : i32
    %c0_i32_0 = arith.constant 0 : i32
    return %arg0, %c0_i32 : i32, i32
  }
  func.func @transform_1(%arg0: i32) -> (i32, i32) {
    %c0_i32 = arith.constant 0 : i32
    %c0_i32_0 = arith.constant 0 : i32
    %c0_i32_1 = arith.constant 0 : i32
    return %c0_i32, %c0_i32_0 : i32, i32
  }
  func.func @transform_2(%arg0: i32) -> (i32, i32) {
    %c0_i32 = arith.constant 0 : i32
    %c0_i32_0 = arith.constant 0 : i32
    %c0_i32_1 = arith.constant 0 : i32
    return %c0_i32, %c0_i32_0 : i32, i32
  }
  func.func @transform_3(%arg0: i32) -> (i32, i32) {
    %c0_i32 = arith.constant 0 : i32
    %c0_i32_0 = arith.constant 0 : i32
    %c0_i32_1 = arith.constant 0 : i32
    return %c0_i32, %c0_i32_0 : i32, i32
  }
  func.func @transform_4(%arg0: i32) -> (i32, i32) {
    %c0_i32 = arith.constant 0 : i32
    %c0_i32_0 = arith.constant 0 : i32
    %c0_i32_1 = arith.constant 0 : i32
    return %c0_i32, %c0_i32_0 : i32, i32
  }
  func.func @transform_5(%arg0: i32) -> (i32, i32) {
    %c0_i32 = arith.constant 0 : i32
    %c0_i32_0 = arith.constant 0 : i32
    %c0_i32_1 = arith.constant 0 : i32
    return %c0_i32, %c0_i32_0 : i32, i32
  }
  func.func @transform_6(%arg0: i32) -> (i32, i32) {
    %c0_i32 = arith.constant 0 : i32
    %c0_i32_0 = arith.constant 0 : i32
    %c0_i32_1 = arith.constant 0 : i32
    return %c0_i32, %c0_i32_0 : i32, i32
  }
  func.func @transform_7(%arg0: i32) -> (i32, i32) {
    %c0_i32 = arith.constant 0 : i32
    %c0_i32_0 = arith.constant 0 : i32
    return %arg0, %c0_i32 : i32, i32
  }
  func.func @transform_8(%arg0: i32) -> (i32, i32) {
    %c0_i32 = arith.constant 0 : i32
    %c0_i32_0 = arith.constant 0 : i32
    return %arg0, %c0_i32 : i32, i32
  }
}

</mosaic_0001>

<bundles_post_ra>
// kernel: tpu_custom_call.1
= control target key start
LH: loop header
LB: loop body
LE: loop exit
PB: predicated region body
PF: predicated region fallthrough
CT: control target
= control target key end

     0   :  { %14 = vsyncpa [#allocation3], 0  ;;  %s7006_s0 = inlined_call_operand.hbm [shape: bf16[32,768], index: 0, kind: input, shape index: {}]   ;;  %s7007_s1 = inlined_call_operand.hbm [shape: bf16[768,1024], index: 1, kind: input, shape index: {}]   ;;  %s7008_s2 = inlined_call_operand.hbm [shape: f32[1,1024], index: 2, kind: input, shape index: {}]   ;;  %s7009_s3 = inlined_call_operand.vmem [shape: f32[1024,3], index: 3, kind: input, shape index: {}]   ;;  %s7010_s4 = inlined_call_operand.hbm [shape: f32[1,3], index: 4, kind: input, shape index: {}]   ;;  %s7011_s5 = inlined_call_operand.hbm [shape: f32[3,256], index: 5, kind: input, shape index: {}]   ;;  %s7012_s6 = inlined_call_operand.hbm [shape: f32[1,256], index: 6, kind: input, shape index: {}]   ;;  %s7013_s7 = inlined_call_operand.vmem [shape: f32[32,3], index: 7, kind: output, shape index: {0}]   ;;  %s7014_s8 = inlined_call_operand.hbm [shape: f32[32,256], index: 8, kind: output, shape index: {1}]  }
   0x1   :  { %15 = vsyncpa [#allocation6], 0 }
   0x2   :  { %16 = vsyncpa [#allocation9], 0 }
   0x3   :  { %17 = vsyncpa [#allocation12], 0  ;;  %s36_s29 = sshll.u32 %s7007_s1, 4  ;;  %s37_s29 = int_to_ptr.hbm [resolvable:$true] %s36_s29 }
   0x4   :  { %18 = vsyncpa [#allocation4], 0  ;;  %s6137_s30 = smov [#allocation5]   ;;  %s63_s12 = sshll.u32 %s7010_s4, 4  ;;  %s64_s12 = int_to_ptr.hbm [resolvable:$true] %s63_s12 }
   0x5   :  { %s38_s9 = sshll.u32 %s6137_s30, 4  ;;  %s6138_s13 = smov 512   ;;  %s39_s9 = int_to_ptr.vmem [resolvable:$true] %s38_s9 }
   0x6   :  { %s6139_s14 = smov 32   ;;  %s6140_s15 = smov [#allocation8]  }
   0x7   :  { %44 = dma.hbm_to_vmem [thread:$0]  %s37_s29, 49152, %s39_s9, [#allocation6], %s6138_s13, %s6138_s13, %s6139_s14  }
   0x8   :  { %s65_s16 = sshll.u32 %s6140_s15, 4  ;;  %s23_s19 = sshll.u32 %s7006_s0, 4  ;;  %s66_s16 = int_to_ptr.vmem [resolvable:$true] %s65_s16  ;;  %s24_s19 = int_to_ptr.hbm [resolvable:$true] %s23_s19 }
   0x9   :  { %68 = dma.hbm_to_vmem [thread:$0]  %s64_s12, 16, %s66_s16, [#allocation9]  }
   0xa   :  { %s6141_s1 = smov [#allocation2]   ;;  %s50_s4 = sshll.u32 %s7008_s2, 4  ;;  %s51_s4 = int_to_ptr.hbm [resolvable:$true] %s50_s4 }
   0xb   :  { %s25_s20 = sshll.u32 %s6141_s1, 4  ;;  %s6142_s23 = smov 384   ;;  %s26_s20 = int_to_ptr.vmem [resolvable:$true] %s25_s20 }
   0xc   :  { %s6143_s24 = smov 24   ;;  %s6144_s25 = smov [#allocation7]  }
   0xd   :  { %31 = dma.hbm_to_vmem [thread:$0]  %s24_s19, 1536, %s26_s20, [#allocation3], %s6142_s23, %s6142_s23, %s6143_s24  }
   0xe   :  { %s52_s26 = sshll.u32 %s6144_s25, 4  ;;  %s74_s0 = sshll.u32 %s7011_s5, 4  ;;  %s53_s26 = int_to_ptr.vmem [resolvable:$true] %s52_s26  ;;  %s75_s0 = int_to_ptr.hbm [resolvable:$true] %s74_s0 }
   0xf   :  { %55 = dma.hbm_to_vmem [thread:$0]  %s51_s4, 128, %s53_s26, [#allocation6]  }
  0x10   :  { %s85_s9 = sshll.u32 %s7012_s6, 4  ;;  %s6145_s10 = smov [#allocation10]   ;;  %s86_s9 = int_to_ptr.hbm [resolvable:$true] %s85_s9 }
  0x11   :  { %s76_s11 = sshll.u32 %s6145_s10, 4  ;;  %s6146_s2 = smov [#allocation11]   ;;  %s77_s11 = int_to_ptr.vmem [resolvable:$true] %s76_s11 }
  0x12   :  { %79 = dma.hbm_to_vmem [thread:$0]  %s75_s0, 128, %s77_s11, [#allocation9]  }
  0x13   :  { %s87_s12 = sshll.u32 %s6146_s2, 4  ;;  %s88_s12 = int_to_ptr.vmem [resolvable:$true] %s87_s12 }
  0x14   :  { %90 = dma.hbm_to_vmem [thread:$0]  %s86_s9, 32, %s88_s12, [#allocation12]  }
  0x15   :  { %6127 = dma.done.wait [#allocation3], 1536  }
  0x16   :  { %6128 = vsyncadd [#allocation3], 4294965760 }
  0x17   :  { %6129 = dma.done.wait [#allocation6], 49280  }
  0x18   :  { %6130 = vsyncadd [#allocation6], 4294918016 }
  0x19   :  { %6131 = dma.done.wait [#allocation9], 144  }
  0x1a   :  { %6132 = vsyncadd [#allocation9], 4294967152 }
  0x1b   :  { %6133 = dma.done.wait [#allocation12], 32  }
  0x1c   :  { %6134 = vsyncadd [#allocation12], 4294967264  ;;  %v4224_v0 = vld [vmem:[#allocation5 + $0x1c0] sm:$0xf]  ;;  %vm3785_vm0 = vcmask 23552   ;;  %s3932_s23 = sshll.u32 %s7014_s8, 4  ;;  %s3933_s23 = int_to_ptr.hbm [resolvable:$true] %s3932_s23 }
  0x1d   :  { %v5606_v1 = vld [vmem:[#allocation5 + $0x1dc] sm:$0xf0]  ;;  %s6151_s24 = smov 256   ;;  %s6152_s25 = smov 16  }
  0x1e   :  { %v4480_v2 = vld [vmem:[#allocation5 + $0x3c0] sm:$0xf]  ;;  %v4225_v3 = vor.u32 %v5606_v1, %v4224_v0 }
  0x1f   :  { %v5670_v4 = vld [vmem:[#allocation5 + $0x3dc] sm:$0xf0] }
  0x20   :  { %v4736_v5 = vld [vmem:[#allocation5 + $0x5c0] sm:$0xf]  ;;  %v4481_v7 = vor.u32 %v5670_v4, %v4480_v2  ;;  %2509 = vmatpush.bf16.msra.mxu0 %v4225_v3 }
  0x21   :  { %v5734_v6 = vld [vmem:[#allocation5 + $0x5dc] sm:$0xf0] }
  0x22   :  { %v4737_v8 = vor.u32 %v5734_v6, %v4736_v5  ;;  %v4992_v9 = vld [vmem:[#allocation5 + $0x7c0] sm:$0xf]  ;;  %2528 = vmatpush.bf16.msra.mxu1 %v4481_v7 }
  0x23   :  { %v5798_v10 = vld [vmem:[#allocation5 + $0x7dc] sm:$0xf0] }
  0x24   :  { %v4192_v11 = vld [vmem:[#allocation5 + $0x180] sm:$0xf]  ;;  %v4993_v12 = vor.u32 %v5798_v10, %v4992_v9  ;;  %2547 = vmatpush.bf16.msra.mxu2 %v4737_v8 }
  0x25   :  { %v5598_v13 = vld [vmem:[#allocation5 + $0x19c] sm:$0xf0] }
  0x26   :  { %v4448_v14 = vld [vmem:[#allocation5 + $0x380] sm:$0xf]  ;;  %v4193_v16 = vor.u32 %v5598_v13, %v4192_v11  ;;  %2566 = vmatpush.bf16.msra.mxu3 %v4993_v12 }
  0x27   :  { %v5662_v15 = vld [vmem:[#allocation5 + $0x39c] sm:$0xf0] }
  0x28   :  { %v4449_v17 = vor.u32 %v5662_v15, %v4448_v14  ;;  %v4704_v18 = vld [vmem:[#allocation5 + $0x580] sm:$0xf]  ;;  %2510 = vmatpush.bf16.msra.mxu0 %v4193_v16 }
  0x29   :  { %v5726_v19 = vld [vmem:[#allocation5 + $0x59c] sm:$0xf0] }
  0x2a   :  { %v4960_v20 = vld [vmem:[#allocation5 + $0x780] sm:$0xf]  ;;  %v4705_v21 = vor.u32 %v5726_v19, %v4704_v18  ;;  %2529 = vmatpush.bf16.msra.mxu1 %v4449_v17 }
  0x2b   :  { %v5790_v22 = vld [vmem:[#allocation5 + $0x79c] sm:$0xf0] }
  0x2c   :  { %v4160_v23 = vld [vmem:[#allocation5 + $0x140] sm:$0xf]  ;;  %v4961_v25 = vor.u32 %v5790_v22, %v4960_v20  ;;  %2548 = vmatpush.bf16.msra.mxu2 %v4705_v21 }
  0x2d   :  { %v5590_v24 = vld [vmem:[#allocation5 + $0x15c] sm:$0xf0] }
  0x2e   :  { %v4416_v26 = vld [vmem:[#allocation5 + $0x340] sm:$0xf]  ;;  %v4161_v29 = vor.u32 %v5590_v24, %v4160_v23  ;;  %2567 = vmatpush.bf16.msra.mxu3 %v4961_v25 }
  0x2f   :  { %v5654_v27 = vld [vmem:[#allocation5 + $0x35c] sm:$0xf0] }
  0x30   :  { %v4672_v28 = vld [vmem:[#allocation5 + $0x540] sm:$0xf]  ;;  %v4417_v33 = vor.u32 %v5654_v27, %v4416_v26  ;;  %2511 = vmatpush.bf16.msra.mxu0 %v4161_v29  ;;  %v5537_v29 = vld [vmem:[#allocation2 + $0x14] sm:$0xf0] }
  0x31   :  { %v5718_v30 = vld [vmem:[#allocation5 + $0x55c] sm:$0xf0] }
  0x32   :  { %v4928_v31 = vld [vmem:[#allocation5 + $0x740] sm:$0xf]  ;;  %v4673_v34 = vor.u32 %v5718_v30, %v4672_v28  ;;  %2530 = vmatpush.bf16.msra.mxu1 %v4417_v33  ;;  %v5534_v30 = vld [vmem:[#allocation2 + $0x4] sm:$0xf] }
  0x33   :  { %v5782_v32 = vld [vmem:[#allocation5 + $0x75c] sm:$0xf0]  ;;  %v4226_v33 = vld [vmem:[#allocation5 + $0x1e0] sm:$0xf0] }
  0x34   :  { %v4128_v35 = vld [vmem:[#allocation5 + $0x100] sm:$0xf]  ;;  %v4929_v38 = vor.u32 %v5782_v32, %v4928_v31  ;;  %2549 = vmatpush.bf16.msra.mxu2 %v4673_v34  ;;  %v3954_v31 = vld [vmem:[#allocation2 + $0x18] sm:$0xf0]  ;;  %v5602_v32 = vld [vmem:[#allocation5 + $0x1c4] sm:$0xf] }
  0x35   :  { %v5582_v36 = vld [vmem:[#allocation5 + $0x11c] sm:$0xf0] }
  0x36   :  { %v4384_v37 = vld [vmem:[#allocation5 + $0x300] sm:$0xf]  ;;  %v4129_v44 = vor.u32 %v5582_v36, %v4128_v35  ;;  %2568 = vmatpush.bf16.msra.mxu3 %v4929_v38  ;;  %v3960_v35 = vld [vmem:[#allocation2 + $0x8] sm:$0xf] }
  0x37   :  { %v5646_v39 = vld [vmem:[#allocation5 + $0x31c] sm:$0xf0] }
  0x38   :  { %v4640_v40 = vld [vmem:[#allocation5 + $0x500] sm:$0xf]  ;;  %v4385_v45 = vor.u32 %v5646_v39, %v4384_v37  ;;  %2512 = vmatpush.bf16.msra.mxu0 %v4129_v44  ;;  %v4229_v44 = vor.u32 %v5602_v32, %v4226_v33  ;;  %v3984_v32 = vld [vmem:[#allocation2 + $0x38] sm:$0xf] }
  0x39   :  { %v5710_v41 = vld [vmem:[#allocation5 + $0x51c] sm:$0xf0] }
  0x3a   :  { %v4896_v42 = vld [vmem:[#allocation5 + $0x700] sm:$0xf]  ;;  %v4641_v46 = vor.u32 %v5710_v41, %v4640_v40  ;;  %2531 = vmatpush.bf16.msra.mxu1 %v4385_v45  ;;  %v5535_v41 = vld [vmem:[#allocation2 + $0xc] sm:$0xf] }
  0x3b   :  { %v5774_v43 = vld [vmem:[#allocation5 + $0x71c] sm:$0xf0] }
  0x3c   :  { %v4096_v47 = vld [vmem:[#allocation5 + $0xc0] sm:$0xf]  ;;  %v4897_v50 = vor.u32 %v5774_v43, %v4896_v42  ;;  %2550 = vmatpush.bf16.msra.mxu2 %v4641_v46  ;;  %v3962_v42 = vld [vmem:[#allocation2 + $0x20] sm:$0xf0] }
  0x3d   :  { %v5574_v48 = vld [vmem:[#allocation5 + $0xdc] sm:$0xf0] }
  0x3e   :  { %v4352_v49 = vld [vmem:[#allocation5 + $0x2c0] sm:$0xf]  ;;  %v4097_v56 = vor.u32 %v5574_v48, %v4096_v47  ;;  %2569 = vmatpush.bf16.msra.mxu3 %v4897_v50  ;;  %v5666_v47 = vld [vmem:[#allocation5 + $0x3c4] sm:$0xf] }
  0x3f   :  { %v5638_v51 = vld [vmem:[#allocation5 + $0x2dc] sm:$0xf0]  ;;  %v4482_v50 = vld [vmem:[#allocation5 + $0x3e0] sm:$0xf0] }
  0x40   :  { %v4608_v52 = vld [vmem:[#allocation5 + $0x4c0] sm:$0xf]  ;;  %v4353_v57 = vor.u32 %v5638_v51, %v4352_v49  ;;  %2513 = vmatpush.bf16.msra.mxu0 %v4097_v56  ;;  %v5594_v51 = vld [vmem:[#allocation5 + $0x184] sm:$0xf] }
  0x41   :  { %v5702_v53 = vld [vmem:[#allocation5 + $0x4dc] sm:$0xf0] }
  0x42   :  { %v4864_v54 = vld [vmem:[#allocation5 + $0x6c0] sm:$0xf]  ;;  %v4609_v58 = vor.u32 %v5702_v53, %v4608_v52  ;;  %2532 = vmatpush.bf16.msra.mxu1 %v4353_v57  ;;  %v4194_v52 = vld [vmem:[#allocation5 + $0x1a0] sm:$0xf0]  ;;  %v6218_v53 = vor.u32 %v5534_v30, %v3954_v31  ;;  %v6222_v57 = vor.u32 %v5535_v41, %v3962_v42 }
  0x43   :  { %v5766_v55 = vld [vmem:[#allocation5 + $0x6dc] sm:$0xf0]  ;;  %v5570_v30 = vld [vmem:[#allocation5 + $0xc4] sm:$0xf] }
  0x44   :  { %v4064_v59 = vld [vmem:[#allocation5 + $0x80] sm:$0xf]  ;;  %v4865_v62 = vor.u32 %v5766_v55, %v4864_v54  ;;  %2551 = vmatpush.bf16.msra.mxu2 %v4609_v58  ;;  %v4098_v31 = vld [vmem:[#allocation5 + $0xe0] sm:$0xf0] }
  0x45   :  { %v5566_v60 = vld [vmem:[#allocation5 + $0x9c] sm:$0xf0] }
  0x46   :  { %v4320_v61 = vld [vmem:[#allocation5 + $0x280] sm:$0xf]  ;;  %v4065_v4 = vor.u32 %v5566_v60, %v4064_v59  ;;  %2570 = vmatpush.bf16.msra.mxu3 %v4865_v62  ;;  %v4485_v59 = vor.u32 %v5666_v47, %v4482_v50  ;;  %v4197_v60 = vor.u32 %v5594_v51, %v4194_v52  ;;  %v5562_v47 = vld [vmem:[#allocation5 + $0x84] sm:$0xf] }
  0x47   :  { %v5630_v63 = vld [vmem:[#allocation5 + $0x29c] sm:$0xf0] }
  0x48   :  { %v4576_v0 = vld [vmem:[#allocation5 + $0x480] sm:$0xf]  ;;  %v4321_v5 = vor.u32 %v5630_v63, %v4320_v61  ;;  %2514 = vmatpush.bf16.msra.mxu0 %v4065_v4  ;;  %v5658_v63 = vld [vmem:[#allocation5 + $0x384] sm:$0xf] }
  0x49   :  { %v5694_v1 = vld [vmem:[#allocation5 + $0x49c] sm:$0xf0] }
  0x4a   :  { %v4832_v2 = vld [vmem:[#allocation5 + $0x680] sm:$0xf]  ;;  %v4577_v6 = vor.u32 %v5694_v1, %v4576_v0  ;;  %2533 = vmatpush.bf16.msra.mxu1 %v4321_v5  ;;  %v4450_v1 = vld [vmem:[#allocation5 + $0x3a0] sm:$0xf0] }
  0x4b   :  { %v5758_v3 = vld [vmem:[#allocation5 + $0x69c] sm:$0xf0] }
  0x4c   :  { %v4032_v7 = vld [vmem:[#allocation5 + $0x40] sm:$0xf]  ;;  %v4833_v10 = vor.u32 %v5758_v3, %v4832_v2  ;;  %2552 = vmatpush.bf16.msra.mxu2 %v4577_v6  ;;  %v5586_v2 = vld [vmem:[#allocation5 + $0x144] sm:$0xf] }
  0x4d   :  { %v5558_v8 = vld [vmem:[#allocation5 + $0x5c] sm:$0xf0]  ;;  %v4162_v3 = vld [vmem:[#allocation5 + $0x160] sm:$0xf0] }
  0x4e   :  { %v4288_v9 = vld [vmem:[#allocation5 + $0x240] sm:$0xf]  ;;  %v4033_v17 = vor.u32 %v5558_v8, %v4032_v7  ;;  %2571 = vmatpush.bf16.msra.mxu3 %v4833_v10  ;;  %v4453_v7 = vor.u32 %v5658_v63, %v4450_v1  ;;  %v4165_v8 = vor.u32 %v5586_v2, %v4162_v3  ;;  %v5626_v63 = vld [vmem:[#allocation5 + $0x284] sm:$0xf] }
  0x4f   :  { %v5622_v11 = vld [vmem:[#allocation5 + $0x25c] sm:$0xf0]  ;;  %v4322_v1 = vld [vmem:[#allocation5 + $0x2a0] sm:$0xf0] }
  0x50   :  { %v4544_v12 = vld [vmem:[#allocation5 + $0x440] sm:$0xf]  ;;  %v4289_v21 = vor.u32 %v5622_v11, %v4288_v9  ;;  %2515 = vmatpush.bf16.msra.mxu0 %v4033_v17  ;;  %v5650_v11 = vld [vmem:[#allocation5 + $0x344] sm:$0xf] }
  0x51   :  { %v5686_v13 = vld [vmem:[#allocation5 + $0x45c] sm:$0xf0]  ;;  %v5554_v2 = vld [vmem:[#allocation5 + $0x44] sm:$0xf] }
  0x52   :  { %v4800_v14 = vld [vmem:[#allocation5 + $0x640] sm:$0xf]  ;;  %v4545_v22 = vor.u32 %v5686_v13, %v4544_v12  ;;  %2534 = vmatpush.bf16.msra.mxu1 %v4289_v21  ;;  %v4418_v13 = vld [vmem:[#allocation5 + $0x360] sm:$0xf0] }
  0x53   :  { %v5750_v15 = vld [vmem:[#allocation5 + $0x65c] sm:$0xf0]  ;;  %v5642_v21 = vld [vmem:[#allocation5 + $0x304] sm:$0xf] }
  0x54   :  { %v4000_v16 = vld [vmem:[#allocation5] sm:$0xf]  ;;  %v4801_v26 = vor.u32 %v5750_v15, %v4800_v14  ;;  %2553 = vmatpush.bf16.msra.mxu2 %v4545_v22  ;;  %v5578_v14 = vld [vmem:[#allocation5 + $0x104] sm:$0xf]  ;;  %v4421_v22 = vor.u32 %v5650_v11, %v4418_v13 }
  0x55   :  { %v5550_v18 = vld [vmem:[#allocation5 + $0x1c] sm:$0xf0]  ;;  %v4130_v15 = vld [vmem:[#allocation5 + $0x120] sm:$0xf0] }
  0x56   :  { %v4256_v19 = vld [vmem:[#allocation5 + $0x200] sm:$0xf]  ;;  %v4001_v34 = vor.u32 %v5550_v18, %v4000_v16  ;;  %2572 = vmatpush.bf16.msra.mxu3 %v4801_v26  ;;  %v5543_v26 = vld [vmem:[#allocation2 + $0x44] sm:$0xf0]  ;;  %v4034_v3 = vld [vmem:[#allocation5 + $0x60] sm:$0xf0] }
  0x57   :  { %v5614_v20 = vld [vmem:[#allocation5 + $0x21c] sm:$0xf0]  ;;  %v5618_v11 = vld [vmem:[#allocation5 + $0x244] sm:$0xf] }
  0x58   :  { %v4512_v23 = vld [vmem:[#allocation5 + $0x400] sm:$0xf]  ;;  %v4257_v38 = vor.u32 %v5614_v20, %v4256_v19  ;;  %2516 = vmatpush.bf16.msra.mxu0 %v4001_v34 }
  0x59   :  { %v5678_v24 = vld [vmem:[#allocation5 + $0x41c] sm:$0xf0] }
  0x5a   :  { %v4768_v25 = vld [vmem:[#allocation5 + $0x600] sm:$0xf]  ;;  %v4513_v39 = vor.u32 %v5678_v24, %v4512_v23  ;;  %2535 = vmatpush.bf16.msra.mxu1 %v4257_v38  ;;  %v4133_v23 = vor.u32 %v5578_v14, %v4130_v15  ;;  %v4386_v24 = vld [vmem:[#allocation5 + $0x320] sm:$0xf0]  ;;  %v3986_v38 = vld [vmem:[#allocation2 + $0x50] sm:$0xf0] }
  0x5b   :  { %v5742_v27 = vld [vmem:[#allocation5 + $0x61c] sm:$0xf0]  ;;  %v5546_v14 = vld [vmem:[#allocation5 + $0x4] sm:$0xf] }
  0x5c   :  { %v3952_v28 = vld [vmem:[#allocation2] sm:$0xf]  ;;  %v4769_v43 = vor.u32 %v5742_v27, %v4768_v25  ;;  %2554 = vmatpush.bf16.msra.mxu2 %v4513_v39  ;;  %v3976_v25 = vld [vmem:[#allocation2 + $0x30] sm:$0xf]  ;;  %v4389_v39 = vor.u32 %v5642_v21, %v4386_v24  ;;  %v4002_v15 = vld [vmem:[#allocation5 + $0x20] sm:$0xf0] }
  0x5d   :  { %v5504_v36 = vld [vmem:[#allocation5 + $0xbc0] sm:$0xf]  ;;  %v6216_v48 = vor.u32 %v5537_v29, %v3952_v28  ;;  %2536 = vmatmul.bf16.vlgmr.msra.gmra.mxu1 %v6218_v53  ;;  %v5540_v28 = vld [vmem:[#allocation2 + $0x34] sm:$0xf]  ;;  %v3978_v29 = vld [vmem:[#allocation2 + $0x48] sm:$0xf0] }
  0x5e   :  { %v5926_v37 = vld [vmem:[#allocation5 + $0xbdc] sm:$0xf0]  ;;  %2573 = vmatpush.bf16.msra.mxu3 %v4769_v43  ;;  %v5634_v43 = vld [vmem:[#allocation5 + $0x2c4] sm:$0xf]  ;;  %v6230_v50 = vor.u32 %v5540_v28, %v3978_v29 }
  0x5f   :  { %v5538_v40 = vld [vmem:[#allocation2 + $0x1c] sm:$0xf0]  ;;  %v5505_v49 = vor.u32 %v5926_v37, %v5504_v36  ;;  %2517 = vmatmul.bf16.vlgmr.msra.gmra.mxu0 %v6216_v48  ;;  %v5544_v36 = vld [vmem:[#allocation2 + $0x4c] sm:$0xf0]  ;;  %v5541_v37 = vld [vmem:[#allocation2 + $0x3c] sm:$0xf] }
  0x60   :  { %v5248_v45 = vld [vmem:[#allocation5 + $0x9c0] sm:$0xf]  ;;  %v6220_v54 = vor.u32 %v5538_v40, %v3960_v35  ;;  %2623 = vmatpush.bf16.msrb.mxu2 %v4229_v44  ;;  %v4101_v40 = vor.u32 %v5570_v30, %v4098_v31  ;;  %v6228_v44 = vor.u32 %v5543_v26, %v3976_v25  ;;  %v6232_v51 = vor.u32 %v5544_v36, %v3984_v32  ;;  %v4258_v28 = vld [vmem:[#allocation5 + $0x220] sm:$0xf0]  ;;  %v3968_v30 = vld [vmem:[#allocation2 + $0x10] sm:$0xf] }
  0x61   :  { %v5862_v46 = vld [vmem:[#allocation5 + $0x9dc] sm:$0xf0]  ;;  %2604 = vmatpush.bf16.msrb.mxu1 %v5505_v49  ;;  %2574 = vmatmul.bf16.vlgmr.msra.gmra.mxu3 %v6222_v57  ;;  %v4066_v49 = vld [vmem:[#allocation5 + $0xa0] sm:$0xf0]  ;;  %v4005_v25 = vor.u32 %v5546_v14, %v4002_v15 }
  0x62   :  { %v5472_v55 = vld [vmem:[#allocation5 + $0xb80] sm:$0xf]  ;;  %v5249_v58 = vor.u32 %v5862_v46, %v5248_v45  ;;  %2555 = vmatmul.bf16.vlgmr.msra.gmra.mxu2 %v6220_v54  ;;  %2642 = vmatpush.bf16.msrb.mxu3 %v4485_v59  ;;  %v4354_v46 = vld [vmem:[#allocation5 + $0x2e0] sm:$0xf0] }
  0x63   :  { %v5918_v56 = vld [vmem:[#allocation5 + $0xb9c] sm:$0xf0]  ;;  %v4357_v59 = vor.u32 %v5634_v43, %v4354_v46  ;;  %v5730_v32 = vld [vmem:[#allocation5 + $0x5c4] sm:$0xf] }
  0x64   :  { %v5216_v61 = vld [vmem:[#allocation5 + $0x980] sm:$0xf]  ;;  %v5473_v0 = vor.u32 %v5918_v56, %v5472_v55  ;;  %2585 = vmatpush.bf16.msrb.mxu0 %v5249_v58  ;;  %2624 = vmatpush.bf16.msrb.mxu2 %v4197_v60  ;;  %v6234_v56 = vor.u32 %v5541_v37, %v3986_v38  ;;  %v4069_v60 = vor.u32 %v5562_v47, %v4066_v49  ;;  %v5506_v36 = vld [vmem:[#allocation5 + $0xbe0] sm:$0xf0] }
  0x65   :  { %v5854_v62 = vld [vmem:[#allocation5 + $0x99c] sm:$0xf0]  ;;  %v5850_v37 = vld [vmem:[#allocation5 + $0x984] sm:$0xf] }
  0x66   :  { %v5440_v4 = vld [vmem:[#allocation5 + $0xb40] sm:$0xf]  ;;  %v5217_v6 = vor.u32 %v5854_v62, %v5216_v61  ;;  %2605 = vmatpush.bf16.msrb.mxu1 %v5473_v0  ;;  %2643 = vmatpush.bf16.msrb.mxu3 %v4453_v7  ;;  %v5218_v38 = vld [vmem:[#allocation5 + $0x9a0] sm:$0xf0] }
  0x67   :  { %v5910_v5 = vld [vmem:[#allocation5 + $0xb5c] sm:$0xf0]  ;;  %v5722_v46 = vld [vmem:[#allocation5 + $0x584] sm:$0xf] }
  0x68   :  { %v5184_v9 = vld [vmem:[#allocation5 + $0x940] sm:$0xf]  ;;  %v5441_v12 = vor.u32 %v5910_v5, %v5440_v4  ;;  %2586 = vmatpush.bf16.msrb.mxu0 %v5217_v6  ;;  %2625 = vmatpush.bf16.msrb.mxu2 %v4165_v8  ;;  %v4325_v8 = vor.u32 %v5626_v63, %v4322_v1  ;;  %v4706_v47 = vld [vmem:[#allocation5 + $0x5a0] sm:$0xf0] }
  0x69   :  { %v5846_v10 = vld [vmem:[#allocation5 + $0x95c] sm:$0xf0]  ;;  %v5842_v63 = vld [vmem:[#allocation5 + $0x944] sm:$0xf]  ;;  %v4709_v1 = vor.u32 %v5722_v46, %v4706_v47 }
  0x6a   :  { %v5408_v16 = vld [vmem:[#allocation5 + $0xb00] sm:$0xf]  ;;  %v5185_v18 = vor.u32 %v5846_v10, %v5184_v9  ;;  %2606 = vmatpush.bf16.msrb.mxu1 %v5441_v12  ;;  %2644 = vmatpush.bf16.msrb.mxu3 %v4421_v22  ;;  %v4037_v9 = vor.u32 %v5554_v2, %v4034_v3  ;;  %v4290_v12 = vld [vmem:[#allocation5 + $0x260] sm:$0xf0] }
  0x6b   :  { %v5902_v17 = vld [vmem:[#allocation5 + $0xb1c] sm:$0xf0]  ;;  %v5794_v22 = vld [vmem:[#allocation5 + $0x7c4] sm:$0xf]  ;;  %v4293_v24 = vor.u32 %v5618_v11, %v4290_v12 }
  0x6c   :  { %v5152_v19 = vld [vmem:[#allocation5 + $0x900] sm:$0xf]  ;;  %v5409_v27 = vor.u32 %v5902_v17, %v5408_v16  ;;  %2587 = vmatpush.bf16.msrb.mxu0 %v5185_v18  ;;  %2626 = vmatpush.bf16.msrb.mxu2 %v4133_v23  ;;  %v5858_v18 = vld [vmem:[#allocation5 + $0x9c4] sm:$0xf] }
  0x6d   :  { %v5838_v20 = vld [vmem:[#allocation5 + $0x91c] sm:$0xf0]  ;;  %2541 = vmatmul.bf16.gmra.mxu1 %v6230_v50  ;;  %v4994_v23 = vld [vmem:[#allocation5 + $0x7e0] sm:$0xf0] }
  0x6e   :  { %v5376_v33 = vld [vmem:[#allocation5 + $0xac0] sm:$0xf]  ;;  %v5153_v35 = vor.u32 %v5838_v20, %v5152_v19  ;;  %2607 = vmatpush.bf16.msrb.mxu1 %v5409_v27  ;;  %2645 = vmatpush.bf16.msrb.mxu3 %v4389_v39  ;;  %v5250_v19 = vld [vmem:[#allocation5 + $0x9e0] sm:$0xf0] }
  0x6f   :  { %v5894_v34 = vld [vmem:[#allocation5 + $0xadc] sm:$0xf0]  ;;  %2522 = vmatmul.bf16.gmra.mxu0 %v6228_v44  ;;  %v5610_v27 = vld [vmem:[#allocation5 + $0x204] sm:$0xf]  ;;  %v5253_v31 = vor.u32 %v5858_v18, %v5250_v19 }
  0x70   :  { %v5120_v41 = vld [vmem:[#allocation5 + $0x8c0] sm:$0xf]  ;;  %v5377_v45 = vor.u32 %v5894_v34, %v5376_v33  ;;  %2588 = vmatpush.bf16.msrb.mxu0 %v5153_v35  ;;  %2627 = vmatpush.bf16.msrb.mxu2 %v4101_v40  ;;  %v4738_v33 = vld [vmem:[#allocation5 + $0x5e0] sm:$0xf0]  ;;  %v4997_v35 = vor.u32 %v5794_v22, %v4994_v23  ;;  %v5539_v40 = vld [vmem:[#allocation2 + $0x24] sm:$0xf0]  ;;  %v4261_v43 = vor.u32 %v5610_v27, %v4258_v28 }
  0x71   :  { %v5830_v42 = vld [vmem:[#allocation5 + $0x8dc] sm:$0xf0]  ;;  %2579 = vmatmul.bf16.gmra.mxu3 %v6234_v56  ;;  %v5922_v34 = vld [vmem:[#allocation5 + $0xbc4] sm:$0xf] }
  0x72   :  { %v5344_v52 = vld [vmem:[#allocation5 + $0xa80] sm:$0xf]  ;;  %v5121_v58 = vor.u32 %v5830_v42, %v5120_v41  ;;  %2608 = vmatpush.bf16.msrb.mxu1 %v5377_v45  ;;  %2560 = vmatmul.bf16.gmra.mxu2 %v6232_v51  ;;  %v5536_v41 = vld [vmem:[#allocation2 + $0x14] sm:$0xf]  ;;  %v3970_v42 = vld [vmem:[#allocation2 + $0x28] sm:$0xf0]  ;;  %v4741_v45 = vor.u32 %v5730_v32, %v4738_v33  ;;  %v5509_v49 = vor.u32 %v5922_v34, %v5506_v36 }
  0x73   :  { %v5886_v55 = vld [vmem:[#allocation5 + $0xa9c] sm:$0xf0]  ;;  %2646 = vmatpush.bf16.msrb.mxu3 %v4357_v59  ;;  %v5914_v59 = vld [vmem:[#allocation5 + $0xb84] sm:$0xf] }
  0x74   :  { %v5088_v61 = vld [vmem:[#allocation5 + $0x880] sm:$0xf]  ;;  %v5345_v0 = vor.u32 %v5886_v55, %v5344_v52  ;;  %2589 = vmatpush.bf16.msrb.mxu0 %v5121_v58  ;;  %2628 = vmatpush.bf16.msrb.mxu2 %v4069_v60  ;;  %v5221_v52 = vor.u32 %v5850_v37, %v5218_v38  ;;  %v5786_v55 = vld [vmem:[#allocation5 + $0x784] sm:$0xf]  ;;  %v6240_v60 = vor.u32 %v5539_v40, %v3968_v30  ;;  %v5545_v38 = vld [vmem:[#allocation2 + $0x54] sm:$0xf0] }
  0x75   :  { %v5822_v62 = vld [vmem:[#allocation5 + $0x89c] sm:$0xf0]  ;;  %v4962_v58 = vld [vmem:[#allocation5 + $0x7a0] sm:$0xf0]  ;;  %v3994_v40 = vld [vmem:[#allocation2 + $0x58] sm:$0xf0] }
  0x76   :  { %v5312_v4 = vld [vmem:[#allocation5 + $0xa40] sm:$0xf]  ;;  %v5089_v6 = vor.u32 %v5822_v62, %v5088_v61  ;;  %2609 = vmatpush.bf16.msrb.mxu1 %v5345_v0  ;;  %v6242_v61 = vor.u32 %v5536_v41, %v3970_v42  ;;  %v5474_v62 = vld [vmem:[#allocation5 + $0xba0] sm:$0xf0]  ;;  %v4965_v2 = vor.u32 %v5786_v55, %v4962_v58 }
  0x77   :  { %v5878_v5 = vld [vmem:[#allocation5 + $0xa5c] sm:$0xf0]  ;;  %2647 = vmatpush.bf16.msrb.mxu3 %v4325_v8  ;;  %v5186_v0 = vld [vmem:[#allocation5 + $0x960] sm:$0xf0] }
  0x78   :  { %v5056_v7 = vld [vmem:[#allocation5 + $0x840] sm:$0xf]  ;;  %v5313_v13 = vor.u32 %v5878_v5, %v5312_v4  ;;  %2590 = vmatpush.bf16.msrb.mxu0 %v5089_v6  ;;  %2629 = vmatpush.bf16.msrb.mxu2 %v4037_v9  ;;  %v5714_v3 = vld [vmem:[#allocation5 + $0x544] sm:$0xf]  ;;  %v5477_v5 = vor.u32 %v5914_v59, %v5474_v62  ;;  %v5189_v6 = vor.u32 %v5842_v63, %v5186_v0 }
  0x79   :  { %v5814_v10 = vld [vmem:[#allocation5 + $0x85c] sm:$0xf0]  ;;  %v4674_v4 = vld [vmem:[#allocation5 + $0x560] sm:$0xf0] }
  0x7a   :  { %v5280_v16 = vld [vmem:[#allocation5 + $0xa00] sm:$0xf]  ;;  %v5057_v20 = vor.u32 %v5814_v10, %v5056_v7  ;;  %2610 = vmatpush.bf16.msrb.mxu1 %v5313_v13  ;;  %v5778_v7 = vld [vmem:[#allocation5 + $0x744] sm:$0xf]  ;;  %v4677_v13 = vor.u32 %v5714_v3, %v4674_v4 }
  0x7b   :  { %v5870_v17 = vld [vmem:[#allocation5 + $0xa1c] sm:$0xf0]  ;;  %2648 = vmatpush.bf16.msrb.mxu3 %v4293_v24  ;;  %v4930_v8 = vld [vmem:[#allocation5 + $0x760] sm:$0xf0] }
  0x7c   :  { %v5024_v21 = vld [vmem:[#allocation5 + $0x800] sm:$0xf]  ;;  %v5281_v29 = vor.u32 %v5870_v17, %v5280_v16  ;;  %2591 = vmatpush.bf16.msrb.mxu0 %v5057_v20  ;;  %2630 = vmatpush.bf16.msrb.mxu2 %v4005_v25  ;;  %v5906_v9 = vld [vmem:[#allocation5 + $0xb44] sm:$0xf]  ;;  %v4933_v14 = vor.u32 %v5778_v7, %v4930_v8 }
  0x7d   :  { %v5806_v26 = vld [vmem:[#allocation5 + $0x81c] sm:$0xf0]  ;;  %v5442_v10 = vld [vmem:[#allocation5 + $0xb60] sm:$0xf0] }
  0x7e   :  { %v5025_v39 = vor.u32 %v5806_v26, %v5024_v21  ;;  %2611 = vmatpush.bf16.msrb.mxu1 %v5281_v29  ;;  %v5834_v11 = vld [vmem:[#allocation5 + $0x904] sm:$0xf]  ;;  %v5445_v17 = vor.u32 %v5906_v9, %v5442_v10  ;;  %v3992_v30 = vld [vmem:[#allocation2 + $0x40] sm:$0xf] }
  0x7f   :  { %2649 = vmatpush.bf16.msrb.mxu3 %v4261_v43  ;;  %v5154_v12 = vld [vmem:[#allocation5 + $0x920] sm:$0xf0]  ;;  %v6248_v58 = vor.u32 %v5545_v38, %v3992_v30  ;;  %v5000_v30 = vld [vmem:[#allocation5 + $0x7c8] sm:$0xf] }
  0x80   :  { %2699 = vmatpush.bf16.msra.mxu2 %v5253_v31  ;;  %2592 = vmatpush.bf16.msrb.mxu0 %v5025_v39  ;;  %v5706_v15 = vld [vmem:[#allocation5 + $0x504] sm:$0xf]  ;;  %v5157_v18 = vor.u32 %v5834_v11, %v5154_v12 }
  0x81   :  { %2612 = vmatmul.bf16.vlgmr.msrb.gmra.mxu1 %v6242_v61  ;;  %v4642_v16 = vld [vmem:[#allocation5 + $0x520] sm:$0xf0] }
  0x82   :  { %2680 = vmatpush.bf16.msra.mxu1 %v4997_v35  ;;  %2631 = vmatmul.bf16.vlgmr.msrb.gmra.mxu2 %v6216_v48  ;;  %v5770_v19 = vld [vmem:[#allocation5 + $0x704] sm:$0xf]  ;;  %v4645_v25 = vor.u32 %v5706_v15, %v4642_v16 }
  0x83   :  { %2718 = vmatpush.bf16.msra.mxu3 %v5509_v49  ;;  %2593 = vmatmul.bf16.vlgmr.msrb.gmra.mxu0 %v6240_v60  ;;  %v4898_v20 = vld [vmem:[#allocation5 + $0x720] sm:$0xf0] }
  0x84   :  { %2661 = vmatpush.bf16.msra.mxu0 %v4741_v45  ;;  %2700 = vmatpush.bf16.msra.mxu2 %v5221_v52  ;;  %v5898_v21 = vld [vmem:[#allocation5 + $0xb04] sm:$0xf]  ;;  %v4901_v26 = vor.u32 %v5770_v19, %v4898_v20 }
  0x85   :  { %2650 = vmatmul.bf16.vlgmr.msrb.gmra.mxu3 %v6218_v53  ;;  %v5410_v22 = vld [vmem:[#allocation5 + $0xb20] sm:$0xf0] }
  0x86   :  { %2681 = vmatpush.bf16.msra.mxu1 %v4965_v2  ;;  %v5826_v23 = vld [vmem:[#allocation5 + $0x8c4] sm:$0xf]  ;;  %v5413_v29 = vor.u32 %v5898_v21, %v5410_v22 }
  0x87   :  { %2719 = vmatpush.bf16.msra.mxu3 %v5477_v5  ;;  %v5122_v24 = vld [vmem:[#allocation5 + $0x8e0] sm:$0xf0] }
  0x88   :  { %2662 = vmatpush.bf16.msra.mxu0 %v4709_v1  ;;  %2701 = vmatpush.bf16.msra.mxu2 %v5189_v6  ;;  %v5698_v27 = vld [vmem:[#allocation5 + $0x4c4] sm:$0xf]  ;;  %v5125_v31 = vor.u32 %v5826_v23, %v5122_v24 }
  0x89   :  { %v4610_v28 = vld [vmem:[#allocation5 + $0x4e0] sm:$0xf0] }
  0x8a   :  { %2682 = vmatpush.bf16.msra.mxu1 %v4933_v14  ;;  %v5762_v32 = vld [vmem:[#allocation5 + $0x6c4] sm:$0xf]  ;;  %v4613_v41 = vor.u32 %v5698_v27, %v4610_v28  ;;  %v5735_v14 = vld [vmem:[#allocation5 + $0x5e4] sm:$0xf0] }
  0x8b   :  { %2720 = vmatpush.bf16.msra.mxu3 %v5445_v17  ;;  %v4866_v33 = vld [vmem:[#allocation5 + $0x6e0] sm:$0xf0]  ;;  %v5607_v27 = vld [vmem:[#allocation5 + $0x1e4] sm:$0xf0] }
  0x8c   :  { %2663 = vmatpush.bf16.msra.mxu0 %v4677_v13  ;;  %2702 = vmatpush.bf16.msra.mxu2 %v5157_v18  ;;  %v5890_v34 = vld [vmem:[#allocation5 + $0xac4] sm:$0xf]  ;;  %v4869_v42 = vor.u32 %v5762_v32, %v4866_v33  ;;  %v4744_v13 = vld [vmem:[#allocation5 + $0x5c8] sm:$0xf] }
  0x8d   :  { %v5378_v35 = vld [vmem:[#allocation5 + $0xae0] sm:$0xf0]  ;;  %v4488_v28 = vld [vmem:[#allocation5 + $0x3c8] sm:$0xf] }
  0x8e   :  { %v5818_v36 = vld [vmem:[#allocation5 + $0x884] sm:$0xf]  ;;  %2683 = vmatpush.bf16.msra.mxu1 %v4901_v26  ;;  %v5381_v46 = vor.u32 %v5890_v34, %v5378_v35  ;;  %v4232_v26 = vld [vmem:[#allocation5 + $0x1c8] sm:$0xf] }
  0x8f   :  { %v5090_v37 = vld [vmem:[#allocation5 + $0x8a0] sm:$0xf0]  ;;  %2721 = vmatpush.bf16.msra.mxu3 %v5413_v29  ;;  %v5671_v29 = vld [vmem:[#allocation5 + $0x3e4] sm:$0xf0] }
  0x90   :  { %v5542_v39 = vld [vmem:[#allocation2 + $0x44] sm:$0xf]  ;;  %2664 = vmatpush.bf16.msra.mxu0 %v4645_v25  ;;  %2703 = vmatpush.bf16.msra.mxu2 %v5125_v31  ;;  %v5093_v47 = vor.u32 %v5818_v36, %v5090_v37  ;;  %v4745_v25 = vor.u32 %v5735_v14, %v4744_v13  ;;  %v5799_v31 = vld [vmem:[#allocation5 + $0x7e4] sm:$0xf0]  ;;  %v4233_v37 = vor.u32 %v5607_v27, %v4232_v26 }
  0x91   :  { %v5690_v43 = vld [vmem:[#allocation5 + $0x484] sm:$0xf]  ;;  %v6250_v59 = vor.u32 %v5542_v39, %v3994_v40  ;;  %v4712_v34 = vld [vmem:[#allocation5 + $0x588] sm:$0xf]  ;;  %v4489_v38 = vor.u32 %v5671_v29, %v4488_v28  ;;  %v5001_v39 = vor.u32 %v5799_v31, %v5000_v30 }
  0x92   :  { %v4578_v45 = vld [vmem:[#allocation5 + $0x4a0] sm:$0xf0]  ;;  %2684 = vmatpush.bf16.msra.mxu1 %v4869_v42  ;;  %2636 = vmatmul.bf16.gmra.mxu2 %v6228_v44  ;;  %v5727_v35 = vld [vmem:[#allocation5 + $0x5a4] sm:$0xf0] }
  0x93   :  { %v5754_v49 = vld [vmem:[#allocation5 + $0x684] sm:$0xf]  ;;  %v4581_v1 = vor.u32 %v5690_v43, %v4578_v45  ;;  %2722 = vmatpush.bf16.msra.mxu3 %v5381_v46  ;;  %2598 = vmatmul.bf16.gmra.mxu0 %v6248_v58  ;;  %v4200_v40 = vld [vmem:[#allocation5 + $0x188] sm:$0xf]  ;;  %v4713_v42 = vor.u32 %v5727_v35, %v4712_v34 }
  0x94   :  { %v4834_v52 = vld [vmem:[#allocation5 + $0x6a0] sm:$0xf0]  ;;  %2665 = vmatpush.bf16.msra.mxu0 %v4613_v41  ;;  %2704 = vmatpush.bf16.msra.mxu2 %v5093_v47  ;;  %v5599_v41 = vld [vmem:[#allocation5 + $0x1a4] sm:$0xf0] }
  0x95   :  { %v5882_v55 = vld [vmem:[#allocation5 + $0xa84] sm:$0xf]  ;;  %v4837_v2 = vor.u32 %v5754_v49, %v4834_v52  ;;  %2617 = vmatmul.bf16.gmra.mxu1 %v6250_v59  ;;  %2655 = vmatmul.bf16.gmra.mxu3 %v6230_v50  ;;  %v4456_v43 = vld [vmem:[#allocation5 + $0x388] sm:$0xf]  ;;  %v4201_v46 = vor.u32 %v5599_v41, %v4200_v40 }
  0x96   :  { %v5346_v62 = vld [vmem:[#allocation5 + $0xaa0] sm:$0xf0]  ;;  %v5663_v45 = vld [vmem:[#allocation5 + $0x3a4] sm:$0xf0] }
  0x97   :  { %v5810_v63 = vld [vmem:[#allocation5 + $0x844] sm:$0xf]  ;;  %v5349_v5 = vor.u32 %v5882_v55, %v5346_v62  ;;  %2685 = vmatpush.bf16.msra.mxu1 %v4837_v2  ;;  %v4968_v47 = vld [vmem:[#allocation5 + $0x788] sm:$0xf] }
  0x98   :  { %v5058_v0 = vld [vmem:[#allocation5 + $0x860] sm:$0xf0]  ;;  %2666 = vmatpush.bf16.msra.mxu0 %v4581_v1  ;;  %v5791_v49 = vld [vmem:[#allocation5 + $0x7a4] sm:$0xf0] }
  0x99   :  { %v5682_v3 = vld [vmem:[#allocation5 + $0x444] sm:$0xf]  ;;  %v5061_v6 = vor.u32 %v5810_v63, %v5058_v0  ;;  %2723 = vmatpush.bf16.msra.mxu3 %v5349_v5  ;;  %v4680_v52 = vld [vmem:[#allocation5 + $0x548] sm:$0xf]  ;;  %v4457_v0 = vor.u32 %v5663_v45, %v4456_v43  ;;  %v4969_v1 = vor.u32 %v5791_v49, %v4968_v47 }
  0x9a   :  { %v4546_v4 = vld [vmem:[#allocation5 + $0x460] sm:$0xf0]  ;;  %v5719_v55 = vld [vmem:[#allocation5 + $0x564] sm:$0xf0] }
  0x9b   :  { %v5746_v7 = vld [vmem:[#allocation5 + $0x644] sm:$0xf]  ;;  %v4549_v15 = vor.u32 %v5682_v3, %v4546_v4  ;;  %2705 = vmatpush.bf16.msra.mxu2 %v5061_v6  ;;  %v4168_v62 = vld [vmem:[#allocation5 + $0x148] sm:$0xf]  ;;  %v4681_v4 = vor.u32 %v5719_v55, %v4680_v52 }
  0x9c   :  { %v4802_v8 = vld [vmem:[#allocation5 + $0x660] sm:$0xf0]  ;;  %v5591_v63 = vld [vmem:[#allocation5 + $0x164] sm:$0xf0] }
  0x9d   :  { %v5874_v9 = vld [vmem:[#allocation5 + $0xa44] sm:$0xf]  ;;  %v4805_v16 = vor.u32 %v5746_v7, %v4802_v8  ;;  %2667 = vmatpush.bf16.msra.mxu0 %v4549_v15  ;;  %v4424_v2 = vld [vmem:[#allocation5 + $0x348] sm:$0xf]  ;;  %v4169_v5 = vor.u32 %v5591_v63, %v4168_v62 }
  0x9e   :  { %v5314_v10 = vld [vmem:[#allocation5 + $0xa60] sm:$0xf0]  ;;  %v5655_v3 = vld [vmem:[#allocation5 + $0x364] sm:$0xf0] }
  0x9f   :  { %v5802_v11 = vld [vmem:[#allocation5 + $0x804] sm:$0xf]  ;;  %v5317_v20 = vor.u32 %v5874_v9, %v5314_v10  ;;  %2686 = vmatpush.bf16.msra.mxu1 %v4805_v16  ;;  %v4936_v6 = vld [vmem:[#allocation5 + $0x748] sm:$0xf] }
  0xa0   :  { %v5026_v12 = vld [vmem:[#allocation5 + $0x820] sm:$0xf0]  ;;  %v5783_v7 = vld [vmem:[#allocation5 + $0x764] sm:$0xf0] }
  0xa1   :  { %v5674_v17 = vld [vmem:[#allocation5 + $0x404] sm:$0xf]  ;;  %v5029_v21 = vor.u32 %v5802_v11, %v5026_v12  ;;  %2724 = vmatpush.bf16.msra.mxu3 %v5317_v20  ;;  %v4648_v8 = vld [vmem:[#allocation5 + $0x508] sm:$0xf]  ;;  %v4425_v12 = vor.u32 %v5655_v3, %v4424_v2  ;;  %v4937_v13 = vor.u32 %v5783_v7, %v4936_v6 }
  0xa2   :  { %v4514_v18 = vld [vmem:[#allocation5 + $0x420] sm:$0xf0]  ;;  %v5711_v9 = vld [vmem:[#allocation5 + $0x524] sm:$0xf0] }
  0xa3   :  { %v5738_v19 = vld [vmem:[#allocation5 + $0x604] sm:$0xf]  ;;  %v4517_v32 = vor.u32 %v5674_v17, %v4514_v18  ;;  %2706 = vmatpush.bf16.msra.mxu2 %v5029_v21  ;;  %v4136_v10 = vld [vmem:[#allocation5 + $0x108] sm:$0xf]  ;;  %v4649_v16 = vor.u32 %v5711_v9, %v4648_v8  ;;  %v5603_v8 = vld [vmem:[#allocation5 + $0x1cc] sm:$0xf] }
  0xa4   :  { %v4770_v22 = vld [vmem:[#allocation5 + $0x620] sm:$0xf0]  ;;  %v5583_v11 = vld [vmem:[#allocation5 + $0x124] sm:$0xf0]  ;;  %v4234_v9 = vld [vmem:[#allocation5 + $0x1e8] sm:$0xf0] }
  0xa5   :  { %v5866_v23 = vld [vmem:[#allocation5 + $0xa04] sm:$0xf]  ;;  %v4773_v33 = vor.u32 %v5738_v19, %v4770_v22  ;;  %2668 = vmatpush.bf16.msra.mxu0 %v4517_v32  ;;  %v4392_v14 = vld [vmem:[#allocation5 + $0x308] sm:$0xf]  ;;  %v4137_v17 = vor.u32 %v5583_v11, %v4136_v10 }
  0xa6   :  { %v5282_v24 = vld [vmem:[#allocation5 + $0xa20] sm:$0xf0]  ;;  %2707 = vmatmul.bf16.vlgmr.msra.gmra.mxu2 %v6240_v60  ;;  %v5647_v15 = vld [vmem:[#allocation5 + $0x324] sm:$0xf0] }
  0xa7   :  { %v5285_v36 = vor.u32 %v5866_v23, %v5282_v24  ;;  %2775 = vmatpush.bf16.msrb.mxu2 %v4745_v25  ;;  %2687 = vmatpush.bf16.msra.mxu1 %v4773_v33  ;;  %v4904_v18 = vld [vmem:[#allocation5 + $0x708] sm:$0xf]  ;;  %v4393_v24 = vor.u32 %v5647_v15, %v4392_v14 }
  0xa8   :  { %2669 = vmatmul.bf16.vlgmr.msra.gmra.mxu0 %v6220_v54  ;;  %v5775_v19 = vld [vmem:[#allocation5 + $0x724] sm:$0xf0] }
  0xa9   :  { %2725 = vmatpush.bf16.msra.mxu3 %v5285_v36  ;;  %2737 = vmatpush.bf16.msrb.mxu0 %v4233_v37  ;;  %v4616_v20 = vld [vmem:[#allocation5 + $0x4c8] sm:$0xf]  ;;  %v4905_v25 = vor.u32 %v5775_v19, %v4904_v18 }
  0xaa   :  { %2688 = vmatmul.bf16.vlgmr.msra.gmra.mxu1 %v6222_v57  ;;  %v5703_v21 = vld [vmem:[#allocation5 + $0x4e4] sm:$0xf0] }
  0xab   :  { %2756 = vmatpush.bf16.msrb.mxu1 %v4489_v38  ;;  %2776 = vmatpush.bf16.msrb.mxu2 %v4713_v42  ;;  %v4104_v22 = vld [vmem:[#allocation5 + $0xc8] sm:$0xf]  ;;  %v4617_v28 = vor.u32 %v5703_v21, %v4616_v20 }
  0xac   :  { %2726 = vmatmul.bf16.vlgmr.msra.gmra.mxu3 %v6242_v61  ;;  %v5575_v23 = vld [vmem:[#allocation5 + $0xe4] sm:$0xf0] }
  0xad   :  { %2794 = vmatpush.bf16.msrb.mxu3 %v5001_v39  ;;  %2738 = vmatpush.bf16.msrb.mxu0 %v4201_v46  ;;  %v4360_v26 = vld [vmem:[#allocation5 + $0x2c8] sm:$0xf]  ;;  %v4105_v29 = vor.u32 %v5575_v23, %v4104_v22  ;;  %v4237_v22 = vor.u32 %v5603_v8, %v4234_v9  ;;  %v5643_v8 = vld [vmem:[#allocation5 + $0x30c] sm:$0xf] }
  0xae   :  { %v5639_v27 = vld [vmem:[#allocation5 + $0x2e4] sm:$0xf0]  ;;  %v4394_v9 = vld [vmem:[#allocation5 + $0x328] sm:$0xf0] }
  0xaf   :  { %2757 = vmatpush.bf16.msrb.mxu1 %v4457_v0  ;;  %2777 = vmatpush.bf16.msrb.mxu2 %v4681_v4  ;;  %v4872_v30 = vld [vmem:[#allocation5 + $0x6c8] sm:$0xf]  ;;  %v4361_v36 = vor.u32 %v5639_v27, %v4360_v26  ;;  %v5595_v26 = vld [vmem:[#allocation5 + $0x18c] sm:$0xf] }
  0xb0   :  { %v5767_v31 = vld [vmem:[#allocation5 + $0x6e4] sm:$0xf0]  ;;  %v4202_v27 = vld [vmem:[#allocation5 + $0x1a8] sm:$0xf0] }
  0xb1   :  { %2795 = vmatpush.bf16.msrb.mxu3 %v4969_v1  ;;  %2739 = vmatpush.bf16.msrb.mxu0 %v4169_v5  ;;  %v4584_v32 = vld [vmem:[#allocation5 + $0x488] sm:$0xf]  ;;  %v4873_v37 = vor.u32 %v5767_v31, %v4872_v30 }
  0xb2   :  { %v5695_v33 = vld [vmem:[#allocation5 + $0x4a4] sm:$0xf0] }
  0xb3   :  { %2758 = vmatpush.bf16.msrb.mxu1 %v4425_v12  ;;  %2778 = vmatpush.bf16.msrb.mxu2 %v4649_v16  ;;  %v4072_v34 = vld [vmem:[#allocation5 + $0x88] sm:$0xf]  ;;  %v4585_v40 = vor.u32 %v5695_v33, %v4584_v32 }
  0xb4   :  { %v5567_v35 = vld [vmem:[#allocation5 + $0xa4] sm:$0xf0] }
  0xb5   :  { %2796 = vmatpush.bf16.msrb.mxu3 %v4937_v13  ;;  %2740 = vmatpush.bf16.msrb.mxu0 %v4137_v17  ;;  %v4328_v38 = vld [vmem:[#allocation5 + $0x288] sm:$0xf]  ;;  %v4073_v41 = vor.u32 %v5567_v35, %v4072_v34  ;;  %v4205_v35 = vor.u32 %v5595_v26, %v4202_v27 }
  0xb6   :  { %v5631_v39 = vld [vmem:[#allocation5 + $0x2a4] sm:$0xf0]  ;;  %2712 = vmatmul.bf16.gmra.mxu2 %v6248_v58 }
  0xb7   :  { %2759 = vmatpush.bf16.msrb.mxu1 %v4393_v24  ;;  %2779 = vmatpush.bf16.msrb.mxu2 %v4617_v28  ;;  %v4840_v42 = vld [vmem:[#allocation5 + $0x688] sm:$0xf]  ;;  %v4329_v52 = vor.u32 %v5631_v39, %v4328_v38  ;;  %v5667_v24 = vld [vmem:[#allocation5 + $0x3cc] sm:$0xf] }
  0xb8   :  { %v5759_v43 = vld [vmem:[#allocation5 + $0x6a4] sm:$0xf0]  ;;  %2674 = vmatmul.bf16.gmra.mxu0 %v6232_v51  ;;  %v5659_v38 = vld [vmem:[#allocation5 + $0x38c] sm:$0xf] }
  0xb9   :  { %2797 = vmatpush.bf16.msrb.mxu3 %v4905_v25  ;;  %2741 = vmatpush.bf16.msrb.mxu0 %v4105_v29  ;;  %v4552_v45 = vld [vmem:[#allocation5 + $0x448] sm:$0xf]  ;;  %v4841_v55 = vor.u32 %v5759_v43, %v4840_v42  ;;  %v4490_v25 = vld [vmem:[#allocation5 + $0x3e8] sm:$0xf0] }
  0xba   :  { %v5687_v46 = vld [vmem:[#allocation5 + $0x464] sm:$0xf0]  ;;  %2693 = vmatmul.bf16.gmra.mxu1 %v6234_v56  ;;  %v4493_v33 = vor.u32 %v5667_v24, %v4490_v25  ;;  %v4458_v39 = vld [vmem:[#allocation5 + $0x3a8] sm:$0xf0] }
  0xbb   :  { %v4040_v47 = vld [vmem:[#allocation5 + $0x48] sm:$0xf]  ;;  %2760 = vmatpush.bf16.msrb.mxu1 %v4361_v36  ;;  %2780 = vmatpush.bf16.msrb.mxu2 %v4585_v40  ;;  %v4553_v1 = vor.u32 %v5687_v46, %v4552_v45  ;;  %v5587_v40 = vld [vmem:[#allocation5 + $0x14c] sm:$0xf]  ;;  %v4461_v43 = vor.u32 %v5659_v38, %v4458_v39 }
  0xbc   :  { %v5559_v49 = vld [vmem:[#allocation5 + $0x64] sm:$0xf0]  ;;  %2731 = vmatmul.bf16.gmra.mxu3 %v6250_v59  ;;  %v5563_v24 = vld [vmem:[#allocation5 + $0x8c] sm:$0xf] }
  0xbd   :  { %2798 = vmatpush.bf16.msrb.mxu3 %v4873_v37  ;;  %v4296_v62 = vld [vmem:[#allocation5 + $0x248] sm:$0xf]  ;;  %2742 = vmatpush.bf16.msrb.mxu0 %v4073_v41  ;;  %v4041_v2 = vor.u32 %v5559_v49, %v4040_v47  ;;  %v4170_v41 = vld [vmem:[#allocation5 + $0x168] sm:$0xf0] }
  0xbe   :  { %v5623_v63 = vld [vmem:[#allocation5 + $0x264] sm:$0xf0]  ;;  %v4074_v25 = vld [vmem:[#allocation5 + $0xa8] sm:$0xf0] }
  0xbf   :  { %v4808_v0 = vld [vmem:[#allocation5 + $0x648] sm:$0xf]  ;;  %2761 = vmatpush.bf16.msrb.mxu1 %v4329_v52  ;;  %v4297_v12 = vor.u32 %v5623_v63, %v4296_v62  ;;  %2781 = vmatpush.bf16.msrb.mxu2 %v4553_v1  ;;  %v5651_v52 = vld [vmem:[#allocation5 + $0x34c] sm:$0xf]  ;;  %v4173_v62 = vor.u32 %v5587_v40, %v4170_v41 }
  0xc0   :  { %v5751_v3 = vld [vmem:[#allocation5 + $0x664] sm:$0xf0]  ;;  %v4138_v1 = vld [vmem:[#allocation5 + $0x128] sm:$0xf0] }
  0xc1   :  { %v4520_v4 = vld [vmem:[#allocation5 + $0x408] sm:$0xf]  ;;  %2799 = vmatpush.bf16.msrb.mxu3 %v4841_v55  ;;  %v4809_v13 = vor.u32 %v5751_v3, %v4808_v0  ;;  %2743 = vmatpush.bf16.msrb.mxu0 %v4041_v2  ;;  %v4426_v55 = vld [vmem:[#allocation5 + $0x368] sm:$0xf0] }
  0xc2   :  { %v5679_v5 = vld [vmem:[#allocation5 + $0x424] sm:$0xf0]  ;;  %v5579_v0 = vld [vmem:[#allocation5 + $0x10c] sm:$0xf]  ;;  %v4429_v3 = vor.u32 %v5651_v52, %v4426_v55 }
  0xc3   :  { %v4008_v6 = vld [vmem:[#allocation5 + $0x8] sm:$0xf]  ;;  %v4521_v17 = vor.u32 %v5679_v5, %v4520_v4  ;;  %2762 = vmatpush.bf16.msrb.mxu1 %v4297_v12  ;;  %v5571_v12 = vld [vmem:[#allocation5 + $0xcc] sm:$0xf] }
  0xc4   :  { %v5551_v7 = vld [vmem:[#allocation5 + $0x24] sm:$0xf0]  ;;  %v4010_v55 = vld [vmem:[#allocation5 + $0x28] sm:$0xf0] }
  0xc5   :  { %v5256_v10 = vld [vmem:[#allocation5 + $0x9c8] sm:$0xf]  ;;  %v4009_v18 = vor.u32 %v5551_v7, %v4008_v6  ;;  %2800 = vmatpush.bf16.msrb.mxu3 %v4809_v13  ;;  %2782 = vmatpush.bf16.msrb.mxu2 %v4521_v17  ;;  %v4106_v13 = vld [vmem:[#allocation5 + $0xe8] sm:$0xf0] }
  0xc6   :  { %v5863_v11 = vld [vmem:[#allocation5 + $0x9e4] sm:$0xf0] }
  0xc7   :  { %v4264_v14 = vld [vmem:[#allocation5 + $0x208] sm:$0xf]  ;;  %v5257_v23 = vor.u32 %v5863_v11, %v5256_v10  ;;  %2744 = vmatpush.bf16.msrb.mxu0 %v4009_v18  ;;  %v4141_v10 = vor.u32 %v5579_v0, %v4138_v1 }
  0xc8   :  { %v5615_v15 = vld [vmem:[#allocation5 + $0x224] sm:$0xf0]  ;;  %2783 = vmatmul.bf16.vlgmr.msrb.gmra.mxu2 %v6220_v54 }
  0xc9   :  { %v4776_v16 = vld [vmem:[#allocation5 + $0x608] sm:$0xf]  ;;  %v4265_v30 = vor.u32 %v5615_v15, %v4264_v14  ;;  %2851 = vmatpush.bf16.msra.mxu2 %v4237_v22  ;;  %v4397_v15 = vor.u32 %v5643_v8, %v4394_v9  ;;  %v4109_v22 = vor.u32 %v5571_v12, %v4106_v13  ;;  %v5731_v8 = vld [vmem:[#allocation5 + $0x5cc] sm:$0xf] }
  0xca   :  { %v5743_v19 = vld [vmem:[#allocation5 + $0x624] sm:$0xf0]  ;;  %2745 = vmatmul.bf16.vlgmr.msrb.gmra.mxu0 %v6216_v48  ;;  %v4746_v9 = vld [vmem:[#allocation5 + $0x5e8] sm:$0xf0] }
  0xcb   :  { %v5512_v20 = vld [vmem:[#allocation5 + $0xbc8] sm:$0xf]  ;;  %v4777_v31 = vor.u32 %v5743_v19, %v4776_v16  ;;  %2813 = vmatpush.bf16.msra.mxu0 %v5257_v23  ;;  %2763 = vmatpush.bf16.msrb.mxu1 %v4265_v30  ;;  %v5002_v13 = vld [vmem:[#allocation5 + $0x7e8] sm:$0xf0] }
  0xcc   :  { %v5927_v21 = vld [vmem:[#allocation5 + $0xbe4] sm:$0xf0] }
  0xcd   :  { %v5224_v28 = vld [vmem:[#allocation5 + $0x988] sm:$0xf]  ;;  %v5513_v32 = vor.u32 %v5927_v21, %v5512_v20  ;;  %2801 = vmatpush.bf16.msrb.mxu3 %v4777_v31  ;;  %2852 = vmatpush.bf16.msra.mxu2 %v4205_v35  ;;  %v5635_v20 = vld [vmem:[#allocation5 + $0x2cc] sm:$0xf] }
  0xce   :  { %v5855_v29 = vld [vmem:[#allocation5 + $0x9a4] sm:$0xf0]  ;;  %2764 = vmatmul.bf16.vlgmr.msrb.gmra.mxu1 %v6218_v53  ;;  %v4362_v21 = vld [vmem:[#allocation5 + $0x2e8] sm:$0xf0] }
  0xcf   :  { %v5480_v34 = vld [vmem:[#allocation5 + $0xb88] sm:$0xf]  ;;  %v5225_v36 = vor.u32 %v5855_v29, %v5224_v28  ;;  %2832 = vmatpush.bf16.msra.mxu1 %v5513_v32  ;;  %v4365_v27 = vor.u32 %v5635_v20, %v4362_v21  ;;  %v5627_v32 = vld [vmem:[#allocation5 + $0x28c] sm:$0xf]  ;;  %v4749_v20 = vor.u32 %v5731_v8, %v4746_v9 }
  0xd0   :  { %v5919_v37 = vld [vmem:[#allocation5 + $0xba4] sm:$0xf0]  ;;  %2802 = vmatmul.bf16.vlgmr.msrb.gmra.mxu3 %v6222_v57  ;;  %v5851_v21 = vld [vmem:[#allocation5 + $0x98c] sm:$0xf] }
  0xd1   :  { %2870 = vmatpush.bf16.msra.mxu3 %v4493_v33  ;;  %v5481_v42 = vor.u32 %v5919_v37, %v5480_v34  ;;  %v5192_v45 = vld [vmem:[#allocation5 + $0x948] sm:$0xf]  ;;  %2814 = vmatpush.bf16.msra.mxu0 %v5225_v36  ;;  %v4330_v33 = vld [vmem:[#allocation5 + $0x2a8] sm:$0xf0]  ;;  %v4077_v34 = vor.u32 %v5563_v24, %v4074_v25 }
  0xd2   :  { %v5847_v46 = vld [vmem:[#allocation5 + $0x964] sm:$0xf0]  ;;  %2853 = vmatpush.bf16.msra.mxu2 %v4173_v62  ;;  %v5555_v36 = vld [vmem:[#allocation5 + $0x4c] sm:$0xf]  ;;  %v4333_v39 = vor.u32 %v5627_v32, %v4330_v33 }
  0xd3   :  { %v5448_v47 = vld [vmem:[#allocation5 + $0xb48] sm:$0xf]  ;;  %v5193_v63 = vor.u32 %v5847_v46, %v5192_v45  ;;  %2833 = vmatpush.bf16.msra.mxu1 %v5481_v42  ;;  %v4042_v37 = vld [vmem:[#allocation5 + $0x68] sm:$0xf0] }
  0xd4   :  { %v5911_v49 = vld [vmem:[#allocation5 + $0xb64] sm:$0xf0]  ;;  %v5619_v45 = vld [vmem:[#allocation5 + $0x24c] sm:$0xf] }
  0xd5   :  { %2871 = vmatpush.bf16.msra.mxu3 %v4461_v43  ;;  %v5449_v2 = vor.u32 %v5911_v49, %v5448_v47  ;;  %v5160_v4 = vld [vmem:[#allocation5 + $0x908] sm:$0xf]  ;;  %2815 = vmatpush.bf16.msra.mxu0 %v5193_v63  ;;  %v4298_v46 = vld [vmem:[#allocation5 + $0x268] sm:$0xf0]  ;;  %v4045_v49 = vor.u32 %v5555_v36, %v4042_v37 }
  0xd6   :  { %v5839_v5 = vld [vmem:[#allocation5 + $0x924] sm:$0xf0]  ;;  %2854 = vmatpush.bf16.msra.mxu2 %v4141_v10  ;;  %v5547_v47 = vld [vmem:[#allocation5 + $0xc] sm:$0xf]  ;;  %v4301_v1 = vor.u32 %v5619_v45, %v4298_v46 }
  0xd7   :  { %v5416_v6 = vld [vmem:[#allocation5 + $0xb08] sm:$0xf]  ;;  %v5161_v11 = vor.u32 %v5839_v5, %v5160_v4  ;;  %2834 = vmatpush.bf16.msra.mxu1 %v5449_v2  ;;  %v5611_v4 = vld [vmem:[#allocation5 + $0x20c] sm:$0xf] }
  0xd8   :  { %v5903_v7 = vld [vmem:[#allocation5 + $0xb24] sm:$0xf0]  ;;  %v4266_v5 = vld [vmem:[#allocation5 + $0x228] sm:$0xf0]  ;;  %2788 = vmatmul.bf16.gmra.mxu2 %v6232_v51 }
  0xd9   :  { %2872 = vmatpush.bf16.msra.mxu3 %v4429_v3  ;;  %v5417_v14 = vor.u32 %v5903_v7, %v5416_v6  ;;  %v5128_v16 = vld [vmem:[#allocation5 + $0x8c8] sm:$0xf]  ;;  %2816 = vmatpush.bf16.msra.mxu0 %v5161_v11  ;;  %v5859_v6 = vld [vmem:[#allocation5 + $0x9cc] sm:$0xf]  ;;  %v4013_v11 = vor.u32 %v5547_v47, %v4010_v55 }
  0xda   :  { %v5831_v17 = vld [vmem:[#allocation5 + $0x8e4] sm:$0xf0]  ;;  %2855 = vmatpush.bf16.msra.mxu2 %v4109_v22  ;;  %2750 = vmatmul.bf16.gmra.mxu0 %v6228_v44  ;;  %v5258_v7 = vld [vmem:[#allocation5 + $0x9e8] sm:$0xf0]  ;;  %v2537_v47 = vpop.f32.mrf.mxu1 }
  0xdb   :  { %v5384_v18 = vld [vmem:[#allocation5 + $0xac8] sm:$0xf]  ;;  %v5129_v23 = vor.u32 %v5831_v17, %v5128_v16  ;;  %2835 = vmatpush.bf16.msra.mxu1 %v5417_v14  ;;  %v5795_v10 = vld [vmem:[#allocation5 + $0x7cc] sm:$0xf]  ;;  %v4269_v17 = vor.u32 %v5611_v4, %v4266_v5 }
  0xdc   :  { %v5895_v19 = vld [vmem:[#allocation5 + $0xae4] sm:$0xf0]  ;;  %v5923_v14 = vld [vmem:[#allocation5 + $0xbcc] sm:$0xf] }
  0xdd   :  { %2873 = vmatpush.bf16.msra.mxu3 %v4397_v15  ;;  %v5385_v26 = vor.u32 %v5895_v19, %v5384_v18  ;;  %v5096_v28 = vld [vmem:[#allocation5 + $0x888] sm:$0xf]  ;;  %2817 = vmatpush.bf16.msra.mxu0 %v5129_v23  ;;  %v5514_v15 = vld [vmem:[#allocation5 + $0xbe8] sm:$0xf0]  ;;  %v6272_v18 = vld [vmem:[#allocation7] sm:$0xff]  ;;  %v5261_v19 = vor.u32 %v5859_v6, %v5258_v7  ;;  %v5005_v23 = vor.u32 %v5795_v10, %v5002_v13 }
  0xde   :  { %v5823_v29 = vld [vmem:[#allocation5 + $0x8a4] sm:$0xf0]  ;;  %2856 = vmatpush.bf16.msra.mxu2 %v4077_v34  ;;  %2769 = vmatmul.bf16.gmra.mxu1 %v6230_v50  ;;  %v5226_v22 = vld [vmem:[#allocation5 + $0x9a8] sm:$0xf0]  ;;  %v5517_v24 = vor.u32 %v5923_v14, %v5514_v15  ;;  %v6275_v33 = vperm.slane %v6272_v18, 0 }
  0xdf   :  { %v5352_v30 = vld [vmem:[#allocation5 + $0xa88] sm:$0xf]  ;;  %v5097_v35 = vor.u32 %v5823_v29, %v5096_v28  ;;  %2836 = vmatpush.bf16.msra.mxu1 %v5385_v26  ;;  %v5723_v25 = vld [vmem:[#allocation5 + $0x58c] sm:$0xf] }
  0xe0   :  { %v5887_v31 = vld [vmem:[#allocation5 + $0xaa4] sm:$0xf0]  ;;  %2807 = vmatmul.bf16.gmra.mxu3 %v6234_v56  ;;  %v4714_v26 = vld [vmem:[#allocation5 + $0x5a8] sm:$0xf0] }
  0xe1   :  { %2874 = vmatpush.bf16.msra.mxu3 %v4365_v27  ;;  %v5353_v38 = vor.u32 %v5887_v31, %v5352_v30  ;;  %v5064_v40 = vld [vmem:[#allocation5 + $0x848] sm:$0xf]  ;;  %2818 = vmatpush.bf16.msra.mxu0 %v5097_v35  ;;  %v5787_v27 = vld [vmem:[#allocation5 + $0x78c] sm:$0xf]  ;;  %v5229_v31 = vor.u32 %v5851_v21, %v5226_v22  ;;  %v4717_v32 = vor.u32 %v5723_v25, %v4714_v26 }
  0xe2   :  { %v5815_v41 = vld [vmem:[#allocation5 + $0x864] sm:$0xf0]  ;;  %2857 = vmatpush.bf16.msra.mxu2 %v4045_v49  ;;  %v4970_v28 = vld [vmem:[#allocation5 + $0x7a8] sm:$0xf0]  ;;  %v2539_v26 = vpop.f32.mrf.mxu1 }
  0xe3   :  { %v5320_v42 = vld [vmem:[#allocation5 + $0xa48] sm:$0xf]  ;;  %v5065_v52 = vor.u32 %v5815_v41, %v5064_v40  ;;  %2837 = vmatpush.bf16.msra.mxu1 %v5353_v38  ;;  %v5915_v29 = vld [vmem:[#allocation5 + $0xb8c] sm:$0xf]  ;;  %v4973_v34 = vor.u32 %v5787_v27, %v4970_v28  ;;  %v2518_v41 = vpop.f32.mrf.mxu0 }
  0xe4   :  { %v5879_v43 = vld [vmem:[#allocation5 + $0xa64] sm:$0xf0]  ;;  %v5482_v30 = vld [vmem:[#allocation5 + $0xba8] sm:$0xf0]  ;;  %v2519_v46 = vadd.f32 %v2518_v41, %v6275_v33 }
  0xe5   :  { %v5032_v62 = vld [vmem:[#allocation5 + $0x808] sm:$0xf]  ;;  %2875 = vmatpush.bf16.msra.mxu3 %v4333_v39  ;;  %v5321_v0 = vor.u32 %v5879_v43, %v5320_v42  ;;  %2819 = vmatpush.bf16.msra.mxu0 %v5065_v52  ;;  %v5485_v35 = vor.u32 %v5915_v29, %v5482_v30  ;;  %v5843_v36 = vld [vmem:[#allocation5 + $0x94c] sm:$0xf] }
  0xe6   :  { %v5807_v63 = vld [vmem:[#allocation5 + $0x824] sm:$0xf0]  ;;  %2858 = vmatpush.bf16.msra.mxu2 %v4013_v11  ;;  %v5194_v37 = vld [vmem:[#allocation5 + $0x968] sm:$0xf0] }
  0xe7   :  { %v5288_v2 = vld [vmem:[#allocation5 + $0xa08] sm:$0xf]  ;;  %v5033_v12 = vor.u32 %v5807_v63, %v5032_v62  ;;  %2838 = vmatpush.bf16.msra.mxu1 %v5321_v0  ;;  %v5715_v38 = vld [vmem:[#allocation5 + $0x54c] sm:$0xf]  ;;  %v5197_v49 = vor.u32 %v5843_v36, %v5194_v37  ;;  %v2538_v63 = vadd.f32 %v2537_v47, %v2519_v46 }
  0xe8   :  { %v5871_v3 = vld [vmem:[#allocation5 + $0xa24] sm:$0xf0]  ;;  %v4682_v39 = vld [vmem:[#allocation5 + $0x568] sm:$0xf0] }
  0xe9   :  { %2876 = vmatpush.bf16.msra.mxu3 %v4301_v1  ;;  %v5289_v16 = vor.u32 %v5871_v3, %v5288_v2  ;;  %2820 = vmatpush.bf16.msra.mxu0 %v5033_v12  ;;  %v5779_v40 = vld [vmem:[#allocation5 + $0x74c] sm:$0xf]  ;;  %v4685_v52 = vor.u32 %v5715_v38, %v4682_v39  ;;  %v2556_v12 = vpop.f32.mrf.mxu2 }
  0xea   :  { %2927 = vmatpush.bf16.msrb.mxu2 %v5261_v19  ;;  %v4938_v42 = vld [vmem:[#allocation5 + $0x768] sm:$0xf0]  ;;  %v2557_v19 = vadd.f32 %v2556_v12, %v2538_v63 }
  0xeb   :  { %2839 = vmatpush.bf16.msra.mxu1 %v5289_v16  ;;  %v5907_v43 = vld [vmem:[#allocation5 + $0xb4c] sm:$0xf]  ;;  %v4941_v0 = vor.u32 %v5779_v40, %v4938_v42  ;;  %2859 = vmatmul.bf16.vlgmr.msra.gmra.mxu2 %v6216_v48  ;;  %v2520_v21 = vpop.f32.mrf.mxu0 }
  0xec   :  { %v5450_v45 = vld [vmem:[#allocation5 + $0xb68] sm:$0xf0]  ;;  %2821 = vmatmul.bf16.vlgmr.msra.gmra.mxu0 %v6240_v60  ;;  %v2521_v25 = vadd.f32 %v2520_v21, %v6275_v33 }
  0xed   :  { %2877 = vmatpush.bf16.msra.mxu3 %v4269_v17  ;;  %2889 = vmatpush.bf16.msrb.mxu0 %v4749_v20  ;;  %v5835_v55 = vld [vmem:[#allocation5 + $0x90c] sm:$0xf]  ;;  %v5453_v1 = vor.u32 %v5907_v43, %v5450_v45  ;;  %v2575_v20 = vpop.f32.mrf.mxu3 }
  0xee   :  { %2928 = vmatpush.bf16.msrb.mxu2 %v5229_v31  ;;  %v5162_v62 = vld [vmem:[#allocation5 + $0x928] sm:$0xf0]  ;;  %2840 = vmatmul.bf16.vlgmr.msra.gmra.mxu1 %v6242_v61  ;;  %v6283_v27 = vadd.f32 %v2575_v20, %v2557_v19 }
  0xef   :  { %2908 = vmatpush.bf16.msrb.mxu1 %v5005_v23  ;;  %v5707_v2 = vld [vmem:[#allocation5 + $0x50c] sm:$0xf]  ;;  %v5165_v8 = vor.u32 %v5835_v55, %v5162_v62 }
  0xf0   :  { %v4650_v3 = vld [vmem:[#allocation5 + $0x528] sm:$0xf0]  ;;  %2878 = vmatmul.bf16.vlgmr.msra.gmra.mxu3 %v6218_v53 }
  0xf1   :  { %2946 = vmatpush.bf16.msrb.mxu3 %v5517_v24  ;;  %2890 = vmatpush.bf16.msrb.mxu0 %v4717_v32  ;;  %v5771_v4 = vld [vmem:[#allocation5 + $0x70c] sm:$0xf]  ;;  %v4653_v9 = vor.u32 %v5707_v2, %v4650_v3  ;;  %v2540_v32 = vadd.f32 %v2539_v26, %v2521_v25  ;;  %v2558_v47 = vpop.f32.mrf.mxu2  ;;  %v4240_v25 = vld [vmem:[#allocation5 + $0x1d0] sm:$0xf] }
  0xf2   :  { %v4906_v5 = vld [vmem:[#allocation5 + $0x728] sm:$0xf0]  ;;  %2929 = vmatpush.bf16.msrb.mxu2 %v5197_v49  ;;  %v5608_v26 = vld [vmem:[#allocation5 + $0x1ec] sm:$0xf0] }
  0xf3   :  { %2909 = vmatpush.bf16.msrb.mxu1 %v4973_v34  ;;  %v5899_v6 = vld [vmem:[#allocation5 + $0xb0c] sm:$0xf]  ;;  %v4909_v13 = vor.u32 %v5771_v4, %v4906_v5  ;;  %v2523_v2 = vpop.f32.mrf.mxu0 }
  0xf4   :  { %v5418_v7 = vld [vmem:[#allocation5 + $0xb28] sm:$0xf0] }
  0xf5   :  { %2947 = vmatpush.bf16.msrb.mxu3 %v5485_v35  ;;  %2891 = vmatpush.bf16.msrb.mxu0 %v4685_v52  ;;  %v5827_v10 = vld [vmem:[#allocation5 + $0x8cc] sm:$0xf]  ;;  %v5421_v14 = vor.u32 %v5899_v6, %v5418_v7  ;;  %v2524_v6 = vadd.f32 %v2523_v2, %v6275_v33  ;;  %v2542_v7 = vpop.f32.mrf.mxu1  ;;  %v4976_v2 = vld [vmem:[#allocation5 + $0x790] sm:$0xf] }
  0xf6   :  { %v5130_v11 = vld [vmem:[#allocation5 + $0x8e8] sm:$0xf0]  ;;  %2930 = vmatpush.bf16.msrb.mxu2 %v5165_v8 }
  0xf7   :  { %2910 = vmatpush.bf16.msrb.mxu1 %v4941_v0  ;;  %v5699_v15 = vld [vmem:[#allocation5 + $0x4cc] sm:$0xf]  ;;  %v5133_v28 = vor.u32 %v5827_v10, %v5130_v11  ;;  %v2559_v0 = vadd.f32 %v2558_v47, %v2540_v32  ;;  %v5008_v32 = vld [vmem:[#allocation5 + $0x7d0] sm:$0xf] }
  0xf8   :  { %v4618_v16 = vld [vmem:[#allocation5 + $0x4e8] sm:$0xf0] }
  0xf9   :  { %2948 = vmatpush.bf16.msrb.mxu3 %v5453_v1  ;;  %v5763_v17 = vld [vmem:[#allocation5 + $0x6cc] sm:$0xf]  ;;  %2892 = vmatpush.bf16.msrb.mxu0 %v4653_v9  ;;  %v4621_v29 = vor.u32 %v5699_v15, %v4618_v16  ;;  %v2577_v1 = vpop.f32.mrf.mxu3  ;;  %v2543_v15 = vadd.f32 %v2542_v7, %v2524_v6 }
  0xfa   :  { %v4874_v22 = vld [vmem:[#allocation5 + $0x6e8] sm:$0xf0]  ;;  %2931 = vmatpush.bf16.msrb.mxu2 %v5133_v28  ;;  %v6286_v9 = vadd.f32 %v2577_v1, %v2559_v0  ;;  %v4496_v28 = vld [vmem:[#allocation5 + $0x3d0] sm:$0xf] }
  0xfb   :  { %v5891_v23 = vld [vmem:[#allocation5 + $0xacc] sm:$0xf]  ;;  %2911 = vmatpush.bf16.msrb.mxu1 %v4909_v13  ;;  %v4877_v34 = vor.u32 %v5763_v17, %v4874_v22  ;;  %2864 = vmatmul.bf16.gmra.mxu2 %v6228_v44  ;;  %v5664_v1 = vld [vmem:[#allocation5 + $0x3ac] sm:$0xf0] }
  0xfc   :  { %v5386_v24 = vld [vmem:[#allocation5 + $0xae8] sm:$0xf0]  ;;  %2826 = vmatmul.bf16.gmra.mxu0 %v6248_v58 }
  0xfd   :  { %v5819_v30 = vld [vmem:[#allocation5 + $0x88c] sm:$0xf]  ;;  %2949 = vmatpush.bf16.msrb.mxu3 %v5421_v14  ;;  %v5389_v35 = vor.u32 %v5891_v23, %v5386_v24  ;;  %2893 = vmatpush.bf16.msrb.mxu0 %v4621_v29  ;;  %v4752_v23 = vld [vmem:[#allocation5 + $0x5d0] sm:$0xf]  ;;  %v2544_v47 = vpop.f32.mrf.mxu1 }
  0xfe   :  { %v5098_v31 = vld [vmem:[#allocation5 + $0x8a8] sm:$0xf0]  ;;  %2845 = vmatmul.bf16.gmra.mxu1 %v6250_v59  ;;  %v5736_v24 = vld [vmem:[#allocation5 + $0x5ec] sm:$0xf0] }
  0xff   :  { %v5691_v36 = vld [vmem:[#allocation5 + $0x48c] sm:$0xf]  ;;  %v5101_v42 = vor.u32 %v5819_v30, %v5098_v31  ;;  %2912 = vmatpush.bf16.msrb.mxu1 %v4877_v34  ;;  %v5672_v31 = vld [vmem:[#allocation5 + $0x3ec] sm:$0xf0] }
 0x100   :  { %v4586_v37 = vld [vmem:[#allocation5 + $0x4a8] sm:$0xf0]  ;;  %2883 = vmatmul.bf16.gmra.mxu3 %v6230_v50  ;;  %v5800_v34 = vld [vmem:[#allocation5 + $0x7ec] sm:$0xf0] }
 0x101   :  { %v5755_v38 = vld [vmem:[#allocation5 + $0x68c] sm:$0xf]  ;;  %v4589_v43 = vor.u32 %v5691_v36, %v4586_v37  ;;  %2950 = vmatpush.bf16.msrb.mxu3 %v5389_v35  ;;  %2932 = vmatpush.bf16.msrb.mxu2 %v5101_v42  ;;  %v2561_v35 = vpop.f32.mrf.mxu2  ;;  %v4241_v42 = vor.u32 %v5608_v26, %v4240_v25 }
 0x102   :  { %v4842_v39 = vld [vmem:[#allocation5 + $0x6a8] sm:$0xf0] }
 0x103   :  { %v5883_v40 = vld [vmem:[#allocation5 + $0xa8c] sm:$0xf]  ;;  %v4845_v49 = vor.u32 %v5755_v38, %v4842_v39  ;;  %2894 = vmatpush.bf16.msrb.mxu0 %v4589_v43  ;;  %v2562_v38 = vadd.f32 %v2561_v35, %v2543_v15  ;;  %v2580_v39 = vpop.f32.mrf.mxu3  ;;  %v4720_v43 = vld [vmem:[#allocation5 + $0x590] sm:$0xf] }
 0x104   :  { %v5354_v41 = vld [vmem:[#allocation5 + $0xaa8] sm:$0xf0]  ;;  %v4400_v35 = vld [vmem:[#allocation5 + $0x310] sm:$0xf] }
 0x105   :  { %v5811_v45 = vld [vmem:[#allocation5 + $0x84c] sm:$0xf]  ;;  %v5357_v52 = vor.u32 %v5883_v40, %v5354_v41  ;;  %2913 = vmatpush.bf16.msrb.mxu1 %v4845_v49  ;;  %v2525_v40 = vpop.f32.mrf.mxu0  ;;  %v4753_v41 = vor.u32 %v5736_v24, %v4752_v23  ;;  %v4497_v49 = vor.u32 %v5672_v31, %v4496_v28  ;;  %v6293_v0 = vadd.f32 %v2580_v39, %v2562_v38  ;;  %v4656_v28 = vld [vmem:[#allocation5 + $0x510] sm:$0xf] }
 0x106   :  { %v5066_v46 = vld [vmem:[#allocation5 + $0x868] sm:$0xf0]  ;;  %v4912_v38 = vld [vmem:[#allocation5 + $0x710] sm:$0xf] }
 0x107   :  { %v5683_v55 = vld [vmem:[#allocation5 + $0x44c] sm:$0xf]  ;;  %v5069_v10 = vor.u32 %v5811_v45, %v5066_v46  ;;  %2951 = vmatpush.bf16.msrb.mxu3 %v5357_v52  ;;  %v5728_v45 = vld [vmem:[#allocation5 + $0x5ac] sm:$0xf0]  ;;  %v2526_v46 = vadd.f32 %v2525_v40, %v6275_v33  ;;  %v5009_v52 = vor.u32 %v5800_v34, %v5008_v32 }
 0x108   :  { %v4554_v62 = vld [vmem:[#allocation5 + $0x468] sm:$0xf0]  ;;  %v4144_v32 = vld [vmem:[#allocation5 + $0x110] sm:$0xf] }
 0x109   :  { %v5747_v63 = vld [vmem:[#allocation5 + $0x64c] sm:$0xf]  ;;  %v4557_v11 = vor.u32 %v5683_v55, %v4554_v62  ;;  %2933 = vmatpush.bf16.msrb.mxu2 %v5069_v10  ;;  %v4208_v55 = vld [vmem:[#allocation5 + $0x190] sm:$0xf] }
 0x10a   :  { %v4810_v3 = vld [vmem:[#allocation5 + $0x668] sm:$0xf0]  ;;  %v5600_v62 = vld [vmem:[#allocation5 + $0x1ac] sm:$0xf0] }
 0x10b   :  { %v5875_v4 = vld [vmem:[#allocation5 + $0xa4c] sm:$0xf]  ;;  %v4813_v16 = vor.u32 %v5747_v63, %v4810_v3  ;;  %2895 = vmatpush.bf16.msrb.mxu0 %v4557_v11  ;;  %v4464_v63 = vld [vmem:[#allocation5 + $0x390] sm:$0xf]  ;;  %v4209_v33 = vor.u32 %v5600_v62, %v4208_v55  ;;  %v2563_v11 = vpop.f32.mrf.mxu2 }
 0x10c   :  { %v5322_v5 = vld [vmem:[#allocation5 + $0xa68] sm:$0xf0]  ;;  %v5792_v3 = vld [vmem:[#allocation5 + $0x7ac] sm:$0xf0]  ;;  %v4465_v6 = vor.u32 %v5664_v1, %v4464_v63 }
 0x10d   :  { %v5803_v8 = vld [vmem:[#allocation5 + $0x80c] sm:$0xf]  ;;  %v5325_v17 = vor.u32 %v5875_v4, %v5322_v5  ;;  %2914 = vmatpush.bf16.msrb.mxu1 %v4813_v16  ;;  %v2545_v4 = vadd.f32 %v2544_v47, %v2526_v46  ;;  %v4721_v5 = vor.u32 %v5728_v45, %v4720_v43  ;;  %v4977_v7 = vor.u32 %v5792_v3, %v4976_v2  ;;  %v5720_v10 = vld [vmem:[#allocation5 + $0x56c] sm:$0xf0]  ;;  %v2582_v16 = vpop.f32.mrf.mxu3 }
 0x10e   :  { %v5034_v12 = vld [vmem:[#allocation5 + $0x828] sm:$0xf0]  ;;  %v5584_v34 = vld [vmem:[#allocation5 + $0x12c] sm:$0xf0] }
 0x10f   :  { %v5675_v13 = vld [vmem:[#allocation5 + $0x40c] sm:$0xf]  ;;  %v5037_v29 = vor.u32 %v5803_v8, %v5034_v12  ;;  %2952 = vmatpush.bf16.msrb.mxu3 %v5325_v17  ;;  %v4688_v8 = vld [vmem:[#allocation5 + $0x550] sm:$0xf]  ;;  %v2564_v15 = vadd.f32 %v2563_v11, %v2545_v4 }
 0x110   :  { %v4522_v14 = vld [vmem:[#allocation5 + $0x428] sm:$0xf0]  ;;  %v4176_v12 = vld [vmem:[#allocation5 + $0x150] sm:$0xf]  ;;  %v4689_v25 = vor.u32 %v5720_v10, %v4688_v8 }
 0x111   :  { %v5739_v19 = vld [vmem:[#allocation5 + $0x60c] sm:$0xf]  ;;  %v4525_v30 = vor.u32 %v5675_v13, %v4522_v14  ;;  %2934 = vmatpush.bf16.msrb.mxu2 %v5037_v29  ;;  %v5592_v13 = vld [vmem:[#allocation5 + $0x16c] sm:$0xf0]  ;;  %v6295_v23 = vadd.f32 %v2582_v16, %v2564_v15 }
 0x112   :  { %v4778_v20 = vld [vmem:[#allocation5 + $0x628] sm:$0xf0]  ;;  %v4432_v14 = vld [vmem:[#allocation5 + $0x350] sm:$0xf]  ;;  %v4177_v26 = vor.u32 %v5592_v13, %v4176_v12 }
 0x113   :  { %v5867_v21 = vld [vmem:[#allocation5 + $0xa0c] sm:$0xf]  ;;  %v4781_v36 = vor.u32 %v5739_v19, %v4778_v20  ;;  %2896 = vmatpush.bf16.msrb.mxu0 %v4525_v30  ;;  %v5656_v17 = vld [vmem:[#allocation5 + $0x36c] sm:$0xf0]  ;;  %v2632_v55 = vpop.f32.mrf.mxu2 }
 0x114   :  { %v5290_v22 = vld [vmem:[#allocation5 + $0xa28] sm:$0xf0]  ;;  %v4944_v19 = vld [vmem:[#allocation5 + $0x750] sm:$0xf]  ;;  %v4433_v30 = vor.u32 %v5656_v17, %v4432_v14  ;;  %2935 = vmatmul.bf16.vlgmr.msrb.gmra.mxu2 %v6240_v60 }
 0x115   :  { %v5293_v37 = vor.u32 %v5867_v21, %v5290_v22  ;;  %2915 = vmatpush.bf16.msrb.mxu1 %v4781_v36  ;;  %3003 = vmatpush.bf16.msra.mxu2 %v4753_v41  ;;  %v5784_v20 = vld [vmem:[#allocation5 + $0x76c] sm:$0xf0]  ;;  %v2594_v21 = vpop.f32.mrf.mxu0  ;;  %v2613_v22 = vpop.f32.mrf.mxu1  ;;  %v4145_v41 = vor.u32 %v5584_v34, %v4144_v32 }
 0x116   :  { %v2595_v24 = vadd.f32 %v2594_v21, %v6283_v27  ;;  %v5712_v29 = vld [vmem:[#allocation5 + $0x52c] sm:$0xf0]  ;;  %v4945_v31 = vor.u32 %v5784_v20, %v4944_v19  ;;  %2897 = vmatmul.bf16.vlgmr.msrb.gmra.mxu0 %v6220_v54  ;;  %v6305_v27 = vperm.slane %v6272_v18, 1  ;;  %v2651_v62 = vpop.f32.mrf.mxu3 }
 0x117   :  { %2953 = vmatpush.bf16.msrb.mxu3 %v5293_v37  ;;  %2965 = vmatpush.bf16.msra.mxu0 %v4241_v42  ;;  %v5648_v37 = vld [vmem:[#allocation5 + $0x32c] sm:$0xf0]  ;;  %v4657_v40 = vor.u32 %v5712_v29, %v4656_v28 }
 0x118   :  { %v6298_v36 = vadd.f32 %v2613_v22, %v2595_v24  ;;  %2916 = vmatmul.bf16.vlgmr.msrb.gmra.mxu1 %v6222_v57  ;;  %v5776_v39 = vld [vmem:[#allocation5 + $0x72c] sm:$0xf0]  ;;  %v4401_v45 = vor.u32 %v5648_v37, %v4400_v35  ;;  %v2633_v18 = vadd.f32 %v2632_v55, %v6305_v27 }
 0x119   :  { %2984 = vmatpush.bf16.msra.mxu1 %v4497_v49  ;;  %3004 = vmatpush.bf16.msra.mxu2 %v4721_v5  ;;  %v4624_v42 = vld [vmem:[#allocation5 + $0x4d0] sm:$0xf]  ;;  %v4913_v46 = vor.u32 %v5776_v39, %v4912_v38 }
 0x11a   :  { %2954 = vmatmul.bf16.vlgmr.msrb.gmra.mxu3 %v6242_v61  ;;  %v5704_v43 = vld [vmem:[#allocation5 + $0x4ec] sm:$0xf0]  ;;  %v6309_v10 = vadd.f32 %v2651_v62, %v2633_v18 }
 0x11b   :  { %3022 = vmatpush.bf16.msra.mxu3 %v5009_v52  ;;  %2966 = vmatpush.bf16.msra.mxu0 %v4209_v33  ;;  %v4112_v47 = vld [vmem:[#allocation5 + $0xd0] sm:$0xf]  ;;  %v4625_v33 = vor.u32 %v5704_v43, %v4624_v42 }
 0x11c   :  { %v5576_v49 = vld [vmem:[#allocation5 + $0xec] sm:$0xf0] }
 0x11d   :  { %2985 = vmatpush.bf16.msra.mxu1 %v4465_v6  ;;  %3005 = vmatpush.bf16.msra.mxu2 %v4689_v25  ;;  %v4368_v52 = vld [vmem:[#allocation5 + $0x2d0] sm:$0xf]  ;;  %v2596_v3 = vpop.f32.mrf.mxu0  ;;  %v2615_v4 = vpop.f32.mrf.mxu1  ;;  %v4113_v6 = vor.u32 %v5576_v49, %v4112_v47 }
 0x11e   :  { %v5640_v63 = vld [vmem:[#allocation5 + $0x2ec] sm:$0xf0]  ;;  %v2597_v5 = vadd.f32 %v2596_v3, %v6286_v9  ;;  %v2653_v32 = vpop.f32.mrf.mxu3  ;;  %v5604_v3 = vld [vmem:[#allocation5 + $0x1d4] sm:$0xf] }
 0x11f   :  { %3023 = vmatpush.bf16.msra.mxu3 %v4977_v7  ;;  %2967 = vmatpush.bf16.msra.mxu0 %v4177_v26  ;;  %v4880_v1 = vld [vmem:[#allocation5 + $0x6d0] sm:$0xf]  ;;  %v4369_v11 = vor.u32 %v5640_v63, %v4368_v52 }
 0x120   :  { %v5768_v2 = vld [vmem:[#allocation5 + $0x6ec] sm:$0xf0]  ;;  %v6311_v16 = vadd.f32 %v2615_v4, %v2597_v5  ;;  %v4242_v4 = vld [vmem:[#allocation5 + $0x1f0] sm:$0xf0] }
 0x121   :  { %2986 = vmatpush.bf16.msra.mxu1 %v4433_v30  ;;  %3006 = vmatpush.bf16.msra.mxu2 %v4657_v40  ;;  %v4592_v7 = vld [vmem:[#allocation5 + $0x490] sm:$0xf]  ;;  %v4881_v12 = vor.u32 %v5768_v2, %v4880_v1 }
 0x122   :  { %v5696_v8 = vld [vmem:[#allocation5 + $0x4ac] sm:$0xf0] }
 0x123   :  { %3024 = vmatpush.bf16.msra.mxu3 %v4945_v31  ;;  %2968 = vmatpush.bf16.msra.mxu0 %v4145_v41  ;;  %v4080_v13 = vld [vmem:[#allocation5 + $0x90] sm:$0xf]  ;;  %v4593_v20 = vor.u32 %v5696_v8, %v4592_v7  ;;  %v2634_v31 = vpop.f32.mrf.mxu2 }
 0x124   :  { %v5568_v14 = vld [vmem:[#allocation5 + $0xac] sm:$0xf0]  ;;  %v2635_v38 = vadd.f32 %v2634_v31, %v6305_v27  ;;  %2940 = vmatmul.bf16.gmra.mxu2 %v6248_v58 }
 0x125   :  { %2987 = vmatpush.bf16.msra.mxu1 %v4401_v45  ;;  %v4336_v15 = vld [vmem:[#allocation5 + $0x290] sm:$0xf]  ;;  %3007 = vmatpush.bf16.msra.mxu2 %v4625_v33  ;;  %v4081_v21 = vor.u32 %v5568_v14, %v4080_v13  ;;  %v2599_v39 = vpop.f32.mrf.mxu0  ;;  %v2618_v40 = vpop.f32.mrf.mxu1  ;;  %v4498_v13 = vld [vmem:[#allocation5 + $0x3f0] sm:$0xf0] }
 0x126   :  { %v5632_v17 = vld [vmem:[#allocation5 + $0x2ac] sm:$0xf0]  ;;  %v2600_v42 = vadd.f32 %v2599_v39, %v6293_v0  ;;  %v6315_v52 = vadd.f32 %v2653_v32, %v2635_v38  ;;  %2902 = vmatmul.bf16.gmra.mxu0 %v6232_v51  ;;  %v4466_v38 = vld [vmem:[#allocation5 + $0x3b0] sm:$0xf0] }
 0x127   :  { %3025 = vmatpush.bf16.msra.mxu3 %v4913_v46  ;;  %v4848_v19 = vld [vmem:[#allocation5 + $0x690] sm:$0xf]  ;;  %2969 = vmatpush.bf16.msra.mxu0 %v4113_v6  ;;  %v4337_v25 = vor.u32 %v5632_v17, %v4336_v15 }
 0x128   :  { %v5760_v9 = vld [vmem:[#allocation5 + $0x6ac] sm:$0xf0]  ;;  %v6317_v18 = vadd.f32 %v2618_v40, %v2600_v42  ;;  %2921 = vmatmul.bf16.gmra.mxu1 %v6234_v56 }
 0x129   :  { %v4560_v22 = vld [vmem:[#allocation5 + $0x450] sm:$0xf]  ;;  %2988 = vmatpush.bf16.msra.mxu1 %v4369_v11  ;;  %v4849_v26 = vor.u32 %v5760_v9, %v4848_v19  ;;  %3008 = vmatpush.bf16.msra.mxu2 %v4593_v20  ;;  %v2656_v19 = vpop.f32.mrf.mxu3  ;;  %v4245_v9 = vor.u32 %v5604_v3, %v4242_v4 }
 0x12a   :  { %v5688_v24 = vld [vmem:[#allocation5 + $0x46c] sm:$0xf0]  ;;  %2959 = vmatmul.bf16.gmra.mxu3 %v6250_v59 }
 0x12b   :  { %3026 = vmatpush.bf16.msra.mxu3 %v4881_v12  ;;  %v4048_v28 = vld [vmem:[#allocation5 + $0x50] sm:$0xf]  ;;  %2970 = vmatpush.bf16.msra.mxu0 %v4081_v21  ;;  %v4561_v43 = vor.u32 %v5688_v24, %v4560_v22  ;;  %v5668_v12 = vld [vmem:[#allocation5 + $0x3d4] sm:$0xf]  ;;  %v2637_v17 = vpop.f32.mrf.mxu2 }
 0x12c   :  { %v5560_v29 = vld [vmem:[#allocation5 + $0x6c] sm:$0xf0]  ;;  %v5596_v21 = vld [vmem:[#allocation5 + $0x194] sm:$0xf]  ;;  %v2638_v24 = vadd.f32 %v2637_v17, %v6305_v27 }
 0x12d   :  { %v4304_v30 = vld [vmem:[#allocation5 + $0x250] sm:$0xf]  ;;  %v4049_v45 = vor.u32 %v5560_v29, %v4048_v28  ;;  %2989 = vmatpush.bf16.msra.mxu1 %v4337_v25  ;;  %3009 = vmatpush.bf16.msra.mxu2 %v4561_v43  ;;  %v4210_v22 = vld [vmem:[#allocation5 + $0x1b0] sm:$0xf0]  ;;  %v2601_v25 = vpop.f32.mrf.mxu0  ;;  %v4501_v29 = vor.u32 %v5668_v12, %v4498_v13 }
 0x12e   :  { %v5624_v34 = vld [vmem:[#allocation5 + $0x26c] sm:$0xf0]  ;;  %v6325_v39 = vadd.f32 %v2656_v19, %v2638_v24  ;;  %v5572_v24 = vld [vmem:[#allocation5 + $0xd4] sm:$0xf] }
 0x12f   :  { %v4816_v35 = vld [vmem:[#allocation5 + $0x650] sm:$0xf]  ;;  %3027 = vmatpush.bf16.msra.mxu3 %v4849_v26  ;;  %v4305_v55 = vor.u32 %v5624_v34, %v4304_v30  ;;  %2971 = vmatpush.bf16.msra.mxu0 %v4049_v45  ;;  %v2620_v26 = vpop.f32.mrf.mxu1  ;;  %v2602_v34 = vadd.f32 %v2601_v25, %v6295_v23  ;;  %v5588_v23 = vld [vmem:[#allocation5 + $0x154] sm:$0xf] }
 0x130   :  { %v5752_v37 = vld [vmem:[#allocation5 + $0x66c] sm:$0xf0]  ;;  %v4114_v25 = vld [vmem:[#allocation5 + $0xf0] sm:$0xf0] }
 0x131   :  { %v4528_v41 = vld [vmem:[#allocation5 + $0x410] sm:$0xf]  ;;  %v4817_v62 = vor.u32 %v5752_v37, %v4816_v35  ;;  %2990 = vmatpush.bf16.msra.mxu1 %v4305_v55  ;;  %v5660_v37 = vld [vmem:[#allocation5 + $0x394] sm:$0xf]  ;;  %v6327_v40 = vadd.f32 %v2620_v26, %v2602_v34 }
 0x132   :  { %v5680_v46 = vld [vmem:[#allocation5 + $0x42c] sm:$0xf0]  ;;  %v4469_v45 = vor.u32 %v5660_v37, %v4466_v38  ;;  %v5636_v37 = vld [vmem:[#allocation5 + $0x2d4] sm:$0xf] }
 0x133   :  { %v4016_v47 = vld [vmem:[#allocation5 + $0x10] sm:$0xf]  ;;  %v4529_v7 = vor.u32 %v5680_v46, %v4528_v41  ;;  %3028 = vmatpush.bf16.msra.mxu3 %v4817_v62  ;;  %v4213_v41 = vor.u32 %v5596_v21, %v4210_v22  ;;  %v4178_v46 = vld [vmem:[#allocation5 + $0x170] sm:$0xf0]  ;;  %v2639_v62 = vpop.f32.mrf.mxu2 }
 0x134   :  { %v5552_v49 = vld [vmem:[#allocation5 + $0x2c] sm:$0xf0]  ;;  %v2640_v3 = vadd.f32 %v2639_v62, %v6305_v27  ;;  %v4402_v21 = vld [vmem:[#allocation5 + $0x330] sm:$0xf0] }
 0x135   :  { %v4272_v63 = vld [vmem:[#allocation5 + $0x210] sm:$0xf]  ;;  %v4017_v8 = vor.u32 %v5552_v49, %v4016_v47  ;;  %3010 = vmatpush.bf16.msra.mxu2 %v4529_v7  ;;  %v2670_v4 = vpop.f32.mrf.mxu0  ;;  %v4370_v38 = vld [vmem:[#allocation5 + $0x2f0] sm:$0xf0] }
 0x136   :  { %v5616_v1 = vld [vmem:[#allocation5 + $0x22c] sm:$0xf0] }
 0x137   :  { %v4784_v2 = vld [vmem:[#allocation5 + $0x610] sm:$0xf]  ;;  %v4273_v14 = vor.u32 %v5616_v1, %v4272_v63  ;;  %2972 = vmatpush.bf16.msra.mxu0 %v4017_v8  ;;  %v2658_v63 = vpop.f32.mrf.mxu3  ;;  %v5580_v8 = vld [vmem:[#allocation5 + $0x114] sm:$0xf] }
 0x138   :  { %v5744_v0 = vld [vmem:[#allocation5 + $0x62c] sm:$0xf0]  ;;  %v6331_v12 = vadd.f32 %v2658_v63, %v2640_v3  ;;  %3011 = vmatmul.bf16.vlgmr.msra.gmra.mxu2 %v6220_v54  ;;  %v4373_v63 = vor.u32 %v5636_v37, %v4370_v38 }
 0x139   :  { %v5264_v5 = vld [vmem:[#allocation5 + $0x9d0] sm:$0xf]  ;;  %v4785_v15 = vor.u32 %v5744_v0, %v4784_v2  ;;  %2991 = vmatpush.bf16.msra.mxu1 %v4273_v14  ;;  %3079 = vmatpush.bf16.msrb.mxu2 %v4245_v9  ;;  %v5652_v2 = vld [vmem:[#allocation5 + $0x354] sm:$0xf] }
 0x13a   :  { %v5864_v33 = vld [vmem:[#allocation5 + $0x9ec] sm:$0xf0]  ;;  %v4434_v0 = vld [vmem:[#allocation5 + $0x370] sm:$0xf0]  ;;  %2973 = vmatmul.bf16.vlgmr.msra.gmra.mxu0 %v6216_v48 }
 0x13b   :  { %v5520_v6 = vld [vmem:[#allocation5 + $0xbd0] sm:$0xf]  ;;  %v5265_v20 = vor.u32 %v5864_v33, %v5264_v5  ;;  %3029 = vmatpush.bf16.msra.mxu3 %v4785_v15  ;;  %v2689_v5 = vpop.f32.mrf.mxu1  ;;  %v2671_v33 = vadd.f32 %v2670_v4, %v6309_v10  ;;  %v4437_v14 = vor.u32 %v5652_v2, %v4434_v0 }
 0x13c   :  { %v5928_v11 = vld [vmem:[#allocation5 + $0xbec] sm:$0xf0]  ;;  %2992 = vmatmul.bf16.vlgmr.msra.gmra.mxu1 %v6218_v53 }
 0x13d   :  { %v5521_v28 = vor.u32 %v5928_v11, %v5520_v6  ;;  %v5232_v30 = vld [vmem:[#allocation5 + $0x990] sm:$0xf]  ;;  %3041 = vmatpush.bf16.msrb.mxu0 %v5265_v20  ;;  %3080 = vmatpush.bf16.msrb.mxu2 %v4213_v41  ;;  %v4181_v6 = vor.u32 %v5588_v23, %v4178_v46  ;;  %v4146_v11 = vld [vmem:[#allocation5 + $0x130] sm:$0xf0]  ;;  %v2690_v9 = vadd.f32 %v2689_v5, %v2671_v33 }
 0x13e   :  { %v5856_v31 = vld [vmem:[#allocation5 + $0x9ac] sm:$0xf0]  ;;  %v5644_v20 = vld [vmem:[#allocation5 + $0x314] sm:$0xf]  ;;  %3030 = vmatmul.bf16.vlgmr.msra.gmra.mxu3 %v6222_v57  ;;  %v4149_v10 = vor.u32 %v5580_v8, %v4146_v11  ;;  %v4117_v23 = vor.u32 %v5572_v24, %v4114_v25 }
 0x13f   :  { %v5488_v32 = vld [vmem:[#allocation5 + $0xb90] sm:$0xf]  ;;  %v5233_v42 = vor.u32 %v5856_v31, %v5232_v30  ;;  %3060 = vmatpush.bf16.msrb.mxu1 %v5521_v28  ;;  %3098 = vmatpush.bf16.msrb.mxu3 %v4501_v29  ;;  %v4405_v28 = vor.u32 %v5644_v20, %v4402_v21  ;;  %v2727_v34 = vpop.f32.mrf.mxu3  ;;  %v5628_v5 = vld [vmem:[#allocation5 + $0x294] sm:$0xf] }
 0x140   :  { %v5920_v35 = vld [vmem:[#allocation5 + $0xbac] sm:$0xf0]  ;;  %v4338_v33 = vld [vmem:[#allocation5 + $0x2b0] sm:$0xf0] }
 0x141   :  { %v5489_v43 = vor.u32 %v5920_v35, %v5488_v32  ;;  %v5200_v47 = vld [vmem:[#allocation5 + $0x950] sm:$0xf]  ;;  %3042 = vmatpush.bf16.msrb.mxu0 %v5233_v42  ;;  %3081 = vmatpush.bf16.msrb.mxu2 %v4181_v6  ;;  %v2708_v32 = vpop.f32.mrf.mxu2  ;;  %v2672_v42 = vpop.f32.mrf.mxu0  ;;  %v4050_v8 = vld [vmem:[#allocation5 + $0x70] sm:$0xf0] }
 0x142   :  { %v5848_v49 = vld [vmem:[#allocation5 + $0x96c] sm:$0xf0]  ;;  %v2709_v41 = vadd.f32 %v2708_v32, %v2690_v9  ;;  %v5620_v20 = vld [vmem:[#allocation5 + $0x254] sm:$0xf] }
 0x143   :  { %v5456_v55 = vld [vmem:[#allocation5 + $0xb50] sm:$0xf]  ;;  %3061 = vmatpush.bf16.msrb.mxu1 %v5489_v43  ;;  %3099 = vmatpush.bf16.msrb.mxu3 %v4469_v45  ;;  %v5201_v7 = vor.u32 %v5848_v49, %v5200_v47  ;;  %v2691_v43 = vpop.f32.mrf.mxu1  ;;  %v2673_v45 = vadd.f32 %v2672_v42, %v6315_v52  ;;  %v5564_v47 = vld [vmem:[#allocation5 + $0x94] sm:$0xf] }
 0x144   :  { %v5912_v1 = vld [vmem:[#allocation5 + $0xb6c] sm:$0xf0]  ;;  %v4082_v49 = vld [vmem:[#allocation5 + $0xb0] sm:$0xf0] }
 0x145   :  { %v5457_v13 = vor.u32 %v5912_v1, %v5456_v55  ;;  %v5168_v15 = vld [vmem:[#allocation5 + $0x910] sm:$0xf]  ;;  %3043 = vmatpush.bf16.msrb.mxu0 %v5201_v7  ;;  %3082 = vmatpush.bf16.msrb.mxu2 %v4149_v10  ;;  %v6338_v55 = vadd.f32 %v2727_v34, %v2709_v41  ;;  %v2692_v3 = vadd.f32 %v2691_v43, %v2673_v45  ;;  %v5556_v7 = vld [vmem:[#allocation5 + $0x54] sm:$0xf] }
 0x146   :  { %v5840_v17 = vld [vmem:[#allocation5 + $0x92c] sm:$0xf0]  ;;  %v4085_v52 = vor.u32 %v5564_v47, %v4082_v49  ;;  %v4306_v21 = vld [vmem:[#allocation5 + $0x270] sm:$0xf0] }
 0x147   :  { %v5424_v19 = vld [vmem:[#allocation5 + $0xb10] sm:$0xf]  ;;  %v5169_v22 = vor.u32 %v5840_v17, %v5168_v15  ;;  %3062 = vmatpush.bf16.msrb.mxu1 %v5457_v13  ;;  %3100 = vmatpush.bf16.msrb.mxu3 %v4437_v14  ;;  %v4341_v13 = vor.u32 %v5628_v5, %v4338_v33  ;;  %v2729_v9 = vpop.f32.mrf.mxu3  ;;  %v5548_v25 = vld [vmem:[#allocation5 + $0x14] sm:$0xf]  ;;  %v4309_v37 = vor.u32 %v5620_v20, %v4306_v21 }
 0x148   :  { %v5904_v27 = vld [vmem:[#allocation5 + $0xb2c] sm:$0xf0]  ;;  %v5612_v42 = vld [vmem:[#allocation5 + $0x214] sm:$0xf]  ;;  %3016 = vmatmul.bf16.gmra.mxu2 %v6232_v51 }
 0x149   :  { %v5425_v26 = vor.u32 %v5904_v27, %v5424_v19  ;;  %v5136_v29 = vld [vmem:[#allocation5 + $0x8d0] sm:$0xf]  ;;  %3044 = vmatpush.bf16.msrb.mxu0 %v5169_v22  ;;  %3083 = vmatpush.bf16.msrb.mxu2 %v4117_v23  ;;  %v2710_v19 = vpop.f32.mrf.mxu2  ;;  %v2675_v22 = vpop.f32.mrf.mxu0  ;;  %v5860_v45 = vld [vmem:[#allocation5 + $0x9d4] sm:$0xf] }
 0x14a   :  { %v5832_v30 = vld [vmem:[#allocation5 + $0x8ec] sm:$0xf0]  ;;  %v2711_v10 = vadd.f32 %v2710_v19, %v2692_v3  ;;  %2978 = vmatmul.bf16.gmra.mxu0 %v6228_v44  ;;  %v5266_v23 = vld [vmem:[#allocation5 + $0x9f0] sm:$0xf0] }
 0x14b   :  { %v5392_v31 = vld [vmem:[#allocation5 + $0xad0] sm:$0xf]  ;;  %v5137_v46 = vor.u32 %v5832_v30, %v5136_v29  ;;  %3063 = vmatpush.bf16.msrb.mxu1 %v5425_v26  ;;  %3101 = vmatpush.bf16.msrb.mxu3 %v4405_v28  ;;  %v2694_v24 = vpop.f32.mrf.mxu1  ;;  %v2676_v26 = vadd.f32 %v2675_v22, %v6325_v39  ;;  %v4053_v28 = vor.u32 %v5556_v7, %v4050_v8  ;;  %v4018_v30 = vld [vmem:[#allocation5 + $0x30] sm:$0xf0] }
 0x14c   :  { %v5896_v35 = vld [vmem:[#allocation5 + $0xaec] sm:$0xf0]  ;;  %v6341_v34 = vadd.f32 %v2729_v9, %v2711_v10  ;;  %2997 = vmatmul.bf16.gmra.mxu1 %v6230_v50  ;;  %v4274_v39 = vld [vmem:[#allocation5 + $0x230] sm:$0xf0] }
 0x14d   :  { %v5393_v62 = vor.u32 %v5896_v35, %v5392_v31  ;;  %v5104_v1 = vld [vmem:[#allocation5 + $0x890] sm:$0xf]  ;;  %3045 = vmatpush.bf16.msrb.mxu0 %v5137_v46  ;;  %3084 = vmatpush.bf16.msrb.mxu2 %v4085_v52  ;;  %v2695_v43 = vadd.f32 %v2694_v24, %v2676_v26  ;;  %v5732_v46 = vld [vmem:[#allocation5 + $0x5d4] sm:$0xf]  ;;  %v5269_v52 = vor.u32 %v5860_v45, %v5266_v23 }
 0x14e   :  { %v5824_v2 = vld [vmem:[#allocation5 + $0x8ac] sm:$0xf0]  ;;  %3035 = vmatmul.bf16.gmra.mxu3 %v6234_v56  ;;  %v4754_v47 = vld [vmem:[#allocation5 + $0x5f0] sm:$0xf0] }
 0x14f   :  { %v5360_v0 = vld [vmem:[#allocation5 + $0xa90] sm:$0xf]  ;;  %v5105_v6 = vor.u32 %v5824_v2, %v5104_v1  ;;  %3064 = vmatpush.bf16.msrb.mxu1 %v5393_v62  ;;  %3102 = vmatpush.bf16.msrb.mxu3 %v4373_v63  ;;  %v5796_v49 = vld [vmem:[#allocation5 + $0x7d4] sm:$0xf]  ;;  %v4021_v62 = vor.u32 %v5548_v25, %v4018_v30  ;;  %v2732_v33 = vpop.f32.mrf.mxu3 }
 0x150   :  { %v5888_v4 = vld [vmem:[#allocation5 + $0xaac] sm:$0xf0]  ;;  %v5010_v1 = vld [vmem:[#allocation5 + $0x7f0] sm:$0xf0] }
 0x151   :  { %v5361_v11 = vor.u32 %v5888_v4, %v5360_v0  ;;  %v5072_v14 = vld [vmem:[#allocation5 + $0x850] sm:$0xf]  ;;  %3046 = vmatpush.bf16.msrb.mxu0 %v5105_v6  ;;  %3085 = vmatpush.bf16.msrb.mxu2 %v4053_v28  ;;  %v5924_v2 = vld [vmem:[#allocation5 + $0xbd4] sm:$0xf]  ;;  %v4277_v4 = vor.u32 %v5612_v42, %v4274_v39  ;;  %v2713_v5 = vpop.f32.mrf.mxu2  ;;  %v4757_v6 = vor.u32 %v5732_v46, %v4754_v47 }
 0x152   :  { %v5816_v15 = vld [vmem:[#allocation5 + $0x86c] sm:$0xf0]  ;;  %v5522_v0 = vld [vmem:[#allocation5 + $0xbf0] sm:$0xf0] }
 0x153   :  { %v5328_v17 = vld [vmem:[#allocation5 + $0xa50] sm:$0xf]  ;;  %v5073_v29 = vor.u32 %v5816_v15, %v5072_v14  ;;  %3065 = vmatpush.bf16.msrb.mxu1 %v5361_v11  ;;  %3103 = vmatpush.bf16.msrb.mxu3 %v4341_v13  ;;  %v5852_v7 = vld [vmem:[#allocation5 + $0x994] sm:$0xf]  ;;  %v2714_v11 = vadd.f32 %v2713_v5, %v2695_v43  ;;  %v2677_v13 = vpop.f32.mrf.mxu0  ;;  %v2696_v14 = vpop.f32.mrf.mxu1  ;;  %v5013_v15 = vor.u32 %v5796_v49, %v5010_v1 }
 0x154   :  { %v5880_v27 = vld [vmem:[#allocation5 + $0xa6c] sm:$0xf0]  ;;  %v5234_v8 = vld [vmem:[#allocation5 + $0x9b0] sm:$0xf0]  ;;  %v2678_v20 = vadd.f32 %v2677_v13, %v6331_v12 }
 0x155   :  { %v5040_v31 = vld [vmem:[#allocation5 + $0x810] sm:$0xf]  ;;  %v5329_v35 = vor.u32 %v5880_v27, %v5328_v17  ;;  %3047 = vmatpush.bf16.msrb.mxu0 %v5073_v29  ;;  %v5525_v17 = vor.u32 %v5924_v2, %v5522_v0  ;;  %v5724_v19 = vld [vmem:[#allocation5 + $0x594] sm:$0xf]  ;;  %3086 = vmatpush.bf16.msrb.mxu2 %v4021_v62  ;;  %v6348_v24 = vadd.f32 %v2732_v33, %v2714_v11 }
 0x156   :  { %v5808_v32 = vld [vmem:[#allocation5 + $0x82c] sm:$0xf0]  ;;  %v4722_v9 = vld [vmem:[#allocation5 + $0x5b0] sm:$0xf0]  ;;  %v2697_v25 = vadd.f32 %v2696_v14, %v2678_v20  ;;  %v5237_v26 = vor.u32 %v5852_v7, %v5234_v8 }
 0x157   :  { %v5296_v38 = vld [vmem:[#allocation5 + $0xa10] sm:$0xf]  ;;  %v5041_v63 = vor.u32 %v5808_v32, %v5040_v31  ;;  %3066 = vmatpush.bf16.msrb.mxu1 %v5329_v35  ;;  %3104 = vmatpush.bf16.msrb.mxu3 %v4309_v37  ;;  %v5788_v27 = vld [vmem:[#allocation5 + $0x794] sm:$0xf]  ;;  %v4725_v28 = vor.u32 %v5724_v19, %v4722_v9  ;;  %v6350_v31 = vld [vmem:[#allocation7] sm:$0xff]  ;;  %v2734_v43 = vpop.f32.mrf.mxu3 }
 0x158   :  { %v5872_v41 = vld [vmem:[#allocation5 + $0xa2c] sm:$0xf0]  ;;  %v4978_v21 = vld [vmem:[#allocation5 + $0x7b0] sm:$0xf0]  ;;  %v6353_v12 = vperm.slane %v6350_v31, 2  ;;  %3087 = vmatmul.bf16.vlgmr.msrb.gmra.mxu2 %v6216_v48 }
 0x159   :  { %v5297_v3 = vor.u32 %v5872_v41, %v5296_v38  ;;  %3048 = vmatpush.bf16.msrb.mxu0 %v5041_v63  ;;  %v5916_v10 = vld [vmem:[#allocation5 + $0xb94] sm:$0xf]  ;;  %3155 = vmatpush.bf16.msra.mxu2 %v5269_v52  ;;  %v4981_v29 = vor.u32 %v5788_v27, %v4978_v21  ;;  %v2715_v42 = vpop.f32.mrf.mxu2 }
 0x15a   :  { %v5490_v22 = vld [vmem:[#allocation5 + $0xbb0] sm:$0xf0]  ;;  %v2716_v46 = vadd.f32 %v2715_v42, %v2697_v25 }
 0x15b   :  { %3067 = vmatpush.bf16.msrb.mxu1 %v5297_v3  ;;  %3105 = vmatpush.bf16.msrb.mxu3 %v4277_v4  ;;  %v5493_v30 = vor.u32 %v5916_v10, %v5490_v22  ;;  %v5844_v32 = vld [vmem:[#allocation5 + $0x954] sm:$0xf]  ;;  %v2746_v47 = vpop.f32.mrf.mxu0  ;;  %v2765_v49 = vpop.f32.mrf.mxu1 }
 0x15c   :  { %v5202_v35 = vld [vmem:[#allocation5 + $0x970] sm:$0xf0]  ;;  %v2747_v62 = vadd.f32 %v2746_v47, %v6353_v12  ;;  %v6356_v3 = vadd.f32 %v2734_v43, %v2716_v46  ;;  %3049 = vmatmul.bf16.vlgmr.msrb.gmra.mxu0 %v6240_v60 }
 0x15d   :  { %3117 = vmatpush.bf16.msra.mxu0 %v4757_v6  ;;  %v5716_v37 = vld [vmem:[#allocation5 + $0x554] sm:$0xf]  ;;  %3156 = vmatpush.bf16.msra.mxu2 %v5237_v26  ;;  %v5205_v63 = vor.u32 %v5844_v32, %v5202_v35 }
 0x15e   :  { %v4690_v38 = vld [vmem:[#allocation5 + $0x570] sm:$0xf0]  ;;  %v2766_v7 = vadd.f32 %v2765_v49, %v2747_v62  ;;  %3068 = vmatmul.bf16.vlgmr.msrb.gmra.mxu1 %v6242_v61  ;;  %3106 = vmatmul.bf16.vlgmr.msrb.gmra.mxu3 %v6218_v53 }
 0x15f   :  { %3136 = vmatpush.bf16.msra.mxu1 %v5013_v15  ;;  %3174 = vmatpush.bf16.msra.mxu3 %v5525_v17  ;;  %v5780_v41 = vld [vmem:[#allocation5 + $0x754] sm:$0xf]  ;;  %v4693_v1 = vor.u32 %v5716_v37, %v4690_v38  ;;  %v2803_v25 = vpop.f32.mrf.mxu3 }
 0x160   :  { %v4946_v39 = vld [vmem:[#allocation5 + $0x770] sm:$0xf0] }
 0x161   :  { %3118 = vmatpush.bf16.msra.mxu0 %v4725_v28  ;;  %v5908_v45 = vld [vmem:[#allocation5 + $0xb54] sm:$0xf]  ;;  %v4949_v4 = vor.u32 %v5780_v41, %v4946_v39  ;;  %3157 = vmatpush.bf16.msra.mxu2 %v5205_v63  ;;  %v2784_v22 = vpop.f32.mrf.mxu2 }
 0x162   :  { %v5458_v23 = vld [vmem:[#allocation5 + $0xb70] sm:$0xf0] }
 0x163   :  { %3137 = vmatpush.bf16.msra.mxu1 %v4981_v29  ;;  %3175 = vmatpush.bf16.msra.mxu3 %v5493_v30  ;;  %v5836_v2 = vld [vmem:[#allocation5 + $0x914] sm:$0xf]  ;;  %v5461_v5 = vor.u32 %v5908_v45, %v5458_v23  ;;  %v2785_v30 = vadd.f32 %v2784_v22, %v2766_v7  ;;  %v2748_v32 = vpop.f32.mrf.mxu0  ;;  %v2767_v35 = vpop.f32.mrf.mxu1 }
 0x164   :  { %v5170_v0 = vld [vmem:[#allocation5 + $0x930] sm:$0xf0]  ;;  %v2749_v37 = vadd.f32 %v2748_v32, %v6353_v12 }
 0x165   :  { %v5708_v33 = vld [vmem:[#allocation5 + $0x514] sm:$0xf]  ;;  %3119 = vmatpush.bf16.msra.mxu0 %v4693_v1  ;;  %v5173_v14 = vor.u32 %v5836_v2, %v5170_v0  ;;  %v6363_v39 = vadd.f32 %v2803_v25, %v2785_v30 }
 0x166   :  { %v4658_v52 = vld [vmem:[#allocation5 + $0x530] sm:$0xf0]  ;;  %v2768_v62 = vadd.f32 %v2767_v35, %v2749_v37 }
 0x167   :  { %v5772_v6 = vld [vmem:[#allocation5 + $0x714] sm:$0xf]  ;;  %v4661_v15 = vor.u32 %v5708_v33, %v4658_v52  ;;  %3138 = vmatpush.bf16.msra.mxu1 %v4949_v4  ;;  %3176 = vmatpush.bf16.msra.mxu3 %v5461_v5 }
 0x168   :  { %v4914_v8 = vld [vmem:[#allocation5 + $0x730] sm:$0xf0]  ;;  %3158 = vmatpush.bf16.msra.mxu2 %v5173_v14  ;;  %v2805_v14 = vpop.f32.mrf.mxu3 }
 0x169   :  { %v5900_v11 = vld [vmem:[#allocation5 + $0xb14] sm:$0xf]  ;;  %v4917_v9 = vor.u32 %v5772_v6, %v4914_v8  ;;  %3120 = vmatpush.bf16.msra.mxu0 %v4661_v15  ;;  %3092 = vmatmul.bf16.gmra.mxu2 %v6228_v44 }
 0x16a   :  { %v5426_v13 = vld [vmem:[#allocation5 + $0xb30] sm:$0xf0] }
 0x16b   :  { %v5828_v17 = vld [vmem:[#allocation5 + $0x8d4] sm:$0xf]  ;;  %v5429_v27 = vor.u32 %v5900_v11, %v5426_v13  ;;  %3139 = vmatpush.bf16.msra.mxu1 %v4917_v9  ;;  %v2786_v13 = vpop.f32.mrf.mxu2 }
 0x16c   :  { %v5138_v19 = vld [vmem:[#allocation5 + $0x8f0] sm:$0xf0]  ;;  %v2787_v9 = vadd.f32 %v2786_v13, %v2768_v62  ;;  %3054 = vmatmul.bf16.gmra.mxu0 %v6248_v58 }
 0x16d   :  { %v5700_v20 = vld [vmem:[#allocation5 + $0x4d4] sm:$0xf]  ;;  %v5141_v38 = vor.u32 %v5828_v17, %v5138_v19  ;;  %3177 = vmatpush.bf16.msra.mxu3 %v5429_v27  ;;  %v2751_v27 = vpop.f32.mrf.mxu0 }
 0x16e   :  { %v4626_v21 = vld [vmem:[#allocation5 + $0x4f0] sm:$0xf0]  ;;  %v6366_v30 = vadd.f32 %v2805_v14, %v2787_v9  ;;  %3073 = vmatmul.bf16.gmra.mxu1 %v6250_v59  ;;  %3111 = vmatmul.bf16.gmra.mxu3 %v6230_v50  ;;  %v4216_v9 = vld [vmem:[#allocation5 + $0x198] sm:$0xf] }
 0x16f   :  { %v5764_v10 = vld [vmem:[#allocation5 + $0x6d4] sm:$0xf]  ;;  %v4629_v41 = vor.u32 %v5700_v20, %v4626_v21  ;;  %3159 = vmatpush.bf16.msra.mxu2 %v5141_v38  ;;  %v2770_v20 = vpop.f32.mrf.mxu1 }
 0x170   :  { %v4882_v26 = vld [vmem:[#allocation5 + $0x6f0] sm:$0xf0] }
 0x171   :  { %v5892_v28 = vld [vmem:[#allocation5 + $0xad4] sm:$0xf]  ;;  %v4885_v45 = vor.u32 %v5764_v10, %v4882_v26  ;;  %3121 = vmatpush.bf16.msra.mxu0 %v4629_v41  ;;  %v2752_v10 = vadd.f32 %v2751_v27, %v6353_v12  ;;  %v5601_v27 = vld [vmem:[#allocation5 + $0x1b4] sm:$0xf0] }
 0x172   :  { %v5394_v29 = vld [vmem:[#allocation5 + $0xaf0] sm:$0xf0] }
 0x173   :  { %v5820_v42 = vld [vmem:[#allocation5 + $0x894] sm:$0xf]  ;;  %v5397_v23 = vor.u32 %v5892_v28, %v5394_v29  ;;  %3140 = vmatpush.bf16.msra.mxu1 %v4885_v45  ;;  %v4760_v45 = vld [vmem:[#allocation5 + $0x5d8] sm:$0xf] }
 0x174   :  { %v5106_v43 = vld [vmem:[#allocation5 + $0x8b0] sm:$0xf0] }
 0x175   :  { %v5692_v46 = vld [vmem:[#allocation5 + $0x494] sm:$0xf]  ;;  %v5109_v0 = vor.u32 %v5820_v42, %v5106_v43  ;;  %3178 = vmatpush.bf16.msra.mxu3 %v5397_v23  ;;  %v2771_v42 = vadd.f32 %v2770_v20, %v2752_v10  ;;  %v5737_v23 = vld [vmem:[#allocation5 + $0x5f4] sm:$0xf0]  ;;  %v2753_v14 = vpop.f32.mrf.mxu0 }
 0x176   :  { %v4594_v47 = vld [vmem:[#allocation5 + $0x4b0] sm:$0xf0]  ;;  %v4472_v20 = vld [vmem:[#allocation5 + $0x398] sm:$0xf] }
 0x177   :  { %v5756_v49 = vld [vmem:[#allocation5 + $0x694] sm:$0xf]  ;;  %v4597_v4 = vor.u32 %v5692_v46, %v4594_v47  ;;  %3160 = vmatpush.bf16.msra.mxu2 %v5109_v0  ;;  %v4248_v46 = vld [vmem:[#allocation5 + $0x1d8] sm:$0xf] }
 0x178   :  { %v4850_v63 = vld [vmem:[#allocation5 + $0x6b0] sm:$0xf0]  ;;  %v5609_v47 = vld [vmem:[#allocation5 + $0x1f4] sm:$0xf0] }
 0x179   :  { %v5884_v1 = vld [vmem:[#allocation5 + $0xa94] sm:$0xf]  ;;  %v4853_v52 = vor.u32 %v5756_v49, %v4850_v63  ;;  %3122 = vmatpush.bf16.msra.mxu0 %v4597_v4  ;;  %v4504_v49 = vld [vmem:[#allocation5 + $0x3d8] sm:$0xf] }
 0x17a   :  { %v5362_v2 = vld [vmem:[#allocation5 + $0xab0] sm:$0xf0]  ;;  %v5801_v0 = vld [vmem:[#allocation5 + $0x7f4] sm:$0xf0] }
 0x17b   :  { %v5812_v5 = vld [vmem:[#allocation5 + $0x854] sm:$0xf]  ;;  %v5365_v6 = vor.u32 %v5884_v1, %v5362_v2  ;;  %3141 = vmatpush.bf16.msra.mxu1 %v4853_v52  ;;  %v5673_v1 = vld [vmem:[#allocation5 + $0x3f4] sm:$0xf0]  ;;  %v2808_v52 = vpop.f32.mrf.mxu3 }
 0x17c   :  { %v5074_v33 = vld [vmem:[#allocation5 + $0x870] sm:$0xf0]  ;;  %v5016_v2 = vld [vmem:[#allocation5 + $0x7d8] sm:$0xf] }
 0x17d   :  { %v5684_v7 = vld [vmem:[#allocation5 + $0x454] sm:$0xf]  ;;  %v5077_v22 = vor.u32 %v5812_v5, %v5074_v33  ;;  %3179 = vmatpush.bf16.msra.mxu3 %v5365_v6  ;;  %v2789_v33 = vpop.f32.mrf.mxu2  ;;  %v4761_v6 = vor.u32 %v5737_v23, %v4760_v45  ;;  %v5665_v10 = vld [vmem:[#allocation5 + $0x3b4] sm:$0xf0] }
 0x17e   :  { %v4562_v8 = vld [vmem:[#allocation5 + $0x470] sm:$0xf0]  ;;  %v2790_v13 = vadd.f32 %v2789_v33, %v2771_v42  ;;  %v5593_v42 = vld [vmem:[#allocation5 + $0x174] sm:$0xf0] }
 0x17f   :  { %v5748_v11 = vld [vmem:[#allocation5 + $0x654] sm:$0xf]  ;;  %v4565_v25 = vor.u32 %v5684_v7, %v4562_v8  ;;  %3161 = vmatpush.bf16.msra.mxu2 %v5077_v22  ;;  %v4249_v7 = vor.u32 %v5609_v47, %v4248_v46  ;;  %v4728_v8 = vld [vmem:[#allocation5 + $0x598] sm:$0xf] }
 0x180   :  { %v4818_v15 = vld [vmem:[#allocation5 + $0x670] sm:$0xf0]  ;;  %v4984_v22 = vld [vmem:[#allocation5 + $0x798] sm:$0xf] }
 0x181   :  { %v5876_v17 = vld [vmem:[#allocation5 + $0xa54] sm:$0xf]  ;;  %v4821_v32 = vor.u32 %v5748_v11, %v4818_v15  ;;  %3123 = vmatpush.bf16.msra.mxu0 %v4565_v25  ;;  %v5729_v11 = vld [vmem:[#allocation5 + $0x5b4] sm:$0xf0]  ;;  %v2772_v15 = vpop.f32.mrf.mxu1 }
 0x182   :  { %v5330_v19 = vld [vmem:[#allocation5 + $0xa70] sm:$0xf0]  ;;  %v5793_v25 = vld [vmem:[#allocation5 + $0x7b4] sm:$0xf0] }
 0x183   :  { %v5804_v21 = vld [vmem:[#allocation5 + $0x814] sm:$0xf]  ;;  %v5333_v35 = vor.u32 %v5876_v17, %v5330_v19  ;;  %3142 = vmatpush.bf16.msra.mxu1 %v4821_v32  ;;  %v4505_v17 = vor.u32 %v5673_v1, %v4504_v49  ;;  %v5017_v19 = vor.u32 %v5801_v0, %v5016_v2  ;;  %v4217_v32 = vor.u32 %v5601_v27, %v4216_v9  ;;  %v2810_v23 = vpop.f32.mrf.mxu3  ;;  %v5657_v46 = vld [vmem:[#allocation5 + $0x374] sm:$0xf0] }
 0x184   :  { %v5042_v26 = vld [vmem:[#allocation5 + $0x830] sm:$0xf0]  ;;  %v4952_v47 = vld [vmem:[#allocation5 + $0x758] sm:$0xf] }
 0x185   :  { %v5676_v28 = vld [vmem:[#allocation5 + $0x414] sm:$0xf]  ;;  %v5045_v62 = vor.u32 %v5804_v21, %v5042_v26  ;;  %3180 = vmatpush.bf16.msra.mxu3 %v5333_v35  ;;  %v2754_v21 = vadd.f32 %v2753_v14, %v6353_v12  ;;  %v6373_v26 = vadd.f32 %v2808_v52, %v2790_v13  ;;  %v4473_v35 = vor.u32 %v5665_v10, %v4472_v20  ;;  %v5721_v12 = vld [vmem:[#allocation5 + $0x574] sm:$0xf0]  ;;  %v2791_v45 = vpop.f32.mrf.mxu2 }
 0x186   :  { %v4530_v29 = vld [vmem:[#allocation5 + $0x430] sm:$0xf0]  ;;  %v5785_v49 = vld [vmem:[#allocation5 + $0x774] sm:$0xf0] }
 0x187   :  { %v5740_v37 = vld [vmem:[#allocation5 + $0x614] sm:$0xf]  ;;  %v4533_v63 = vor.u32 %v5676_v28, %v4530_v29  ;;  %3162 = vmatpush.bf16.msra.mxu2 %v5045_v62  ;;  %v2773_v28 = vadd.f32 %v2772_v15, %v2754_v21  ;;  %v4729_v29 = vor.u32 %v5729_v11, %v4728_v8  ;;  %v5713_v33 = vld [vmem:[#allocation5 + $0x534] sm:$0xf0] }
 0x188   :  { %v4786_v38 = vld [vmem:[#allocation5 + $0x630] sm:$0xf0]  ;;  %v4152_v8 = vld [vmem:[#allocation5 + $0x118] sm:$0xf] }
 0x189   :  { %v5868_v41 = vld [vmem:[#allocation5 + $0xa14] sm:$0xf]  ;;  %v4789_v4 = vor.u32 %v5740_v37, %v4786_v38  ;;  %3124 = vmatpush.bf16.msra.mxu0 %v4533_v63  ;;  %v4985_v37 = vor.u32 %v5793_v25, %v4984_v22  ;;  %v4696_v38 = vld [vmem:[#allocation5 + $0x558] sm:$0xf]  ;;  %v2792_v62 = vadd.f32 %v2791_v45, %v2773_v28  ;;  %v2822_v63 = vpop.f32.mrf.mxu0  ;;  %v2841_v1 = vpop.f32.mrf.mxu1 }
 0x18a   :  { %v5298_v43 = vld [vmem:[#allocation5 + $0xa30] sm:$0xf0]  ;;  %v2823_v2 = vadd.f32 %v2822_v63, %v6363_v39  ;;  %v4697_v0 = vor.u32 %v5721_v12, %v4696_v38  ;;  %v5585_v11 = vld [vmem:[#allocation5 + $0x134] sm:$0xf0]  ;;  %3163 = vmatmul.bf16.vlgmr.msra.gmra.mxu2 %v6240_v60 }
 0x18b   :  { %v5301_v5 = vor.u32 %v5868_v41, %v5298_v43  ;;  %3143 = vmatpush.bf16.msra.mxu1 %v4789_v4  ;;  %3231 = vmatpush.bf16.msrb.mxu2 %v4761_v6  ;;  %v4184_v41 = vld [vmem:[#allocation5 + $0x158] sm:$0xf]  ;;  %v6376_v52 = vadd.f32 %v2810_v23, %v2792_v62  ;;  %v4153_v27 = vor.u32 %v5585_v11, %v4152_v8 }
 0x18c   :  { %v4440_v43 = vld [vmem:[#allocation5 + $0x358] sm:$0xf]  ;;  %v4185_v4 = vor.u32 %v5593_v42, %v4184_v41  ;;  %v6378_v14 = vadd.f32 %v2841_v1, %v2823_v2  ;;  %3125 = vmatmul.bf16.vlgmr.msra.gmra.mxu0 %v6220_v54 }
 0x18d   :  { %3181 = vmatpush.bf16.msra.mxu3 %v5301_v5  ;;  %3193 = vmatpush.bf16.msrb.mxu0 %v4249_v7  ;;  %v4664_v5 = vld [vmem:[#allocation5 + $0x518] sm:$0xf]  ;;  %v4441_v6 = vor.u32 %v5657_v46, %v4440_v43  ;;  %v4953_v7 = vor.u32 %v5785_v49, %v4952_v47 }
 0x18e   :  { %v4408_v13 = vld [vmem:[#allocation5 + $0x318] sm:$0xf]  ;;  %3144 = vmatmul.bf16.vlgmr.msra.gmra.mxu1 %v6222_v57  ;;  %v4665_v9 = vor.u32 %v5713_v33, %v4664_v5 }
 0x18f   :  { %3212 = vmatpush.bf16.msrb.mxu1 %v4505_v17  ;;  %3232 = vmatpush.bf16.msrb.mxu2 %v4729_v29  ;;  %v5649_v15 = vld [vmem:[#allocation5 + $0x334] sm:$0xf0] }
 0x190   :  { %v4920_v17 = vld [vmem:[#allocation5 + $0x718] sm:$0xf]  ;;  %3182 = vmatmul.bf16.vlgmr.msra.gmra.mxu3 %v6242_v61  ;;  %v4409_v10 = vor.u32 %v5649_v15, %v4408_v13 }
 0x191   :  { %3250 = vmatpush.bf16.msrb.mxu3 %v5017_v19  ;;  %3194 = vmatpush.bf16.msrb.mxu0 %v4217_v32  ;;  %v5777_v39 = vld [vmem:[#allocation5 + $0x734] sm:$0xf0]  ;;  %v6385_v19 = vperm.slane %v6350_v31, 3  ;;  %v2860_v32 = vpop.f32.mrf.mxu2  ;;  %v2824_v42 = vpop.f32.mrf.mxu0 }
 0x192   :  { %v4632_v20 = vld [vmem:[#allocation5 + $0x4d8] sm:$0xf]  ;;  %v4921_v22 = vor.u32 %v5777_v39, %v4920_v17  ;;  %v2843_v43 = vpop.f32.mrf.mxu1  ;;  %v2825_v45 = vadd.f32 %v2824_v42, %v6366_v30 }
 0x193   :  { %3213 = vmatpush.bf16.msrb.mxu1 %v4473_v35  ;;  %3233 = vmatpush.bf16.msrb.mxu2 %v4697_v0  ;;  %v5705_v21 = vld [vmem:[#allocation5 + $0x4f4] sm:$0xf0]  ;;  %v2879_v35 = vpop.f32.mrf.mxu3  ;;  %v2861_v41 = vadd.f32 %v2860_v32, %v6385_v19 }
 0x194   :  { %v4120_v25 = vld [vmem:[#allocation5 + $0xd8] sm:$0xf]  ;;  %v4633_v23 = vor.u32 %v5705_v21, %v4632_v20  ;;  %v6391_v5 = vadd.f32 %v2843_v43, %v2825_v45 }
 0x195   :  { %3251 = vmatpush.bf16.msrb.mxu3 %v4985_v37  ;;  %3195 = vmatpush.bf16.msrb.mxu0 %v4185_v4  ;;  %v5577_v28 = vld [vmem:[#allocation5 + $0xf4] sm:$0xf0]  ;;  %v6389_v62 = vadd.f32 %v2879_v35, %v2861_v41 }
 0x196   :  { %v4376_v29 = vld [vmem:[#allocation5 + $0x2d8] sm:$0xf]  ;;  %v4121_v46 = vor.u32 %v5577_v28, %v4120_v25 }
 0x197   :  { %3214 = vmatpush.bf16.msrb.mxu1 %v4441_v6  ;;  %v5641_v37 = vld [vmem:[#allocation5 + $0x2f4] sm:$0xf0]  ;;  %3234 = vmatpush.bf16.msrb.mxu2 %v4665_v9 }
 0x198   :  { %v4888_v38 = vld [vmem:[#allocation5 + $0x6d8] sm:$0xf]  ;;  %v4377_v63 = vor.u32 %v5641_v37, %v4376_v29 }
 0x199   :  { %3252 = vmatpush.bf16.msrb.mxu3 %v4953_v7  ;;  %v5769_v12 = vld [vmem:[#allocation5 + $0x6f4] sm:$0xf0]  ;;  %3196 = vmatpush.bf16.msrb.mxu0 %v4153_v27  ;;  %v2862_v20 = vpop.f32.mrf.mxu2  ;;  %v2827_v29 = vpop.f32.mrf.mxu0 }
 0x19a   :  { %v4600_v47 = vld [vmem:[#allocation5 + $0x498] sm:$0xf]  ;;  %v4889_v1 = vor.u32 %v5769_v12, %v4888_v38  ;;  %v2863_v28 = vadd.f32 %v2862_v20, %v6385_v19  ;;  %v2846_v32 = vpop.f32.mrf.mxu1  ;;  %v2828_v37 = vadd.f32 %v2827_v29, %v6373_v26  ;;  %3168 = vmatmul.bf16.gmra.mxu2 %v6248_v58 }
 0x19b   :  { %v5697_v49 = vld [vmem:[#allocation5 + $0x4b4] sm:$0xf0]  ;;  %3215 = vmatpush.bf16.msrb.mxu1 %v4409_v10  ;;  %3235 = vmatpush.bf16.msrb.mxu2 %v4633_v23  ;;  %v2881_v21 = vpop.f32.mrf.mxu3 }
 0x19c   :  { %v4088_v2 = vld [vmem:[#allocation5 + $0x98] sm:$0xf]  ;;  %v4601_v7 = vor.u32 %v5697_v49, %v4600_v47  ;;  %v6395_v45 = vadd.f32 %v2881_v21, %v2863_v28  ;;  %3130 = vmatmul.bf16.gmra.mxu0 %v6232_v51  ;;  %v5597_v21 = vld [vmem:[#allocation5 + $0x19c] sm:$0xf] }
 0x19d   :  { %3253 = vmatpush.bf16.msrb.mxu3 %v4921_v22  ;;  %v5569_v0 = vld [vmem:[#allocation5 + $0xb4] sm:$0xf0]  ;;  %3197 = vmatpush.bf16.msrb.mxu0 %v4121_v46 }
 0x19e   :  { %v4344_v4 = vld [vmem:[#allocation5 + $0x298] sm:$0xf]  ;;  %v4089_v8 = vor.u32 %v5569_v0, %v4088_v2  ;;  %3149 = vmatmul.bf16.gmra.mxu1 %v6234_v56  ;;  %v5605_v2 = vld [vmem:[#allocation5 + $0x1dc] sm:$0xf] }
 0x19f   :  { %v5633_v33 = vld [vmem:[#allocation5 + $0x2b4] sm:$0xf0]  ;;  %3216 = vmatpush.bf16.msrb.mxu1 %v4377_v63  ;;  %3236 = vmatpush.bf16.msrb.mxu2 %v4601_v7  ;;  %v4250_v0 = vld [vmem:[#allocation5 + $0x1f8] sm:$0xf0] }
 0x1a0   :  { %v4856_v6 = vld [vmem:[#allocation5 + $0x698] sm:$0xf]  ;;  %v4345_v15 = vor.u32 %v5633_v33, %v4344_v4  ;;  %3187 = vmatmul.bf16.gmra.mxu3 %v6250_v59 }
 0x1a1   :  { %v5761_v30 = vld [vmem:[#allocation5 + $0x6b4] sm:$0xf0]  ;;  %3254 = vmatpush.bf16.msrb.mxu3 %v4889_v1  ;;  %3198 = vmatpush.bf16.msrb.mxu0 %v4089_v8  ;;  %v6397_v1 = vadd.f32 %v2846_v32, %v2828_v37 }
 0x1a2   :  { %v4568_v11 = vld [vmem:[#allocation5 + $0x458] sm:$0xf]  ;;  %v4857_v17 = vor.u32 %v5761_v30, %v4856_v6  ;;  %v2848_v28 = vpop.f32.mrf.mxu1 }
 0x1a3   :  { %v5689_v13 = vld [vmem:[#allocation5 + $0x474] sm:$0xf0]  ;;  %3217 = vmatpush.bf16.msrb.mxu1 %v4345_v15 }
 0x1a4   :  { %v4056_v39 = vld [vmem:[#allocation5 + $0x58] sm:$0xf]  ;;  %v4569_v38 = vor.u32 %v5689_v13, %v4568_v11  ;;  %v5669_v11 = vld [vmem:[#allocation5 + $0x3dc] sm:$0xf] }
 0x1a5   :  { %v5561_v9 = vld [vmem:[#allocation5 + $0x74] sm:$0xf0]  ;;  %3255 = vmatpush.bf16.msrb.mxu3 %v4857_v17  ;;  %v4506_v13 = vld [vmem:[#allocation5 + $0x3f8] sm:$0xf0] }
 0x1a6   :  { %v4312_v27 = vld [vmem:[#allocation5 + $0x258] sm:$0xf]  ;;  %v4057_v12 = vor.u32 %v5561_v9, %v4056_v39  ;;  %3237 = vmatpush.bf16.msrb.mxu2 %v4569_v38  ;;  %v2865_v39 = vpop.f32.mrf.mxu2  ;;  %v2884_v9 = vpop.f32.mrf.mxu3  ;;  %v4509_v32 = vor.u32 %v5669_v11, %v4506_v13  ;;  %v4442_v11 = vld [vmem:[#allocation5 + $0x378] sm:$0xf0] }
 0x1a7   :  { %v5625_v10 = vld [vmem:[#allocation5 + $0x274] sm:$0xf0] }
 0x1a8   :  { %v4824_v22 = vld [vmem:[#allocation5 + $0x658] sm:$0xf]  ;;  %v4313_v23 = vor.u32 %v5625_v10, %v4312_v27  ;;  %3199 = vmatpush.bf16.msrb.mxu0 %v4057_v12  ;;  %v4253_v27 = vor.u32 %v5605_v2, %v4250_v0  ;;  %v4218_v10 = vld [vmem:[#allocation5 + $0x1b8] sm:$0xf0] }
 0x1a9   :  { %v5753_v25 = vld [vmem:[#allocation5 + $0x674] sm:$0xf0]  ;;  %v4186_v2 = vld [vmem:[#allocation5 + $0x178] sm:$0xf0] }
 0x1aa   :  { %v4536_v35 = vld [vmem:[#allocation5 + $0x418] sm:$0xf]  ;;  %v4825_v46 = vor.u32 %v5753_v25, %v4824_v22  ;;  %3218 = vmatpush.bf16.msrb.mxu1 %v4313_v23  ;;  %v2866_v22 = vadd.f32 %v2865_v39, %v6385_v19  ;;  %v2829_v25 = vpop.f32.mrf.mxu0 }
 0x1ab   :  { %v5681_v41 = vld [vmem:[#allocation5 + $0x434] sm:$0xf0]  ;;  %v2830_v12 = vadd.f32 %v2829_v25, %v6376_v52  ;;  %v5589_v52 = vld [vmem:[#allocation5 + $0x15c] sm:$0xf] }
 0x1ac   :  { %v4024_v42 = vld [vmem:[#allocation5 + $0x18] sm:$0xf]  ;;  %v4537_v30 = vor.u32 %v5681_v41, %v4536_v35  ;;  %3256 = vmatpush.bf16.msrb.mxu3 %v4825_v46  ;;  %v6405_v23 = vadd.f32 %v2884_v9, %v2866_v22  ;;  %v4189_v9 = vor.u32 %v5589_v52, %v4186_v2 }
 0x1ad   :  { %v5553_v43 = vld [vmem:[#allocation5 + $0x34] sm:$0xf0]  ;;  %v6407_v46 = vadd.f32 %v2848_v28, %v2830_v12 }
 0x1ae   :  { %v4280_v47 = vld [vmem:[#allocation5 + $0x218] sm:$0xf]  ;;  %v4025_v7 = vor.u32 %v5553_v43, %v4024_v42  ;;  %3238 = vmatpush.bf16.msrb.mxu2 %v4537_v30  ;;  %v5661_v42 = vld [vmem:[#allocation5 + $0x39c] sm:$0xf]  ;;  %v2886_v30 = vpop.f32.mrf.mxu3 }
 0x1af   :  { %v5617_v49 = vld [vmem:[#allocation5 + $0x234] sm:$0xf0]  ;;  %v4474_v43 = vld [vmem:[#allocation5 + $0x3b8] sm:$0xf0] }
 0x1b0   :  { %v4792_v63 = vld [vmem:[#allocation5 + $0x618] sm:$0xf]  ;;  %v4281_v15 = vor.u32 %v5617_v49, %v4280_v47  ;;  %3200 = vmatpush.bf16.msrb.mxu0 %v4025_v7  ;;  %v4221_v47 = vor.u32 %v5597_v21, %v4218_v10  ;;  %v4154_v21 = vld [vmem:[#allocation5 + $0x138] sm:$0xf0] }
 0x1b1   :  { %v5745_v26 = vld [vmem:[#allocation5 + $0x634] sm:$0xf0]  ;;  %3239 = vmatmul.bf16.vlgmr.msrb.gmra.mxu2 %v6220_v54 }
 0x1b2   :  { %v5272_v4 = vld [vmem:[#allocation5 + $0x9d8] sm:$0xf]  ;;  %v4793_v17 = vor.u32 %v5745_v26, %v4792_v63  ;;  %3219 = vmatpush.bf16.msrb.mxu1 %v4281_v15  ;;  %3307 = vmatpush.bf16.msra.mxu2 %v4253_v27  ;;  %v4477_v26 = vor.u32 %v5661_v42, %v4474_v43  ;;  %v2898_v15 = vpop.f32.mrf.mxu0  ;;  %v4122_v42 = vld [vmem:[#allocation5 + $0xf8] sm:$0xf0] }
 0x1b3   :  { %v5865_v33 = vld [vmem:[#allocation5 + $0x9f4] sm:$0xf0]  ;;  %v2899_v39 = vadd.f32 %v2898_v15, %v6389_v62  ;;  %3201 = vmatmul.bf16.vlgmr.msrb.gmra.mxu0 %v6216_v48  ;;  %v5565_v15 = vld [vmem:[#allocation5 + $0x9c] sm:$0xf] }
 0x1b4   :  { %v5528_v6 = vld [vmem:[#allocation5 + $0xbd8] sm:$0xf]  ;;  %v5273_v20 = vor.u32 %v5865_v33, %v5272_v4  ;;  %3257 = vmatpush.bf16.msrb.mxu3 %v4793_v17  ;;  %v2917_v17 = vpop.f32.mrf.mxu1 }
 0x1b5   :  { %v5929_v8 = vld [vmem:[#allocation5 + $0xbf4] sm:$0xf0]  ;;  %3220 = vmatmul.bf16.vlgmr.msrb.gmra.mxu1 %v6218_v53 }
 0x1b6   :  { %v5529_v29 = vor.u32 %v5929_v8, %v5528_v6  ;;  %v5240_v35 = vld [vmem:[#allocation5 + $0x998] sm:$0xf]  ;;  %3269 = vmatpush.bf16.msra.mxu0 %v5273_v20  ;;  %v2867_v6 = vpop.f32.mrf.mxu2  ;;  %3308 = vmatpush.bf16.msra.mxu2 %v4221_v47  ;;  %v5653_v8 = vld [vmem:[#allocation5 + $0x35c] sm:$0xf]  ;;  %v2955_v2 = vpop.f32.mrf.mxu3 }
 0x1b7   :  { %v5857_v37 = vld [vmem:[#allocation5 + $0x9b4] sm:$0xf0]  ;;  %v2868_v13 = vadd.f32 %v2867_v6, %v6385_v19  ;;  %v5581_v20 = vld [vmem:[#allocation5 + $0x11c] sm:$0xf]  ;;  %v4445_v25 = vor.u32 %v5653_v8, %v4442_v11  ;;  %3258 = vmatmul.bf16.vlgmr.msrb.gmra.mxu3 %v6222_v57 }
 0x1b8   :  { %v5496_v38 = vld [vmem:[#allocation5 + $0xb98] sm:$0xf]  ;;  %v5241_v49 = vor.u32 %v5857_v37, %v5240_v35  ;;  %3288 = vmatpush.bf16.msra.mxu1 %v5529_v29  ;;  %3326 = vmatpush.bf16.msra.mxu3 %v4509_v32  ;;  %v2918_v35 = vadd.f32 %v2917_v17, %v2899_v39  ;;  %v5645_v37 = vld [vmem:[#allocation5 + $0x31c] sm:$0xf]  ;;  %v4157_v62 = vor.u32 %v5581_v20, %v4154_v21 }
 0x1b9   :  { %v5921_v41 = vld [vmem:[#allocation5 + $0xbb4] sm:$0xf0]  ;;  %v6411_v10 = vadd.f32 %v2886_v30, %v2868_v13  ;;  %v4090_v17 = vld [vmem:[#allocation5 + $0xb8] sm:$0xf0] }
 0x1ba   :  { %v5497_v63 = vor.u32 %v5921_v41, %v5496_v38  ;;  %v5208_v0 = vld [vmem:[#allocation5 + $0x958] sm:$0xf]  ;;  %3270 = vmatpush.bf16.msra.mxu0 %v5241_v49  ;;  %v4410_v38 = vld [vmem:[#allocation5 + $0x338] sm:$0xf0]  ;;  %3309 = vmatpush.bf16.msra.mxu2 %v4189_v9  ;;  %v2900_v30 = vpop.f32.mrf.mxu0 }
 0x1bb   :  { %v5849_v4 = vld [vmem:[#allocation5 + $0x974] sm:$0xf0]  ;;  %v5573_v41 = vld [vmem:[#allocation5 + $0xdc] sm:$0xf]  ;;  %v4413_v47 = vor.u32 %v5645_v37, %v4410_v38  ;;  %v2901_v8 = vadd.f32 %v2900_v30, %v6395_v45  ;;  %v4093_v45 = vor.u32 %v5565_v15, %v4090_v17 }
 0x1bc   :  { %v5464_v33 = vld [vmem:[#allocation5 + $0xb58] sm:$0xf]  ;;  %3289 = vmatpush.bf16.msra.mxu1 %v5497_v63  ;;  %3327 = vmatpush.bf16.msra.mxu3 %v4477_v26  ;;  %v5209_v27 = vor.u32 %v5849_v4, %v5208_v0  ;;  %v5637_v4 = vld [vmem:[#allocation5 + $0x2dc] sm:$0xf]  ;;  %v4125_v11 = vor.u32 %v5573_v41, %v4122_v42 }
 0x1bd   :  { %v5913_v7 = vld [vmem:[#allocation5 + $0xb74] sm:$0xf0]  ;;  %v4058_v37 = vld [vmem:[#allocation5 + $0x78] sm:$0xf0] }
 0x1be   :  { %v5465_v22 = vor.u32 %v5913_v7, %v5464_v33  ;;  %v5176_v28 = vld [vmem:[#allocation5 + $0x918] sm:$0xf]  ;;  %3271 = vmatpush.bf16.msra.mxu0 %v5209_v27  ;;  %v2936_v52 = vpop.f32.mrf.mxu2  ;;  %v4378_v33 = vld [vmem:[#allocation5 + $0x2f8] sm:$0xf0]  ;;  %v2919_v7 = vpop.f32.mrf.mxu1  ;;  %3310 = vmatpush.bf16.msra.mxu2 %v4157_v62 }
 0x1bf   :  { %v5841_v29 = vld [vmem:[#allocation5 + $0x934] sm:$0xf0]  ;;  %v2937_v6 = vadd.f32 %v2936_v52, %v2918_v35  ;;  %v4381_v27 = vor.u32 %v5637_v4, %v4378_v33  ;;  %v5549_v4 = vld [vmem:[#allocation5 + $0x1c] sm:$0xf] }
 0x1c0   :  { %v5432_v32 = vld [vmem:[#allocation5 + $0xb18] sm:$0xf]  ;;  %v5177_v12 = vor.u32 %v5841_v29, %v5176_v28  ;;  %3290 = vmatpush.bf16.msra.mxu1 %v5465_v22  ;;  %3328 = vmatpush.bf16.msra.mxu3 %v4445_v25  ;;  %v2920_v25 = vadd.f32 %v2919_v7, %v2901_v8  ;;  %v5629_v29 = vld [vmem:[#allocation5 + $0x29c] sm:$0xf] }
 0x1c1   :  { %v5905_v19 = vld [vmem:[#allocation5 + $0xb34] sm:$0xf0]  ;;  %v6418_v39 = vadd.f32 %v2955_v2, %v2937_v6  ;;  %v4026_v7 = vld [vmem:[#allocation5 + $0x38] sm:$0xf0]  ;;  %3244 = vmatmul.bf16.gmra.mxu2 %v6232_v51 }
 0x1c2   :  { %v5433_v43 = vor.u32 %v5905_v19, %v5432_v32  ;;  %v5144_v49 = vld [vmem:[#allocation5 + $0x8d8] sm:$0xf]  ;;  %3272 = vmatpush.bf16.msra.mxu0 %v5177_v12  ;;  %v4346_v32 = vld [vmem:[#allocation5 + $0x2b8] sm:$0xf0]  ;;  %3311 = vmatpush.bf16.msra.mxu2 %v4125_v11  ;;  %v2903_v2 = vpop.f32.mrf.mxu0 }
 0x1c3   :  { %v5833_v63 = vld [vmem:[#allocation5 + $0x8f4] sm:$0xf0]  ;;  %v5557_v19 = vld [vmem:[#allocation5 + $0x5c] sm:$0xf]  ;;  %v4349_v62 = vor.u32 %v5629_v29, %v4346_v32  ;;  %v2904_v33 = vadd.f32 %v2903_v2, %v6405_v23  ;;  %3206 = vmatmul.bf16.gmra.mxu0 %v6228_v44 }
 0x1c4   :  { %v5400_v26 = vld [vmem:[#allocation5 + $0xad8] sm:$0xf]  ;;  %v5145_v13 = vor.u32 %v5833_v63, %v5144_v49  ;;  %3291 = vmatpush.bf16.msra.mxu1 %v5433_v43  ;;  %3329 = vmatpush.bf16.msra.mxu3 %v4413_v47  ;;  %v2957_v47 = vpop.f32.mrf.mxu3  ;;  %v5621_v63 = vld [vmem:[#allocation5 + $0x25c] sm:$0xf]  ;;  %v4061_v6 = vor.u32 %v5557_v19, %v4058_v37 }
 0x1c5   :  { %v5897_v0 = vld [vmem:[#allocation5 + $0xaf4] sm:$0xf0]  ;;  %3225 = vmatmul.bf16.gmra.mxu1 %v6230_v50  ;;  %v4282_v23 = vld [vmem:[#allocation5 + $0x238] sm:$0xf0] }
 0x1c6   :  { %v5401_v9 = vor.u32 %v5897_v0, %v5400_v26  ;;  %v5112_v20 = vld [vmem:[#allocation5 + $0x898] sm:$0xf]  ;;  %3273 = vmatpush.bf16.msra.mxu0 %v5145_v13  ;;  %v2938_v43 = vpop.f32.mrf.mxu2  ;;  %v4314_v26 = vld [vmem:[#allocation5 + $0x278] sm:$0xf0]  ;;  %v2922_v0 = vpop.f32.mrf.mxu1  ;;  %3312 = vmatpush.bf16.msra.mxu2 %v4093_v45  ;;  %v4029_v45 = vor.u32 %v5549_v4, %v4026_v7 }
 0x1c7   :  { %v5825_v21 = vld [vmem:[#allocation5 + $0x8b4] sm:$0xf0]  ;;  %v2939_v52 = vadd.f32 %v2938_v43, %v2920_v25  ;;  %v4317_v17 = vor.u32 %v5621_v63, %v4314_v26  ;;  %v5274_v25 = vld [vmem:[#allocation5 + $0x9f8] sm:$0xf0]  ;;  %3263 = vmatmul.bf16.gmra.mxu3 %v6234_v56 }
 0x1c8   :  { %v5368_v22 = vld [vmem:[#allocation5 + $0xa98] sm:$0xf]  ;;  %v5113_v35 = vor.u32 %v5825_v21, %v5112_v20  ;;  %3292 = vmatpush.bf16.msra.mxu1 %v5401_v9  ;;  %3330 = vmatpush.bf16.msra.mxu3 %v4381_v27  ;;  %v5613_v20 = vld [vmem:[#allocation5 + $0x21c] sm:$0xf]  ;;  %v2923_v21 = vadd.f32 %v2922_v0, %v2904_v33 }
 0x1c9   :  { %v5889_v28 = vld [vmem:[#allocation5 + $0xab4] sm:$0xf0]  ;;  %v6421_v13 = vadd.f32 %v2957_v47, %v2939_v52  ;;  %v4762_v29 = vld [vmem:[#allocation5 + $0x5f8] sm:$0xf0] }
 0x1ca   :  { %v5369_v38 = vor.u32 %v5889_v28, %v5368_v22  ;;  %v5080_v12 = vld [vmem:[#allocation5 + $0x858] sm:$0xf]  ;;  %3274 = vmatpush.bf16.msra.mxu0 %v5113_v35  ;;  %v5861_v22 = vld [vmem:[#allocation5 + $0x9dc] sm:$0xf]  ;;  %3313 = vmatpush.bf16.msra.mxu2 %v4061_v6  ;;  %v2905_v52 = vpop.f32.mrf.mxu0 }
 0x1cb   :  { %v5817_v41 = vld [vmem:[#allocation5 + $0x874] sm:$0xf0]  ;;  %v5733_v28 = vld [vmem:[#allocation5 + $0x5dc] sm:$0xf]  ;;  %v5277_v43 = vor.u32 %v5861_v22, %v5274_v25  ;;  %v2906_v7 = vadd.f32 %v2905_v52, %v6411_v10  ;;  %v6431_v10 = vperm.slane %v6350_v31, 4 }
 0x1cc   :  { %v5336_v42 = vld [vmem:[#allocation5 + $0xa58] sm:$0xf]  ;;  %v5081_v30 = vor.u32 %v5817_v41, %v5080_v12  ;;  %3293 = vmatpush.bf16.msra.mxu1 %v5369_v38  ;;  %3331 = vmatpush.bf16.msra.mxu3 %v4349_v62  ;;  %v5797_v32 = vld [vmem:[#allocation5 + $0x7dc] sm:$0xf]  ;;  %v4285_v12 = vor.u32 %v5613_v20, %v4282_v23  ;;  %v4765_v47 = vor.u32 %v5733_v28, %v4762_v29 }
 0x1cd   :  { %v5881_v49 = vld [vmem:[#allocation5 + $0xa74] sm:$0xf0]  ;;  %v5018_v19 = vld [vmem:[#allocation5 + $0x7f8] sm:$0xf0] }
 0x1ce   :  { %v5048_v8 = vld [vmem:[#allocation5 + $0x818] sm:$0xf]  ;;  %v5337_v15 = vor.u32 %v5881_v49, %v5336_v42  ;;  %3275 = vmatpush.bf16.msra.mxu0 %v5081_v30  ;;  %v5925_v37 = vld [vmem:[#allocation5 + $0xbdc] sm:$0xf]  ;;  %v2941_v41 = vpop.f32.mrf.mxu2  ;;  %v2960_v42 = vpop.f32.mrf.mxu3  ;;  %v5021_v0 = vor.u32 %v5797_v32, %v5018_v19  ;;  %3314 = vmatpush.bf16.msra.mxu2 %v4029_v45 }
 0x1cf   :  { %v5809_v11 = vld [vmem:[#allocation5 + $0x834] sm:$0xf0]  ;;  %v5530_v38 = vld [vmem:[#allocation5 + $0xbf8] sm:$0xf0]  ;;  %v2942_v26 = vadd.f32 %v2941_v41, %v2923_v21  ;;  %v2924_v2 = vpop.f32.mrf.mxu1 }
 0x1d0   :  { %v5304_v9 = vld [vmem:[#allocation5 + $0xa18] sm:$0xf]  ;;  %v5049_v35 = vor.u32 %v5809_v11, %v5048_v8  ;;  %3294 = vmatpush.bf16.msra.mxu1 %v5337_v15  ;;  %3332 = vmatpush.bf16.msra.mxu3 %v4317_v17  ;;  %v5853_v49 = vld [vmem:[#allocation5 + $0x99c] sm:$0xf]  ;;  %v5533_v33 = vor.u32 %v5925_v37, %v5530_v38 }
 0x1d1   :  { %v5873_v27 = vld [vmem:[#allocation5 + $0xa34] sm:$0xf0]  ;;  %v5242_v63 = vld [vmem:[#allocation5 + $0x9b8] sm:$0xf0]  ;;  %v6428_v17 = vadd.f32 %v2960_v42, %v2942_v26  ;;  %3315 = vmatmul.bf16.vlgmr.msra.gmra.mxu2 %v6216_v48 }
 0x1d2   :  { %v5305_v62 = vor.u32 %v5873_v27, %v5304_v9  ;;  %v5725_v4 = vld [vmem:[#allocation5 + $0x59c] sm:$0xf]  ;;  %3276 = vmatpush.bf16.msra.mxu0 %v5049_v35  ;;  %v2925_v9 = vadd.f32 %v2924_v2, %v2906_v7  ;;  %3383 = vmatpush.bf16.msrb.mxu2 %v5277_v43  ;;  %v5245_v27 = vor.u32 %v5853_v49, %v5242_v63 }
 0x1d3   :  { %v4730_v6 = vld [vmem:[#allocation5 + $0x5b8] sm:$0xf0] }
 0x1d4   :  { %v5789_v30 = vld [vmem:[#allocation5 + $0x79c] sm:$0xf]  ;;  %3295 = vmatpush.bf16.msra.mxu1 %v5305_v62  ;;  %3333 = vmatpush.bf16.msra.mxu3 %v4285_v12  ;;  %v4733_v20 = vor.u32 %v5725_v4, %v4730_v6  ;;  %v2974_v12 = vpop.f32.mrf.mxu0 }
 0x1d5   :  { %v4986_v8 = vld [vmem:[#allocation5 + $0x7b8] sm:$0xf0]  ;;  %v2975_v31 = vadd.f32 %v2974_v12, %v6431_v10  ;;  %3277 = vmatmul.bf16.vlgmr.msra.gmra.mxu0 %v6240_v60 }
 0x1d6   :  { %v5917_v11 = vld [vmem:[#allocation5 + $0xb9c] sm:$0xf]  ;;  %3345 = vmatpush.bf16.msrb.mxu0 %v4765_v47  ;;  %v4989_v21 = vor.u32 %v5789_v30, %v4986_v8  ;;  %v2943_v45 = vpop.f32.mrf.mxu2  ;;  %v2962_v35 = vpop.f32.mrf.mxu3  ;;  %3384 = vmatpush.bf16.msrb.mxu2 %v5245_v27 }
 0x1d7   :  { %v5498_v15 = vld [vmem:[#allocation5 + $0xbb8] sm:$0xf0]  ;;  %v2944_v62 = vadd.f32 %v2943_v45, %v2925_v9  ;;  %v2993_v41 = vpop.f32.mrf.mxu1  ;;  %3296 = vmatmul.bf16.vlgmr.msra.gmra.mxu1 %v6242_v61  ;;  %3334 = vmatmul.bf16.vlgmr.msra.gmra.mxu3 %v6218_v53 }
 0x1d8   :  { %3364 = vmatpush.bf16.msrb.mxu1 %v5021_v0  ;;  %3402 = vmatpush.bf16.msrb.mxu3 %v5533_v33  ;;  %v5501_v23 = vor.u32 %v5917_v11, %v5498_v15  ;;  %v5845_v22 = vld [vmem:[#allocation5 + $0x95c] sm:$0xf]  ;;  %v2994_v7 = vadd.f32 %v2993_v41, %v2975_v31 }
 0x1d9   :  { %v5210_v25 = vld [vmem:[#allocation5 + $0x978] sm:$0xf0]  ;;  %v6434_v63 = vadd.f32 %v2962_v35, %v2944_v62 }
 0x1da   :  { %v5717_v28 = vld [vmem:[#allocation5 + $0x55c] sm:$0xf]  ;;  %3346 = vmatpush.bf16.msrb.mxu0 %v4733_v20  ;;  %v5213_v42 = vor.u32 %v5845_v22, %v5210_v25 }
 0x1db   :  { %v4698_v29 = vld [vmem:[#allocation5 + $0x578] sm:$0xf0] }
 0x1dc   :  { %v5781_v32 = vld [vmem:[#allocation5 + $0x75c] sm:$0xf]  ;;  %3365 = vmatpush.bf16.msrb.mxu1 %v4989_v21  ;;  %3403 = vmatpush.bf16.msrb.mxu3 %v5501_v23  ;;  %v4701_v43 = vor.u32 %v5717_v28, %v4698_v29  ;;  %v2976_v53 = vpop.f32.mrf.mxu0 }
 0x1dd   :  { %v4954_v19 = vld [vmem:[#allocation5 + $0x778] sm:$0xf0]  ;;  %3385 = vmatpush.bf16.msrb.mxu2 %v5213_v42  ;;  %v2977_v31 = vadd.f32 %v2976_v53, %v6431_v10 }
 0x1de   :  { %v5909_v37 = vld [vmem:[#allocation5 + $0xb5c] sm:$0xf]  ;;  %v4957_v26 = vor.u32 %v5781_v32, %v4954_v19  ;;  %3347 = vmatpush.bf16.msrb.mxu0 %v4701_v43  ;;  %v3012_v28 = vpop.f32.mrf.mxu2  ;;  %v3031_v29 = vpop.f32.mrf.mxu3 }
 0x1df   :  { %v5466_v38 = vld [vmem:[#allocation5 + $0xb78] sm:$0xf0]  ;;  %v3013_v45 = vadd.f32 %v3012_v28, %v2994_v7  ;;  %v2995_v35 = vpop.f32.mrf.mxu1 }
 0x1e0   :  { %v5837_v47 = vld [vmem:[#allocation5 + $0x91c] sm:$0xf]  ;;  %v5469_v52 = vor.u32 %v5909_v37, %v5466_v38  ;;  %3366 = vmatpush.bf16.msrb.mxu1 %v4957_v26 }
 0x1e1   :  { %v5178_v49 = vld [vmem:[#allocation5 + $0x938] sm:$0xf0]  ;;  %v6440_v41 = vadd.f32 %v3031_v29, %v3013_v45  ;;  %3320 = vmatmul.bf16.gmra.mxu2 %v6228_v44 }
 0x1e2   :  { %v5709_v2 = vld [vmem:[#allocation5 + $0x51c] sm:$0xf]  ;;  %v5181_v8 = vor.u32 %v5837_v47, %v5178_v49  ;;  %3404 = vmatpush.bf16.msrb.mxu3 %v5469_v52 }
 0x1e3   :  { %v4666_v0 = vld [vmem:[#allocation5 + $0x538] sm:$0xf0] }
 0x1e4   :  { %v5773_v33 = vld [vmem:[#allocation5 + $0x71c] sm:$0xf]  ;;  %v4669_v11 = vor.u32 %v5709_v2, %v4666_v0  ;;  %3386 = vmatpush.bf16.msrb.mxu2 %v5181_v8  ;;  %v2979_v28 = vpop.f32.mrf.mxu0 }
 0x1e5   :  { %v4922_v4 = vld [vmem:[#allocation5 + $0x738] sm:$0xf0]  ;;  %3282 = vmatmul.bf16.gmra.mxu0 %v6248_v58 }
 0x1e6   :  { %v5901_v6 = vld [vmem:[#allocation5 + $0xb1c] sm:$0xf]  ;;  %v4925_v20 = vor.u32 %v5773_v33, %v4922_v4  ;;  %3348 = vmatpush.bf16.msrb.mxu0 %v4669_v11 }
 0x1e7   :  { %v5434_v30 = vld [vmem:[#allocation5 + $0xb38] sm:$0xf0]  ;;  %v2998_v29 = vpop.f32.mrf.mxu1  ;;  %3301 = vmatmul.bf16.gmra.mxu1 %v6250_v59  ;;  %3339 = vmatmul.bf16.gmra.mxu3 %v6230_v50 }
 0x1e8   :  { %v5829_v15 = vld [vmem:[#allocation5 + $0x8dc] sm:$0xf]  ;;  %v5437_v21 = vor.u32 %v5901_v6, %v5434_v30  ;;  %3367 = vmatpush.bf16.msrb.mxu1 %v4925_v20  ;;  %v2996_v30 = vadd.f32 %v2995_v35, %v2977_v31  ;;  %v3033_v20 = vpop.f32.mrf.mxu3 }
 0x1e9   :  { %v5146_v9 = vld [vmem:[#allocation5 + $0x8f8] sm:$0xf0] }
 0x1ea   :  { %v5701_v27 = vld [vmem:[#allocation5 + $0x4dc] sm:$0xf]  ;;  %v5149_v19 = vor.u32 %v5829_v15, %v5146_v9  ;;  %3405 = vmatpush.bf16.msrb.mxu3 %v5437_v21 }
 0x1eb   :  { %v4634_v23 = vld [vmem:[#allocation5 + $0x4f8] sm:$0xf0] }
 0x1ec   :  { %v5765_v22 = vld [vmem:[#allocation5 + $0x6dc] sm:$0xf]  ;;  %v4637_v37 = vor.u32 %v5701_v27, %v4634_v23  ;;  %3387 = vmatpush.bf16.msrb.mxu2 %v5149_v19  ;;  %v3014_v27 = vpop.f32.mrf.mxu2 }
 0x1ed   :  { %v4890_v25 = vld [vmem:[#allocation5 + $0x6f8] sm:$0xf0] }
 0x1ee   :  { %v5893_v32 = vld [vmem:[#allocation5 + $0xadc] sm:$0xf]  ;;  %v4893_v38 = vor.u32 %v5765_v22, %v4890_v25  ;;  %3349 = vmatpush.bf16.msrb.mxu0 %v4637_v37  ;;  %v3015_v25 = vadd.f32 %v3014_v27, %v2996_v30  ;;  %v2981_v30 = vpop.f32.mrf.mxu0  ;;  %v3435_v27 = vld [vmem:[%s7009_s3 + $0x70] sm:$0xff] }
 0x1ef   :  { %v5402_v48 = vld [vmem:[#allocation5 + $0xaf8] sm:$0xf0] }
 0x1f0   :  { %v5821_v62 = vld [vmem:[#allocation5 + $0x89c] sm:$0xf]  ;;  %v5405_v42 = vor.u32 %v5893_v32, %v5402_v48  ;;  %3368 = vmatpush.bf16.msrb.mxu1 %v4893_v38  ;;  %v2980_v32 = vadd.f32 %v2979_v28, %v6431_v10  ;;  %v6444_v19 = vadd.f32 %v3033_v20, %v3015_v25  ;;  %v3451_v20 = vld [vmem:[%s7009_s3 + $0xf0] sm:$0xff]  ;;  %v3466_v25 = vld [vmem:[%s7009_s3 + $0x168] sm:$0xff] }
 0x1f1   :  { %v5114_v12 = vld [vmem:[#allocation5 + $0x8b8] sm:$0xf0]  ;;  %v3482_v28 = vld [vmem:[%s7009_s3 + $0x1e8] sm:$0xff] }
 0x1f2   :  { %v5693_v43 = vld [vmem:[#allocation5 + $0x49c] sm:$0xf]  ;;  %v5117_v0 = vor.u32 %v5821_v62, %v5114_v12  ;;  %3406 = vmatpush.bf16.msrb.mxu3 %v5405_v42 }
 0x1f3   :  { %v4602_v47 = vld [vmem:[#allocation5 + $0x4b8] sm:$0xf0] }
 0x1f4   :  { %v5757_v49 = vld [vmem:[#allocation5 + $0x69c] sm:$0xf]  ;;  %v4605_v33 = vor.u32 %v5693_v43, %v4602_v47  ;;  %3388 = vmatpush.bf16.msrb.mxu2 %v5117_v0 }
 0x1f5   :  { %v4858_v26 = vld [vmem:[#allocation5 + $0x6b8] sm:$0xf0] }
 0x1f6   :  { %v5885_v52 = vld [vmem:[#allocation5 + $0xa9c] sm:$0xf]  ;;  %v4861_v7 = vor.u32 %v5757_v49, %v4858_v26  ;;  %3350 = vmatpush.bf16.msrb.mxu0 %v4605_v33  ;;  %v2999_v49 = vadd.f32 %v2998_v29, %v2980_v32  ;;  %v3017_v33 = vpop.f32.mrf.mxu2  ;;  %v3433_v32 = vld [vmem:[%s7009_s3 + $0x60] sm:$0xff] }
 0x1f7   :  { %v5370_v2 = vld [vmem:[#allocation5 + $0xab8] sm:$0xf0] }
 0x1f8   :  { %v5813_v4 = vld [vmem:[#allocation5 + $0x85c] sm:$0xf]  ;;  %v5373_v8 = vor.u32 %v5885_v52, %v5370_v2  ;;  %3369 = vmatpush.bf16.msrb.mxu1 %v4861_v7  ;;  %v3000_v7 = vpop.f32.mrf.mxu1 }
 0x1f9   :  { %v5082_v6 = vld [vmem:[#allocation5 + $0x878] sm:$0xf0] }
 0x1fa   :  { %v5685_v11 = vld [vmem:[#allocation5 + $0x45c] sm:$0xf]  ;;  %v5085_v48 = vor.u32 %v5813_v4, %v5082_v6  ;;  %3407 = vmatpush.bf16.msrb.mxu3 %v5373_v8  ;;  %v3036_v4 = vpop.f32.mrf.mxu3  ;;  %v3018_v6 = vadd.f32 %v3017_v33, %v2999_v49 }
 0x1fb   :  { %v4570_v15 = vld [vmem:[#allocation5 + $0x478] sm:$0xf0] }
 0x1fc   :  { %v5749_v9 = vld [vmem:[#allocation5 + $0x65c] sm:$0xf]  ;;  %v4573_v45 = vor.u32 %v5685_v11, %v4570_v15  ;;  %3389 = vmatpush.bf16.msrb.mxu2 %v5085_v48  ;;  %v6462_v15 = vadd.f32 %v3036_v4, %v3018_v6  ;;  %v3449_v48 = vld [vmem:[%s7009_s3 + $0xe0] sm:$0xff]  ;;  %v3462_v4 = vld [vmem:[%s7009_s3 + $0x148] sm:$0xff] }
 0x1fd   :  { %v4826_v21 = vld [vmem:[#allocation5 + $0x678] sm:$0xf0]  ;;  %v3478_v6 = vld [vmem:[%s7009_s3 + $0x1c8] sm:$0xff] }
 0x1fe   :  { %v5877_v23 = vld [vmem:[#allocation5 + $0xa5c] sm:$0xf]  ;;  %v4829_v37 = vor.u32 %v5749_v9, %v4826_v21  ;;  %3351 = vmatpush.bf16.msrb.mxu0 %v4573_v45  ;;  %v2982_v9 = vadd.f32 %v2981_v30, %v6431_v10  ;;  %v3467_v21 = vld [vmem:[%s7009_s3 + $0x170] sm:$0xff]  ;;  %v3019_v45 = vpop.f32.mrf.mxu2 }
 0x1ff   :  { %v5338_v22 = vld [vmem:[#allocation5 + $0xa78] sm:$0xf0]  ;;  %v3483_v10 = vld [vmem:[%s7009_s3 + $0x1f0] sm:$0xff] }
 0x200   :  { %v5805_v53 = vld [vmem:[#allocation5 + $0x81c] sm:$0xf]  ;;  %v5341_v38 = vor.u32 %v5877_v23, %v5338_v22  ;;  %3370 = vmatpush.bf16.msrb.mxu1 %v4829_v37  ;;  %v3434_v23 = vld [vmem:[%s7009_s3 + $0x68] sm:$0xff]  ;;  %v3001_v29 = vadd.f32 %v3000_v7, %v2982_v9  ;;  %v3481_v37 = vld [vmem:[%s7009_s3 + $0x1e0] sm:$0xff] }
 0x201   :  { %v5050_v35 = vld [vmem:[#allocation5 + $0x838] sm:$0xf0]  ;;  %v3450_v22 = vld [vmem:[%s7009_s3 + $0xe8] sm:$0xff]  ;;  %v3477_v9 = vld [vmem:[%s7009_s3 + $0x1c0] sm:$0xff] }
 0x202   :  { %v5677_v62 = vld [vmem:[#allocation5 + $0x41c] sm:$0xf]  ;;  %v5053_v26 = vor.u32 %v5805_v53, %v5050_v35  ;;  %3408 = vmatpush.bf16.msrb.mxu3 %v5341_v38  ;;  %v3038_v53 = vpop.f32.mrf.mxu3  ;;  %v3465_v35 = vld [vmem:[%s7009_s3 + $0x160] sm:$0xff]  ;;  %v3020_v38 = vadd.f32 %v3019_v45, %v3001_v29  ;;  %v3426_v29 = vld [vmem:[%s7009_s3 + $0x28] sm:$0xff] }
 0x203   :  { %v4538_v12 = vld [vmem:[#allocation5 + $0x438] sm:$0xf0] }
 0x204   :  { %v5741_v31 = vld [vmem:[#allocation5 + $0x61c] sm:$0xf]  ;;  %v4541_v52 = vor.u32 %v5677_v62, %v4538_v12  ;;  %3390 = vmatpush.bf16.msrb.mxu2 %v5053_v26  ;;  %v3050_v62 = vpop.f32.mrf.mxu0  ;;  %v3069_v12 = vpop.f32.mrf.mxu1 }
 0x205   :  { %v4794_v42 = vld [vmem:[#allocation5 + $0x638] sm:$0xf0] }
 0x206   :  { %v5869_v43 = vld [vmem:[#allocation5 + $0xa1c] sm:$0xf]  ;;  %v4797_v2 = vor.u32 %v5741_v31, %v4794_v42  ;;  %3352 = vmatpush.bf16.msrb.mxu0 %v4541_v52  ;;  %v3051_v31 = vadd.f32 %v3050_v62, %v6440_v41  ;;  %v6502_v42 = vadd.f32 %v3038_v53, %v3020_v38  ;;  %v3431_v52 = vld [vmem:[%s7009_s3 + $0x50] sm:$0xff]  ;;  %v3458_v53 = vld [vmem:[%s7009_s3 + $0x128] sm:$0xff] }
 0x207   :  { %v5306_v47 = vld [vmem:[#allocation5 + $0xa38] sm:$0xf0]  ;;  %3391 = vmatmul.bf16.vlgmr.msrb.gmra.mxu2 %v6240_v60  ;;  %v3479_v60 = vld [vmem:[%s7009_s3 + $0x1d0] sm:$0xff] }
 0x208   :  { %v5309_v0 = vor.u32 %v5869_v43, %v5306_v47  ;;  %v3436_v8 = vld [vmem:[%s7009_s3 + $0x78] sm:$0xff]  ;;  %3371 = vmatpush.bf16.msrb.mxu1 %v4797_v2  ;;  %v6510_v49 = vadd.f32 %v3069_v12, %v3051_v31  ;;  %v3446_v2 = vld [vmem:[%s7009_s3 + $0xc8] sm:$0xff]  ;;  %v3425_v12 = vld [vmem:[%s7009_s3 + $0x20] sm:$0xff] }
 0x209   :  { %v3452_v44 = vld [vmem:[%s7009_s3 + $0xf8] sm:$0xff]  ;;  %3353 = vmatmul.bf16.vlgmr.msrb.gmra.mxu0 %v6220_v54  ;;  %v3447_v54 = vld [vmem:[%s7009_s3 + $0xd0] sm:$0xff]  ;;  %v3441_v31 = vld [vmem:[%s7009_s3 + $0xa0] sm:$0xff] }
 0x20a   :  { %v3468_v50 = vld [vmem:[%s7009_s3 + $0x178] sm:$0xff]  ;;  %3409 = vmatpush.bf16.msrb.mxu3 %v5309_v0  ;;  %3553 = vmatpush.msra.mxu0 %v3436_v8  ;;  %v6540_v0 = vpop.f32.mrf.mxu2  ;;  %v6542_v33 = vpop.f32.mrf.mxu3  ;;  %v3429_v8 = vld [vmem:[%s7009_s3 + $0x40] sm:$0xff] }
 0x20b   :  { %v3484_v11 = vld [vmem:[%s7009_s3 + $0x1f8] sm:$0xff]  ;;  %3611 = vmatpush.msra.mxu2 %v3468_v50  ;;  %3372 = vmatmul.bf16.vlgmr.msrb.gmra.mxu1 %v6222_v57  ;;  %v3463_v57 = vld [vmem:[%s7009_s3 + $0x150] sm:$0xff] }
 0x20c   :  { %3582 = vmatpush.msra.mxu1 %v3452_v44  ;;  %3554 = vmatpush.msra.mxu0 %v3435_v27  ;;  %v3432_v43 = vld [vmem:[%s7009_s3 + $0x58] sm:$0xff]  ;;  %v3052_v30 = vpop.f32.mrf.mxu0  ;;  %v3071_v7 = vpop.f32.mrf.mxu1  ;;  %v3445_v44 = vld [vmem:[%s7009_s3 + $0xc0] sm:$0xff] }
 0x20d   :  { %3612 = vmatpush.msra.mxu2 %v3467_v21  ;;  %v3448_v47 = vld [vmem:[%s7009_s3 + $0xd8] sm:$0xff]  ;;  %3410 = vmatmul.bf16.vlgmr.msrb.gmra.mxu3 %v6242_v61  ;;  %v3430_v61 = vld [vmem:[%s7009_s3 + $0x48] sm:$0xff]  ;;  %v3053_v50 = vadd.f32 %v3052_v30, %v6444_v19 }
 0x20e   :  { %3640 = vmatpush.msra.mxu3 %v3484_v11  ;;  %3583 = vmatpush.msra.mxu1 %v3451_v20  ;;  %v3464_v41 = vld [vmem:[%s7009_s3 + $0x158] sm:$0xff]  ;;  %v3461_v11 = vld [vmem:[%s7009_s3 + $0x140] sm:$0xff] }
 0x20f   :  { %3555 = vmatpush.msra.mxu0 %v3434_v23  ;;  %3613 = vmatpush.msra.mxu2 %v3466_v25  ;;  %v3480_v26 = vld [vmem:[%s7009_s3 + $0x1d8] sm:$0xff]  ;;  %v6569_v20 = vadd.f32 %v3071_v7, %v3053_v50  ;;  %v3427_v23 = vld [vmem:[%s7009_s3 + $0x30] sm:$0xff]  ;;  %v3454_v7 = vld [vmem:[%s7009_s3 + $0x108] sm:$0xff] }
 0x210   :  { %3641 = vmatpush.msra.mxu3 %v3483_v10  ;;  %3584 = vmatpush.msra.mxu1 %v3450_v22  ;;  %v3428_v27 = vld [vmem:[%s7009_s3 + $0x38] sm:$0xff]  ;;  %v3443_v22 = vld [vmem:[%s7009_s3 + $0xb0] sm:$0xff] }
 0x211   :  { %3556 = vmatpush.msra.mxu0 %v3433_v32  ;;  %3614 = vmatpush.msra.mxu2 %v3465_v35  ;;  %v3444_v19 = vld [vmem:[%s7009_s3 + $0xb8] sm:$0xff]  ;;  %v3459_v25 = vld [vmem:[%s7009_s3 + $0x130] sm:$0xff]  ;;  %v3442_v32 = vld [vmem:[%s7009_s3 + $0xa8] sm:$0xff] }
 0x212   :  { %3642 = vmatpush.msra.mxu3 %v3482_v28  ;;  %3585 = vmatpush.msra.mxu1 %v3449_v48  ;;  %v3460_v21 = vld [vmem:[%s7009_s3 + $0x138] sm:$0xff]  ;;  %v3475_v28 = vld [vmem:[%s7009_s3 + $0x1b0] sm:$0xff]  ;;  %v6595_v48 = vpop.f32.mrf.mxu2  ;;  %v6597_v45 = vpop.f32.mrf.mxu3  ;;  %v3474_v35 = vld [vmem:[%s7009_s3 + $0x1a8] sm:$0xff] }
 0x213   :  { %3557 = vmatpush.msra.mxu0 %v3432_v43  ;;  %3615 = vmatpush.msra.mxu2 %v3464_v41  ;;  %v3476_v10 = vld [vmem:[%s7009_s3 + $0x1b8] sm:$0xff] }
 0x214   :  { %3643 = vmatpush.msra.mxu3 %v3481_v37  ;;  %3586 = vmatpush.msra.mxu1 %v3448_v47  ;;  %v3055_v37 = vpop.f32.mrf.mxu0  ;;  %v3074_v38 = vpop.f32.mrf.mxu1  ;;  %v3473_v47 = vld [vmem:[%s7009_s3 + $0x1a0] sm:$0xff]  ;;  %v3424_v41 = vld [vmem:[%s7009_s3 + $0x18] sm:$0xff] }
 0x215   :  { %3558 = vmatpush.msra.mxu0 %v3431_v52  ;;  %3616 = vmatpush.msra.mxu2 %v3463_v57  ;;  %v3056_v62 = vadd.f32 %v3055_v37, %v6462_v15  ;;  %v3457_v15 = vld [vmem:[%s7009_s3 + $0x120] sm:$0xff]  ;;  %v3455_v57 = vld [vmem:[%s7009_s3 + $0x110] sm:$0xff]  ;;  %v3532_v37 = vld [vmem:[%s7009_s3 + $0x378] sm:$0xff] }
 0x216   :  { %3644 = vmatpush.msra.mxu3 %v3480_v26  ;;  %3587 = vmatpush.msra.mxu1 %v3447_v54  ;;  %v3439_v26 = vld [vmem:[%s7009_s3 + $0x90] sm:$0xff] }
 0x217   :  { %3559 = vmatpush.msra.mxu0 %v3430_v61  ;;  %3617 = vmatpush.msra.mxu2 %v3462_v4  ;;  %v6612_v43 = vadd.f32 %v3074_v38, %v3056_v62  ;;  %v3422_v4 = vld [vmem:[%s7009_s3 + $0x8] sm:$0xff] }
 0x218   :  { %3645 = vmatpush.msra.mxu3 %v3479_v60  ;;  %3588 = vmatpush.msra.mxu1 %v3446_v2  ;;  %v3471_v60 = vld [vmem:[%s7009_s3 + $0x190] sm:$0xff] }
 0x219   :  { %3560 = vmatpush.msra.mxu0 %v3429_v8  ;;  %3618 = vmatpush.msra.mxu2 %v3461_v11  ;;  %v3470_v8 = vld [vmem:[%s7009_s3 + $0x188] sm:$0xff]  ;;  %v3453_v11 = vld [vmem:[%s7009_s3 + $0x100] sm:$0xff] }
 0x21a   :  { %3646 = vmatpush.msra.mxu3 %v3478_v6  ;;  %3589 = vmatpush.msra.mxu1 %v3445_v44  ;;  %v6642_v52 = vpop.f32.mrf.mxu2  ;;  %v6644_v54 = vpop.f32.mrf.mxu3  ;;  %v3438_v6 = vld [vmem:[%s7009_s3 + $0x88] sm:$0xff]  ;;  %v3421_v44 = vld [vmem:[%s7009_s3] sm:$0xff] }
 0x21b   :  { %3561 = vmatpush.msra.mxu0 %v3428_v27  ;;  %3619 = vmatpush.msra.mxu2 %v3460_v21  ;;  %v3500_v27 = vld [vmem:[%s7009_s3 + $0x278] sm:$0xff]  ;;  %v3499_v21 = vld [vmem:[%s7009_s3 + $0x270] sm:$0xff] }
 0x21c   :  { %3647 = vmatpush.msra.mxu3 %v3477_v9  ;;  %3590 = vmatpush.msra.mxu1 %v3444_v19  ;;  %v3057_v61 = vpop.f32.mrf.mxu0  ;;  %v3076_v2 = vpop.f32.mrf.mxu1  ;;  %v3469_v9 = vld [vmem:[%s7009_s3 + $0x180] sm:$0xff]  ;;  %v3516_v19 = vld [vmem:[%s7009_s3 + $0x2f8] sm:$0xff] }
 0x21d   :  { %3562 = vmatpush.msra.mxu0 %v3427_v23  ;;  %3620 = vmatpush.msra.mxu2 %v3459_v25  ;;  %v3058_v30 = vadd.f32 %v3057_v61, %v6502_v42  ;;  %v3437_v42 = vld [vmem:[%s7009_s3 + $0x80] sm:$0xff]  ;;  %v3492_v61 = vld [vmem:[%s7009_s3 + $0x238] sm:$0xff] }
 0x21e   :  { %3648 = vmatpush.msra.mxu3 %v3476_v10  ;;  %3591 = vmatpush.msra.mxu1 %v3443_v22  ;;  %v3515_v10 = vld [vmem:[%s7009_s3 + $0x2f0] sm:$0xff] }
 0x21f   :  { %3563 = vmatpush.msra.mxu0 %v3426_v29  ;;  %3621 = vmatpush.msra.mxu2 %v3458_v53  ;;  %v6671_v50 = vadd.f32 %v3076_v2, %v3058_v30  ;;  %v3498_v29 = vld [vmem:[%s7009_s3 + $0x268] sm:$0xff]  ;;  %v3497_v53 = vld [vmem:[%s7009_s3 + $0x260] sm:$0xff]  ;;  %v3508_v2 = vld [vmem:[%s7009_s3 + $0x2b8] sm:$0xff] }
 0x220   :  { %3649 = vmatpush.msra.mxu3 %v3475_v28  ;;  %3592 = vmatpush.msra.mxu1 %v3442_v32  ;;  %v3514_v32 = vld [vmem:[%s7009_s3 + $0x2e8] sm:$0xff]  ;;  %v3491_v30 = vld [vmem:[%s7009_s3 + $0x230] sm:$0xff] }
 0x221   :  { %3358 = vmatmul.bf16.gmra.mxu0 %v6232_v51  ;;  %3377 = vmatmul.bf16.gmra.mxu1 %v6234_v56  ;;  %v3440_v51 = vld [vmem:[%s7009_s3 + $0x98] sm:$0xff] }
 0x222   :  { %3650 = vmatpush.msra.mxu3 %v3474_v35  ;;  %3396 = vmatmul.bf16.gmra.mxu2 %v6248_v58  ;;  %v3456_v56 = vld [vmem:[%s7009_s3 + $0x118] sm:$0xff]  ;;  %v6691_v23 = vpop.f32.mrf.mxu2  ;;  %v6693_v22 = vpop.f32.mrf.mxu3  ;;  %v3513_v35 = vld [vmem:[%s7009_s3 + $0x2e0] sm:$0xff] }
 0x223   :  { %3415 = vmatmul.bf16.gmra.mxu3 %v6250_v59  ;;  %3564 = vmatpush.msra.mxu0 %v3425_v12  ;;  %v3472_v58 = vld [vmem:[%s7009_s3 + $0x198] sm:$0xff]  ;;  %v3423_v59 = vld [vmem:[%s7009_s3 + $0x10] sm:$0xff] }
 0x224   :  { %3593 = vmatpush.msra.mxu1 %v3441_v31  ;;  %3622 = vmatpush.msra.mxu2 %v3457_v15  ;;  %v6695_v25 = vpop.f32.mrf.mxu0  ;;  %v6697_v28 = vpop.f32.mrf.mxu1  ;;  %v3531_v12 = vld [vmem:[%s7009_s3 + $0x370] sm:$0xff] }
 0x225   :  { %3651 = vmatpush.msra.mxu3 %v3473_v47  ;;  %3565 = vmatpush.msra.mxu0 %v3424_v41  ;;  %v3495_v31 = vld [vmem:[%s7009_s3 + $0x250] sm:$0xff]  ;;  %v3530_v47 = vld [vmem:[%s7009_s3 + $0x368] sm:$0xff] }
 0x226   :  { %3594 = vmatpush.msra.mxu1 %v3440_v51  ;;  %3623 = vmatpush.msra.mxu2 %v3456_v56  ;;  %v3511_v15 = vld [vmem:[%s7009_s3 + $0x2d0] sm:$0xff]  ;;  %v3494_v41 = vld [vmem:[%s7009_s3 + $0x248] sm:$0xff] }
 0x227   :  { %3652 = vmatpush.msra.mxu3 %v3472_v58  ;;  %3566 = vmatpush.msra.mxu0 %v3423_v59  ;;  %v3510_v51 = vld [vmem:[%s7009_s3 + $0x2c8] sm:$0xff] }
 0x228   :  { %3595 = vmatpush.msra.mxu1 %v3439_v26  ;;  %3624 = vmatpush.msra.mxu2 %v3455_v57  ;;  %v3528_v26 = vld [vmem:[%s7009_s3 + $0x358] sm:$0xff] }
 0x229   :  { %3653 = vmatpush.msra.mxu3 %v3471_v60  ;;  %3567 = vmatpush.msra.mxu0 %v3422_v4 }
 0x22a   :  { %3596 = vmatpush.msra.mxu1 %v3438_v6  ;;  %3625 = vmatpush.msra.mxu2 %v3454_v7  ;;  %v3527_v6 = vld [vmem:[%s7009_s3 + $0x350] sm:$0xff] }
 0x22b   :  { %3654 = vmatpush.msra.mxu3 %v3470_v8  ;;  %3568 = vmatpush.msra.mxu0 %v3421_v44  ;;  %v3525_v44 = vld [vmem:[%s7009_s3 + $0x340] sm:$0xff] }
 0x22c   :  { %3597 = vmatpush.msra.mxu1 %v3437_v42  ;;  %3626 = vmatpush.msra.mxu2 %v3453_v11  ;;  %v6728_v38 = vpop.f32.mrf.mxu0  ;;  %v6730_v62 = vpop.f32.mrf.mxu1 }
 0x22d   :  { %3655 = vmatpush.msra.mxu3 %v3469_v9  ;;  %3669 = vmatpush.msrb.mxu0 %v3500_v27  ;;  %v3489_v9 = vld [vmem:[%s7009_s3 + $0x220] sm:$0xff] }
 0x22e   :  { %3698 = vmatpush.msrb.mxu1 %v3516_v19  ;;  %3727 = vmatpush.msrb.mxu2 %v3532_v37  ;;  %v3485_v37 = vld [vmem:[%s7009_s3 + $0x200] sm:$0xff] }
 0x22f   :  { %3670 = vmatpush.msrb.mxu0 %v3499_v21  ;;  %v3488_v21 = vld [vmem:[%s7009_s3 + $0x218] sm:$0xff] }
 0x230   :  { %3699 = vmatpush.msrb.mxu1 %v3515_v10  ;;  %3728 = vmatpush.msrb.mxu2 %v3531_v12  ;;  %v3504_v10 = vld [vmem:[%s7009_s3 + $0x298] sm:$0xff]  ;;  %v3501_v12 = vld [vmem:[%s7009_s3 + $0x280] sm:$0xff] }
 0x231   :  { %3569 = vmatmul.f32.vlgmr.msra.gmra.mxu0 %v6298_v36  ;;  %3598 = vmatmul.f32.vlgmr.msra.gmra.mxu1 %v6338_v55  ;;  %v3496_v36 = vld [vmem:[%s7009_s3 + $0x258] sm:$0xff] }
 0x232   :  { %3627 = vmatmul.f32.vlgmr.msra.gmra.mxu2 %v6378_v14  ;;  %3671 = vmatpush.msrb.mxu0 %v3498_v29  ;;  %v3512_v55 = vld [vmem:[%s7009_s3 + $0x2d8] sm:$0xff]  ;;  %v6721_v14 = vpop.f32.mrf.mxu2  ;;  %v3487_v29 = vld [vmem:[%s7009_s3 + $0x210] sm:$0xff] }
 0x233   :  { %3656 = vmatmul.f32.vlgmr.msra.gmra.mxu3 %v6418_v39  ;;  %3700 = vmatpush.msrb.mxu1 %v3514_v32  ;;  %v6723_v39 = vpop.f32.mrf.mxu3 }
 0x234   :  { %3672 = vmatpush.msrb.mxu0 %v3497_v53  ;;  %3729 = vmatpush.msrb.mxu2 %v3530_v47  ;;  %v6775_v57 = vpop.f32.mrf.mxu0  ;;  %v6777_v60 = vpop.f32.mrf.mxu1  ;;  %v3486_v53 = vld [vmem:[%s7009_s3 + $0x208] sm:$0xff] }
 0x235   :  { %3701 = vmatpush.msrb.mxu1 %v3513_v35  ;;  %v3502_v35 = vld [vmem:[%s7009_s3 + $0x288] sm:$0xff] }
 0x236   :  { %3673 = vmatpush.msrb.mxu0 %v3496_v36 }
 0x237   :  { %3702 = vmatpush.msrb.mxu1 %v3512_v55 }
 0x238   :  { %3674 = vmatpush.msrb.mxu0 %v3495_v31 }
 0x239   :  { %3572 = vmatmul.f32.gmra.mxu0 %v6311_v16  ;;  %3601 = vmatmul.f32.gmra.mxu1 %v6341_v34  ;;  %v3529_v16 = vld [vmem:[%s7009_s3 + $0x360] sm:$0xff] }
 0x23a   :  { %3630 = vmatmul.f32.gmra.mxu2 %v6391_v5  ;;  %3703 = vmatpush.msrb.mxu1 %v3511_v15  ;;  %v3493_v34 = vld [vmem:[%s7009_s3 + $0x240] sm:$0xff]  ;;  %v6768_v58 = vpop.f32.mrf.mxu2 }
 0x23b   :  { %3659 = vmatmul.f32.gmra.mxu3 %v6421_v13  ;;  %v3509_v5 = vld [vmem:[%s7009_s3 + $0x2c0] sm:$0xff]  ;;  %v6770_v59 = vpop.f32.mrf.mxu3  ;;  %3675 = vmatpush.msrb.mxu0 %v3494_v41  ;;  %v3520_v41 = vld [vmem:[%s7009_s3 + $0x318] sm:$0xff] }
 0x23c   :  { %v6763_v13 = vld [vmem:[#allocation7] sm:$0xff]  ;;  %3704 = vmatpush.msrb.mxu1 %v3510_v51  ;;  %3730 = vmatpush.msrb.mxu2 %v3529_v16  ;;  %v6817_v42 = vpop.f32.mrf.mxu0  ;;  %v6819_v11 = vpop.f32.mrf.mxu1 }
 0x23d   :  { %v6766_v56 = vperm.slane %v6763_v13, 5  ;;  %3676 = vmatpush.msrb.mxu0 %v3493_v34  ;;  %v3519_v34 = vld [vmem:[%s7009_s3 + $0x310] sm:$0xff] }
 0x23e   :  { %3705 = vmatpush.msrb.mxu1 %v3509_v5  ;;  %3731 = vmatpush.msrb.mxu2 %v3528_v26  ;;  %v3518_v26 = vld [vmem:[%s7009_s3 + $0x308] sm:$0xff] }
 0x23f   :  { %v3089_v4 = vadd.f32 %v6540_v0, %v6766_v56  ;;  %v3507_v0 = vld [vmem:[%s7009_s3 + $0x2b0] sm:$0xff]  ;;  %3677 = vmatpush.msrb.mxu0 %v3492_v61  ;;  %v3091_v19 = vadd.f32 %v6595_v48, %v6766_v56  ;;  %v3094_v31 = vadd.f32 %v6642_v52, %v6766_v56  ;;  %v3517_v61 = vld [vmem:[%s7009_s3 + $0x300] sm:$0xff] }
 0x240   :  { %3706 = vmatpush.msrb.mxu1 %v3508_v2  ;;  %3732 = vmatpush.msrb.mxu2 %v3527_v6  ;;  %v3548_v2 = vld [vmem:[%s7009_s3 + $0x3f8] sm:$0xff] }
 0x241   :  { %3575 = vmatmul.f32.gmra.mxu0 %v6317_v18  ;;  %3604 = vmatmul.f32.gmra.mxu1 %v6348_v24  ;;  %v3526_v18 = vld [vmem:[%s7009_s3 + $0x348] sm:$0xff]  ;;  %v3113_v52 = vadd.f32 %v6644_v54, %v3094_v31  ;;  %v3096_v54 = vadd.f32 %v6691_v23, %v6766_v56  ;;  %v3547_v23 = vld [vmem:[%s7009_s3 + $0x3f0] sm:$0xff] }
 0x242   :  { %3633 = vmatmul.f32.gmra.mxu2 %v6397_v1  ;;  %v3490_v24 = vld [vmem:[%s7009_s3 + $0x228] sm:$0xff]  ;;  %v6810_v7 = vpop.f32.mrf.mxu2  ;;  %3678 = vmatpush.msrb.mxu0 %v3491_v30 }
 0x243   :  { %3662 = vmatmul.f32.gmra.mxu3 %v6428_v17  ;;  %v3506_v1 = vld [vmem:[%s7009_s3 + $0x2a8] sm:$0xff]  ;;  %v3108_v17 = vadd.f32 %v6542_v33, %v3089_v4  ;;  %v6812_v8 = vpop.f32.mrf.mxu3  ;;  %3707 = vmatpush.msrb.mxu1 %v3507_v0  ;;  %v3505_v33 = vld [vmem:[%s7009_s3 + $0x2a0] sm:$0xff]  ;;  %v3115_v56 = vadd.f32 %v6693_v22, %v3096_v54  ;;  %v6914_v4 = vperm.slane %v6763_v13, 6 }
 0x244   :  { %3733 = vmatpush.msrb.mxu2 %v3526_v18  ;;  %3679 = vmatpush.msrb.mxu0 %v3490_v24  ;;  %v3202_v36 = vpop.f32.mrf.mxu0  ;;  %v6865_v55 = vpop.f32.mrf.mxu1  ;;  %v3546_v18 = vld [vmem:[%s7009_s3 + $0x3e8] sm:$0xff] }
 0x245   :  { %v3127_v27 = vadd.f32 %v6695_v25, %v3108_v17  ;;  %3708 = vmatpush.msrb.mxu1 %v3506_v1  ;;  %v3524_v25 = vld [vmem:[%s7009_s3 + $0x338] sm:$0xff]  ;;  %3756 = vmatpush.msrb.mxu3 %v3548_v2  ;;  %v3203_v22 = vadd.f32 %v3202_v36, %v6914_v4  ;;  %v3545_v1 = vld [vmem:[%s7009_s3 + $0x3e0] sm:$0xff] }
 0x246   :  { %3734 = vmatpush.msrb.mxu2 %v3525_v44  ;;  %3680 = vmatpush.msrb.mxu0 %v3489_v9  ;;  %v3544_v17 = vld [vmem:[%s7009_s3 + $0x3d8] sm:$0xff] }
 0x247   :  { %3709 = vmatpush.msrb.mxu1 %v3505_v33  ;;  %v3146_v48 = vadd.f32 %v6697_v28, %v3127_v27  ;;  %v3110_v28 = vadd.f32 %v6597_v45, %v3091_v19  ;;  %v3522_v45 = vld [vmem:[%s7009_s3 + $0x328] sm:$0xff]  ;;  %3757 = vmatpush.msrb.mxu3 %v3547_v23 }
 0x248   :  { %3681 = vmatpush.msrb.mxu0 %v3488_v21  ;;  %3735 = vmatpush.msrb.mxu2 %v3524_v25  ;;  %v3540_v25 = vld [vmem:[%s7009_s3 + $0x3b8] sm:$0xff] }
 0x249   :  { %3578 = vmatmul.f32.gmra.mxu0 %v6327_v40  ;;  %3607 = vmatmul.f32.gmra.mxu1 %v6356_v3  ;;  %v3503_v40 = vld [vmem:[%s7009_s3 + $0x290] sm:$0xff] }
 0x24a   :  { %3636 = vmatmul.f32.gmra.mxu2 %v6407_v46  ;;  %3710 = vmatpush.msrb.mxu1 %v3504_v10  ;;  %v3523_v3 = vld [vmem:[%s7009_s3 + $0x330] sm:$0xff]  ;;  %v3165_v46 = vadd.f32 %v6721_v14, %v3146_v48  ;;  %v6855_v32 = vpop.f32.mrf.mxu2  ;;  %v3129_v14 = vadd.f32 %v6728_v38, %v3110_v28  ;;  %v3521_v38 = vld [vmem:[%s7009_s3 + $0x320] sm:$0xff] }
 0x24b   :  { %3665 = vmatmul.f32.gmra.mxu3 %v6434_v63  ;;  %v6857_v63 = vpop.f32.mrf.mxu3  ;;  %3682 = vmatpush.msrb.mxu0 %v3487_v29  ;;  %v3541_v10 = vld [vmem:[%s7009_s3 + $0x3c0] sm:$0xff]  ;;  %v3539_v29 = vld [vmem:[%s7009_s3 + $0x3b0] sm:$0xff] }
 0x24c   :  { %3711 = vmatpush.msrb.mxu1 %v3503_v40  ;;  %3736 = vmatpush.msrb.mxu2 %v3523_v3  ;;  %v3184_v15 = vadd.f32 %v6723_v39, %v3165_v46  ;;  %v3148_v47 = vadd.f32 %v6730_v62, %v3129_v14  ;;  %v3204_v5 = vpop.f32.mrf.mxu0  ;;  %v3223_v62 = vpop.f32.mrf.mxu1  ;;  %v3536_v14 = vld [vmem:[%s7009_s3 + $0x398] sm:$0xff] }
 0x24d   :  { %3683 = vmatpush.msrb.mxu0 %v3486_v53  ;;  %3758 = vmatpush.msrb.mxu3 %v3546_v18  ;;  %v3205_v48 = vadd.f32 %v3204_v5, %v6914_v4 }
 0x24e   :  { %3712 = vmatpush.msrb.mxu1 %v3502_v35  ;;  %3737 = vmatpush.msrb.mxu2 %v3522_v45  ;;  %v3167_v39 = vadd.f32 %v6768_v58, %v3148_v47  ;;  %v3538_v35 = vld [vmem:[%s7009_s3 + $0x3a8] sm:$0xff]  ;;  %v3537_v45 = vld [vmem:[%s7009_s3 + $0x3a0] sm:$0xff] }
 0x24f   :  { %3684 = vmatpush.msrb.mxu0 %v3485_v37  ;;  %3759 = vmatpush.msrb.mxu3 %v3545_v1  ;;  %v3535_v37 = vld [vmem:[%s7009_s3 + $0x390] sm:$0xff] }
 0x250   :  { %3713 = vmatpush.msrb.mxu1 %v3501_v12  ;;  %3738 = vmatpush.msrb.mxu2 %v3521_v38  ;;  %v3186_v58 = vadd.f32 %v6770_v59, %v3167_v39  ;;  %v3534_v39 = vld [vmem:[%s7009_s3 + $0x388] sm:$0xff] }
 0x251   :  { %3685 = vmatmul.f32.vlgmr.msrb.gmra.mxu0 %v6510_v49  ;;  %3714 = vmatmul.f32.vlgmr.msrb.gmra.mxu1 %v3184_v15  ;;  %v3132_v49 = vadd.f32 %v6775_v57, %v3113_v52 }
 0x252   :  { %v3240_v51 = vpop.f32.mrf.mxu2  ;;  %3739 = vmatpush.msrb.mxu2 %v3520_v41  ;;  %3760 = vmatpush.msrb.mxu3 %v3544_v17 }
 0x253   :  { %v3259_v16 = vpop.f32.mrf.mxu3  ;;  %v3151_v57 = vadd.f32 %v6777_v60, %v3132_v49 }
 0x254   :  { %3740 = vmatpush.msrb.mxu2 %v3519_v34  ;;  %v3207_v0 = vpop.f32.mrf.mxu0  ;;  %v3226_v60 = vpop.f32.mrf.mxu1  ;;  %v3533_v34 = vld [vmem:[%s7009_s3 + $0x380] sm:$0xff] }
 0x255   :  { %v3170_v59 = vadd.f32 %v6810_v7, %v3151_v57  ;;  %v3208_v36 = vadd.f32 %v3207_v0, %v6914_v4 }
 0x256   :  { %3741 = vmatpush.msrb.mxu2 %v3518_v26 }
 0x257   :  { %v3189_v24 = vadd.f32 %v6812_v8, %v3170_v59  ;;  %v3543_v8 = vld [vmem:[%s7009_s3 + $0x3d0] sm:$0xff]  ;;  %v3227_v31 = vadd.f32 %v3226_v60, %v3208_v36 }
 0x258   :  { %3742 = vmatpush.msrb.mxu2 %v3517_v61  ;;  %3761 = vmatpush.msrb.mxu3 %v3543_v8 }
 0x259   :  { %3688 = vmatmul.f32.gmra.mxu0 %v6569_v20  ;;  %3717 = vmatmul.f32.gmra.mxu1 %v3186_v58  ;;  %v3134_v20 = vadd.f32 %v6817_v42, %v3115_v56  ;;  %v3222_v42 = vadd.f32 %v6865_v55, %v3203_v22 }
 0x25a   :  { %v3242_v6 = vpop.f32.mrf.mxu2 }
 0x25b   :  { %v3261_v30 = vpop.f32.mrf.mxu3  ;;  %v3153_v7 = vadd.f32 %v6819_v11, %v3134_v20  ;;  %v3542_v11 = vld [vmem:[%s7009_s3 + $0x3c8] sm:$0xff]  ;;  %v3241_v21 = vadd.f32 %v3240_v51, %v3222_v42 }
 0x25c   :  { %v3209_v27 = vpop.f32.mrf.mxu0  ;;  %v3228_v19 = vpop.f32.mrf.mxu1  ;;  %3762 = vmatpush.msrb.mxu3 %v3542_v11 }
 0x25d   :  { %v3172_v44 = vadd.f32 %v6855_v32, %v3153_v7  ;;  %v3260_v40 = vadd.f32 %v3259_v16, %v3241_v21  ;;  %v3210_v5 = vadd.f32 %v3209_v27, %v6914_v4 }
 0x25e   :  { %3763 = vmatpush.msrb.mxu3 %v3541_v10 }
 0x25f   :  { %v3229_v61 = vadd.f32 %v3228_v19, %v3210_v5 }
 0x260   :  { %3764 = vmatpush.msrb.mxu3 %v3540_v25 }
 0x261   :  { %3691 = vmatmul.f32.gmra.mxu0 %v6612_v43  ;;  %3720 = vmatmul.f32.gmra.mxu1 %v3189_v24  ;;  %v3191_v43 = vadd.f32 %v6857_v63, %v3172_v44  ;;  %v3224_v63 = vadd.f32 %v3223_v62, %v3205_v48 }
 0x262   :  { %v3245_v9 = vpop.f32.mrf.mxu2  ;;  %3765 = vmatpush.msrb.mxu3 %v3539_v29 }
 0x263   :  { %v3264_v33 = vpop.f32.mrf.mxu3  ;;  %v3246_v51 = vadd.f32 %v3245_v9, %v3227_v31 }
 0x264   :  { %v3278_v46 = vpop.f32.mrf.mxu0  ;;  %v3297_v32 = vpop.f32.mrf.mxu1  ;;  %3766 = vmatpush.msrb.mxu3 %v3538_v35 }
 0x265   :  { %v3279_v53 = vadd.f32 %v3278_v46, %v3260_v40  ;;  %v3265_v62 = vadd.f32 %v3264_v33, %v3246_v51 }
 0x266   :  { %3767 = vmatpush.msrb.mxu3 %v3537_v45 }
 0x267   :  { %v3298_v55 = vadd.f32 %v3297_v32, %v3279_v53 }
 0x268   :  { %3768 = vmatpush.msrb.mxu3 %v3536_v14 }
 0x269   :  { %3694 = vmatmul.f32.gmra.mxu0 %v6671_v50  ;;  %3723 = vmatmul.f32.gmra.mxu1 %v3191_v43  ;;  %v3243_v50 = vadd.f32 %v3242_v6, %v3224_v63 }
 0x26a   :  { %v3247_v3 = vpop.f32.mrf.mxu2  ;;  %3743 = vmatmul.f32.vlgmr.msrb.gmra.mxu2 %v3298_v55  ;;  %3769 = vmatpush.msrb.mxu3 %v3535_v37 }
 0x26b   :  { %v3266_v28 = vpop.f32.mrf.mxu3  ;;  %v3262_v12 = vadd.f32 %v3261_v30, %v3243_v50  ;;  %v3248_v57 = vadd.f32 %v3247_v3, %v3229_v61  ;;  %v520_v30 = vperm.slane %v6763_v13, 7  ;;  %v6148_v61 = vmov 0  }
 0x26c   :  { %v3280_v47 = vpop.f32.mrf.mxu0  ;;  %v3299_v41 = vpop.f32.mrf.mxu1  ;;  %3770 = vmatpush.msrb.mxu3 %v3534_v39  ;;  %5946 = vset.pattern.permute.xlu0 %v6148_v61 }
 0x26d   :  { %v3281_v52 = vadd.f32 %v3280_v47, %v3262_v12  ;;  %v3267_v56 = vadd.f32 %v3266_v28, %v3248_v57  ;;  %5950 = vset.pattern.permute.xlu1 %v6148_v61 }
 0x26e   :  { %3771 = vmatpush.msrb.mxu3 %v3533_v34 }
 0x26f   :  { %v3300_v16 = vadd.f32 %v3299_v41, %v3281_v52 }
 0x272   :  { %v3316_v15 = vpop.f32.mrf.mxu2  ;;  %3746 = vmatmul.f32.gmra.mxu2 %v3300_v16 }
 0x273   :  { %v3335_v38 = vpop.f32.mrf.mxu3  ;;  %v3317_v18 = vadd.f32 %v3316_v15, %v520_v30 }
 0x274   :  { %v3283_v54 = vpop.f32.mrf.mxu0  ;;  %v3302_v58 = vpop.f32.mrf.mxu1 }
 0x275   :  { %v3284_v2 = vadd.f32 %v3283_v54, %v3265_v62  ;;  %v3336_v1 = vadd.f32 %v3335_v38, %v3317_v18 }
 0x277   :  { %v3303_v23 = vadd.f32 %v3302_v58, %v3284_v2  ;;  %v6147_v58 = vmov 1  }
 0x278   :  { %5947 = vset.pattern.permute.xlu2 %v6147_v58 }
 0x27a   :  { %v3318_v49 = vpop.f32.mrf.mxu2  ;;  %3749 = vmatmul.f32.gmra.mxu2 %v3303_v23 }
 0x27b   :  { %v3337_v26 = vpop.f32.mrf.mxu3  ;;  %v3319_v44 = vadd.f32 %v3318_v49, %v520_v30 }
 0x27c   :  { %v3285_v0 = vpop.f32.mrf.mxu0  ;;  %v3304_v60 = vpop.f32.mrf.mxu1 }
 0x27d   :  { %v3286_v20 = vadd.f32 %v3285_v0, %v3267_v56  ;;  %v3338_v27 = vadd.f32 %v3337_v26, %v3319_v44  ;;  %v5956_v56 = vld [vmem:[#allocation8] ss:$0 sm:$0xff] }
 0x27f   :  { %v3305_v4 = vadd.f32 %v3304_v60, %v3286_v20 }
 0x282   :  { %v3321_v59 = vpop.f32.mrf.mxu2  ;;  %3752 = vmatmul.f32.gmra.mxu2 %v3305_v4 }
 0x283   :  { %v3340_v6 = vpop.f32.mrf.mxu3  ;;  %v3322_v10 = vadd.f32 %v3321_v59, %v520_v30 }
 0x285   :  { %v3341_v40 = vadd.f32 %v3340_v6, %v3322_v10 }
 0x286   :  { %v3354_v17 = vpop.f32.mrf.mxu0 }
 0x287   :  { %v3355_v8 = vadd.f32 %v3354_v17, %v3336_v1 }
 0x288   :  { %v3373_v7 = vpop.f32.mrf.mxu1 }
 0x289   :  { %v3374_v42 = vadd.f32 %v3373_v7, %v3355_v8 }
 0x28a   :  { %v3323_v24 = vpop.f32.mrf.mxu2 }
 0x28b   :  { %v3342_v22 = vpop.f32.mrf.mxu3  ;;  %v3324_v53 = vadd.f32 %v3323_v24, %v520_v30 }
 0x28d   :  { %v3343_v55 = vadd.f32 %v3342_v22, %v3324_v53 }
 0x28e   :  { %v3356_v11 = vpop.f32.mrf.mxu0 }
 0x28f   :  { %v3357_v21 = vadd.f32 %v3356_v11, %v3338_v27 }
 0x290   :  { %v3375_v13 = vpop.f32.mrf.mxu1 }
 0x291   :  { %v3376_v25 = vadd.f32 %v3375_v13, %v3357_v21 }
 0x292   :  { %v3392_v9 = vpop.f32.mrf.mxu2 }
 0x293   :  { %v3411_v33 = vpop.f32.mrf.mxu3  ;;  %v3393_v19 = vadd.f32 %v3392_v9, %v3374_v42 }
 0x295   :  { %v3412_v43 = vadd.f32 %v3411_v33, %v3393_v19 }
 0x297   :  { %3772 = vmatmul.f32.vlgmr.msrb.gmra.mxu3 %v3412_v43 }
 0x29a   :  { %v3394_v48 = vpop.f32.mrf.mxu2 }
 0x29b   :  { %v3413_v29 = vpop.f32.mrf.mxu3  ;;  %v3395_v3 = vadd.f32 %v3394_v48, %v3376_v25 }
 0x29d   :  { %v3414_v46 = vadd.f32 %v3413_v29, %v3395_v3 }
 0x29e   :  { %v3359_v28 = vpop.f32.mrf.mxu0  ;;  %v3378_v63 = vpop.f32.mrf.mxu1 }
 0x29f   :  { %v3360_v32 = vadd.f32 %v3359_v28, %v3341_v40  ;;  %3775 = vmatmul.f32.gmra.mxu3 %v3414_v46 }
 0x2a1   :  { %v3379_v35 = vadd.f32 %v3378_v63, %v3360_v32 }
 0x2a5   :  { %v3397_v50 = vpop.f32.mrf.mxu2 }
 0x2a6   :  { %v3416_v36 = vpop.f32.mrf.mxu3  ;;  %v3398_v45 = vadd.f32 %v3397_v50, %v3379_v35  ;;  %v3361_v14 = vpop.f32.mrf.mxu0 }
 0x2a7   :  { %v3362_v12 = vadd.f32 %v3361_v14, %v3343_v55  ;;  %v3380_v31 = vpop.f32.mrf.mxu1 }
 0x2a8   :  { %v3417_v37 = vadd.f32 %v3416_v36, %v3398_v45  ;;  %v6149_v45 = vmov 2  }
 0x2a9   :  { %v3381_v15 = vadd.f32 %v3380_v31, %v3362_v12 }
 0x2aa   :  { %3778 = vmatmul.f32.gmra.mxu3 %v3417_v37 }
 0x2ad   :  { %v3399_v38 = vpop.f32.mrf.mxu2 }
 0x2ae   :  { %v3400_v47 = vadd.f32 %v3399_v38, %v3381_v15  ;;  %v3418_v41 = vpop.f32.mrf.mxu3  ;;  %v3570_v39 = vpop.f32.mrf.mxu0 }
 0x2af   :  { %v3599_v51 = vpop.f32.mrf.mxu1  ;;  %v3571_v6 = vadd.f32 %v5956_v56, %v3570_v39 }
 0x2b0   :  { %v3419_v52 = vadd.f32 %v3418_v41, %v3400_v47 }
 0x2b1   :  { %v3600_v20 = vadd.f32 %v3599_v51, %v3571_v6 }
 0x2b2   :  { %3781 = vmatmul.f32.gmra.mxu3 %v3419_v52 }
 0x2b5   :  { %v3628_v16 = vpop.f32.mrf.mxu2 }
 0x2b6   :  { %v3573_v34 = vpop.f32.mrf.mxu0  ;;  %v3657_v62 = vpop.f32.mrf.mxu3  ;;  %v3629_v4 = vadd.f32 %v3628_v16, %v3600_v20 }
 0x2b7   :  { %v3602_v5 = vpop.f32.mrf.mxu1  ;;  %v3574_v18 = vadd.f32 %v5956_v56, %v3573_v34 }
 0x2b8   :  { %v3658_v1 = vadd.f32 %v3657_v62, %v3629_v4  ;;  %v3791_v62 = vld [vmem:[#allocation10] ss:$4 sm:$0x3] }
 0x2b9   :  { %v3603_v7 = vadd.f32 %v3602_v5, %v3574_v18  ;;  %v3814_v61 = vperm.slane %v3791_v62, 1 }
 0x2bd   :  { %v3631_v49 = vpop.f32.mrf.mxu2 }
 0x2be   :  { %v3576_v26 = vpop.f32.mrf.mxu0  ;;  %v3660_v2 = vpop.f32.mrf.mxu3  ;;  %v3632_v42 = vadd.f32 %v3631_v49, %v3603_v7  ;;  %v3839_v49 = vld [vmem:[#allocation10 + $0x1] ss:$4 sm:$0x3] }
 0x2bf   :  { %v3605_v54 = vpop.f32.mrf.mxu1  ;;  %v3577_v9 = vadd.f32 %v5956_v56, %v3576_v26  ;;  %v3790_v26 = vld [vmem:[#allocation11] sm:$0x3] }
 0x2c0   :  { %v3661_v27 = vadd.f32 %v3660_v2, %v3632_v42  ;;  %v3878_v2 = vld [vmem:[#allocation10 + $0x2] ss:$4 sm:$0x3]  ;;  %v3827_v6 = vperm.slane %v3790_v26, 1 }
 0x2c1   :  { %v3606_v21 = vadd.f32 %v3605_v54, %v3577_v9  ;;  %v3813_v54 = vperm.slane %v3791_v62, 0 }
 0x2c5   :  { %v3634_v57 = vpop.f32.mrf.mxu2 }
 0x2c6   :  { %v3579_v23 = vpop.f32.mrf.mxu0  ;;  %v3663_v30 = vpop.f32.mrf.mxu3  ;;  %v3635_v48 = vadd.f32 %v3634_v57, %v3606_v21 }
 0x2c7   :  { %v3608_v59 = vpop.f32.mrf.mxu1  ;;  %v3580_v40 = vadd.f32 %v5956_v56, %v3579_v23  ;;  %v3857_v23 = vperm.slane %v3839_v49, 0  ;;  %v3858_v56 = vperm.slane %v3839_v49, 1 }
 0x2c8   :  { %v3664_v28 = vadd.f32 %v3663_v30, %v3635_v48 }
 0x2c9   :  { %v3609_v63 = vadd.f32 %v3608_v59, %v3580_v40  ;;  %v3826_v59 = vperm.slane %v3790_v26, 0 }
 0x2cd   :  { %v3637_v0 = vpop.f32.mrf.mxu2 }
 0x2ce   :  { %v3686_v60 = vpop.f32.mrf.mxu0  ;;  %v3666_v17 = vpop.f32.mrf.mxu3  ;;  %v3638_v55 = vadd.f32 %v3637_v0, %v3609_v63  ;;  %v6991_v0 = vperm.slane %v3878_v2, 0 }
 0x2cf   :  { %v3715_v24 = vpop.f32.mrf.mxu1  ;;  %v3687_v8 = vadd.f32 %v3686_v60, %v3658_v1  ;;  %v6993_v60 = vperm.slane %v3878_v2, 1 }
 0x2d0   :  { %v3667_v12 = vadd.f32 %v3666_v17, %v3638_v55 }
 0x2d1   :  { %v3716_v33 = vadd.f32 %v3715_v24, %v3687_v8 }
 0x2d6   :  { %v3689_v44 = vpop.f32.mrf.mxu0 }
 0x2d7   :  { %v3718_v19 = vpop.f32.mrf.mxu1  ;;  %v3690_v10 = vadd.f32 %v3689_v44, %v3661_v27 }
 0x2d9   :  { %v3719_v3 = vadd.f32 %v3718_v19, %v3690_v10 }
 0x2de   :  { %v3692_v29 = vpop.f32.mrf.mxu0 }
 0x2df   :  { %v3693_v53 = vadd.f32 %v3692_v29, %v3664_v28  ;;  %v3721_v50 = vpop.f32.mrf.mxu1 }
 0x2e1   :  { %v3722_v14 = vadd.f32 %v3721_v50, %v3693_v53 }
 0x2e6   :  { %v3695_v37 = vpop.f32.mrf.mxu0 }
 0x2e7   :  { %v3696_v38 = vadd.f32 %v3695_v37, %v3667_v12  ;;  %v3724_v41 = vpop.f32.mrf.mxu1 }
 0x2e9   :  { %v3725_v39 = vadd.f32 %v3724_v41, %v3696_v38 }
 0x2ed   :  { %v3744_v22 = vpop.f32.mrf.mxu2 }
 0x2ee   :  { %v3745_v11 = vadd.f32 %v3744_v22, %v3716_v33 }
 0x2f5   :  { %v3747_v13 = vpop.f32.mrf.mxu2 }
 0x2f6   :  { %v3748_v46 = vadd.f32 %v3747_v13, %v3719_v3 }
 0x2fd   :  { %v3750_v36 = vpop.f32.mrf.mxu2 }
 0x2fe   :  { %v3751_v31 = vadd.f32 %v3750_v36, %v3722_v14 }
 0x305   :  { %v3753_v52 = vpop.f32.mrf.mxu2 }
 0x306   :  { %v3754_v51 = vadd.f32 %v3753_v52, %v3725_v39 }
 0x31a   :  { %v3773_v43 = vpop.f32.mrf.mxu3 }
 0x31b   :  { %v3774_v25 = vadd.f32 %v3773_v43, %v3745_v11 }
 0x31d   :  { %3786 = vst.msk [vmem:[%s7013_s7] sm:$0xff] %vm3785_vm0, %v3774_v25  ;;  %3841 = vperm.xlu2 %5947, %v3774_v25   ;;  %3794 = vperm.xlu0 %5946, %v3774_v25  }
 0x322   :  { %v3776_v32 = vpop.f32.mrf.mxu3 }
 0x323   :  { %v3777_v35 = vadd.f32 %v3776_v32, %v3748_v46 }
 0x325   :  { %3787 = vst.msk [vmem:[%s7013_s7 + $0x8] sm:$0xff] %vm3785_vm0, %v3777_v35  ;;  %5948 = vset.pattern.permute.xlu2 %v6149_v45  ;;  %3799 = vperm.xlu0 %5946, %v3777_v35  }
 0x326   :  { %3880 = vperm.xlu2 %5948, %v3774_v25  }
 0x32d   :  { %v3779_v15 = vpop.f32.mrf.mxu3  ;;  %5951 = vset.pattern.permute.xlu0 %v6147_v58 }
 0x32e   :  { %v3780_v47 = vadd.f32 %v3779_v15, %v3751_v31  ;;  %5949 = vset.pattern.permute.xlu2 %v6147_v58 }
 0x32f   :  { %3845 = vperm.xlu2 %5949, %v3777_v35  }
 0x330   :  { %3788 = vst.msk [vmem:[%s7013_s7 + $0x10] sm:$0xff] %vm3785_vm0, %v3780_v47  ;;  %3804 = vperm.xlu1 %5950, %v3780_v47   ;;  %3849 = vperm.xlu0 %5951, %v3780_v47  }
 0x335   :  { %v3782_v16 = vpop.f32.mrf.mxu3 }
 0x336   :  { %v3783_v34 = vadd.f32 %v3782_v16, %v3754_v51 }
 0x337   :  { %5954 = vset.pattern.permute.xlu2 %v6149_v45 }
 0x338   :  { %3789 = vst.msk [vmem:[%s7013_s7 + $0x18] sm:$0xff] %vm3785_vm0, %v3783_v34  ;;  %3809 = vperm.xlu1 %5950, %v3783_v34   ;;  %5955 = vset.pattern.permute.xlu0 %v6149_v45  ;;  %s6150_s7 = smov [#allocation13]  }
 0x339   :  { %3892 = vperm.xlu0 %5955, %v3783_v34   ;;  %3888 = vperm.xlu2 %5954, %v3780_v47   ;;  %s3930_s21 = sshll.u32 %s6150_s7, 4  ;;  %s3931_s21 = int_to_ptr.vmem [resolvable:$true] %s3930_s21 }
 0x340   :  { %5952 = vset.pattern.permute.xlu1 %v6147_v58 }
 0x341   :  { %3853 = vperm.xlu1 %5952, %v3783_v34  }
 0x349   :  { %5953 = vset.pattern.permute.xlu1 %v6149_v45 }
 0x34a   :  { %3884 = vperm.xlu1 %5953, %v3777_v35  }
 0x377   :  { %v3842_v5 = vpop.permute.xlu2 %3841 }
 0x378   :  { %v3861_v4 = vmul.f32 %v3857_v23, %v3842_v5  ;;  %v3862_v18 = vmul.f32 %v3858_v56, %v3842_v5 }
 0x380   :  { %v3881_v57 = vpop.permute.xlu2 %3880 }
 0x381   :  { %v3900_v1 = vmul.f32 %v6991_v0, %v3881_v57  ;;  %v3901_v17 = vmul.f32 %v6993_v60, %v3881_v57 }
 0x389   :  { %v3846_v9 = vpop.permute.xlu2 %3845 }
 0x38a   :  { %v3863_v34 = vmul.f32 %v3857_v23, %v3846_v9  ;;  %v3864_v5 = vmul.f32 %v3858_v56, %v3846_v9 }
 0x38f   :  { %v3795_v30 = vpop.permute.xlu0 %3794 }
 0x390   :  { %v3817_v58 = vmul.f32 %v3813_v54, %v3795_v30  ;;  %v3818_v20 = vmul.f32 %v3814_v61, %v3795_v30 }
 0x392   :  { %v3830_v24 = vadd.f32 %v3826_v59, %v3817_v58  ;;  %v3831_v22 = vadd.f32 %v3827_v6, %v3818_v20 }
 0x393   :  { %v3889_v43 = vpop.permute.xlu2 %3888 }
 0x394   :  { %v3869_v7 = vadd.f32 %v3861_v4, %v3830_v24  ;;  %v3870_v8 = vadd.f32 %v3862_v18, %v3831_v22  ;;  %v3904_v29 = vmul.f32 %v6991_v0, %v3889_v43  ;;  %v3905_v40 = vmul.f32 %v6993_v60, %v3889_v43 }
 0x396   :  { %v3908_v44 = vadd.f32 %v3900_v1, %v3869_v7  ;;  %v3909_v42 = vadd.f32 %v3901_v17, %v3870_v8 }
 0x397   :  { %v3800_v33 = vpop.permute.xlu0 %3799 }
 0x398   :  { %3916 = vst [vmem:[#allocation13] sm:$0xff] %v3908_v44  ;;  %v3819_v12 = vmul.f32 %v3813_v54, %v3800_v33  ;;  %v3820_v31 = vmul.f32 %v3814_v61, %v3800_v33 }
 0x399   :  { %3917 = vst [vmem:[#allocation13 + $0x8] sm:$0xff] %v3909_v42 }
 0x39a   :  { %v3832_v51 = vadd.f32 %v3826_v59, %v3819_v12  ;;  %v3833_v16 = vadd.f32 %v3827_v6, %v3820_v31 }
 0x39c   :  { %v3871_v49 = vadd.f32 %v3863_v34, %v3832_v51  ;;  %v3872_v26 = vadd.f32 %v3864_v5, %v3833_v16 }
 0x3a2   :  { %v3805_v27 = vpop.permute.xlu1 %3804  ;;  %v3850_v13 = vpop.permute.xlu0 %3849 }
 0x3a3   :  { %v3821_v19 = vmul.f32 %v3813_v54, %v3805_v27  ;;  %v3822_v11 = vmul.f32 %v3814_v61, %v3805_v27  ;;  %v3865_v21 = vmul.f32 %v3857_v23, %v3850_v13  ;;  %v3866_v10 = vmul.f32 %v3858_v56, %v3850_v13 }
 0x3a5   :  { %v3834_v25 = vadd.f32 %v3826_v59, %v3821_v19  ;;  %v3835_v48 = vadd.f32 %v3827_v6, %v3822_v11 }
 0x3a7   :  { %v3873_v3 = vadd.f32 %v3865_v21, %v3834_v25  ;;  %v3874_v28 = vadd.f32 %v3866_v10, %v3835_v48 }
 0x3a9   :  { %v3912_v46 = vadd.f32 %v3904_v29, %v3873_v3  ;;  %v3913_v32 = vadd.f32 %v3905_v40, %v3874_v28 }
 0x3aa   :  { %v3810_v63 = vpop.permute.xlu1 %3809 }
 0x3ab   :  { %3920 = vst [vmem:[#allocation13 + $0x20] sm:$0xff] %v3912_v46  ;;  %v3823_v53 = vmul.f32 %v3813_v54, %v3810_v63  ;;  %v3824_v35 = vmul.f32 %v3814_v61, %v3810_v63  ;;  %v3893_v50 = vpop.permute.xlu0 %3892 }
 0x3ac   :  { %3921 = vst [vmem:[#allocation13 + $0x28] sm:$0xff] %v3913_v32  ;;  %v3906_v15 = vmul.f32 %v6991_v0, %v3893_v50  ;;  %v3907_v38 = vmul.f32 %v6993_v60, %v3893_v50 }
 0x3ad   :  { %v3836_v55 = vadd.f32 %v3826_v59, %v3823_v53  ;;  %v3837_v45 = vadd.f32 %v3827_v6, %v3824_v35 }
 0x3b3   :  { %v3854_v36 = vpop.permute.xlu1 %3853 }
 0x3b4   :  { %v3867_v14 = vmul.f32 %v3857_v23, %v3854_v36  ;;  %v3868_v37 = vmul.f32 %v3858_v56, %v3854_v36 }
 0x3b6   :  { %v3875_v47 = vadd.f32 %v3867_v14, %v3836_v55  ;;  %v3876_v41 = vadd.f32 %v3868_v37, %v3837_v45 }
 0x3b8   :  { %v3914_v52 = vadd.f32 %v3906_v15, %v3875_v47  ;;  %v3915_v39 = vadd.f32 %v3907_v38, %v3876_v41 }
 0x3ba   :  { %3922 = vst [vmem:[#allocation13 + $0x30] sm:$0xff] %v3914_v52 }
 0x3bb   :  { %3923 = vst [vmem:[#allocation13 + $0x38] sm:$0xff] %v3915_v39 }
 0x3bc   :  { %v3885_v62 = vpop.permute.xlu1 %3884 }
 0x3bd   :  { %v3902_v54 = vmul.f32 %v6991_v0, %v3885_v62  ;;  %v3903_v61 = vmul.f32 %v6993_v60, %v3885_v62 }
 0x3bf   :  { %v3910_v2 = vadd.f32 %v3902_v54, %v3871_v49  ;;  %v3911_v57 = vadd.f32 %v3903_v61, %v3872_v26 }
 0x3c1   :  { %3918 = vst [vmem:[#allocation13 + $0x10] sm:$0xff] %v3910_v2 }
 0x3c2   :  { %3919 = vst [vmem:[#allocation13 + $0x18] sm:$0xff] %v3911_v57 }
 0x3c3   :  { %3938 = dma.vmem_to_hbm [thread:$0]  %s3931_s21, 1024, %s3933_s23, [#allocation4], %s6151_s24, %s6151_s24, %s6152_s25  }
 0x3c4   :  { %6135 = dma.done.wait [#allocation4], 1024  }
 0x3c5   :  { %6136 = vsyncadd [#allocation4], 4294966272 }
 0x3c6   :  { %3945 = vsyncpa [#allocation3], 1 }
 0x3c7   :  { %3946 = vsyncpa [#allocation6], 1 }
 0x3c8   :  { %3947 = vsyncpa [#allocation9], 1 }
 0x3c9   :  { %3948 = vsyncpa [#allocation12], 1 }
 0x3ca   :  { %3949 = vsyncpa [#allocation4], 1 }

</bundles_post_ra>
